<compile_context>
chip_gen: v5e
topology: v5e:2x2
jax: 0.10.0
libtpu: 0.0.40
codegen_flags: <defaults>
</compile_context>

<pallas_src>
import jax
import jax.numpy as jnp
import numpy as np
from jax.experimental import pallas as pl
from jax.experimental.pallas import tpu as pltpu

# --- hyperparameters (module __init__) ------------------------------------
INPUT_SIZE = 32        # E
HIDDEN_SIZE = 32       # H
PROJECTION_SIZE = 32   # P (module implicitly requires P == E for its output buffer)
MAXPOOL = False        # module default
MAXPOOL_K = 3 if MAXPOOL else 1
OUT_DIM = PROJECTION_SIZE // MAXPOOL_K
OUT_W = 4 * OUT_DIM    # packed output width (4 words per 128-lane row)

# matmul operand dtype: bf16 on the MXU with f32 accumulation.
MM_DTYPE = jnp.bfloat16


def _round_up(v: int, m: int) -> int:
    return -(-v // m) * m


# --- Pallas kernel: one grid step == one tile of packed word rows -----------
def _make_kernel(R: int, L: int):
    H = HIDDEN_SIZE
    GW = 4 * H            # 128 = packed lane width (4 words x H) = one gate block
    GS = 4 * GW           # 512 = all four gates [i|f|o|g], gate-major

    def kernel(x_ref, len_ref, wg_ref, wp_ref, b_ref, out_ref, gates_ref):
        # x_ref    : (L*R, GW)     bf16  timestep-major: row t*R + r = packed row r, step t
        # len_ref  : (R, GW)       int32 word lengths, broadcast over each word's H lanes
        # wg_ref   : (GW, 3*GS)    bf16  [W_in_f | W_hh_f | W_in_b], block-expanded
        # wp_ref   : (2*GW, 4*P)   bf16  block-expanded projection weight
        # b_ref    : (1, 2*GS+4*P) f32   [b_f | b_b | b_proj], expanded
        # out_ref  : (R, OUT_W)    f32   4 words packed per row (lane-dense store)
        # gates_ref: (L*R, GS)     f32   VMEM scratch for the hoisted input-gate matmul
        lens = len_ref[...]                                   # (R, GW) int32

        # ---- hoisted input-gate matmul: ONE (L*R,128)@(128,512) bf16 MXU op for
        # every packed row and every timestep, parked in VMEM scratch so the serial
        # recurrence only reads one (R, 512) slab per step.
        gates_ref[...] = (
            jnp.dot(x_ref[...], wg_ref[:, 0:GS], preferred_element_type=jnp.float32)
            + b_ref[:, 0:GS])

        w_hh = wg_ref[:, GS:2 * GS]                           # (GW, GS), fwd recurrent

        h = jnp.zeros((R, GW), jnp.float32)
        c = jnp.zeros((R, GW), jnp.float32)
        x_last = jnp.zeros((R, GW), MM_DTYPE)                 # x at each word's last valid step

        # ---- packed-sequence forward recurrence (padded steps never touch the
        # state).  Gate-major layout [i|f|o|g] keeps the three sigmoids one
        # contiguous slab and every elementwise op at full 128-lane width.
        for t in range(L):
            g_t = gates_ref[pl.ds(t * R, R), :] + jnp.dot(
                h.astype(MM_DTYPE), w_hh, preferred_element_type=jnp.float32)
            sig = jax.nn.sigmoid(g_t[:, :3 * GW])
            i_g = sig[:, 0 * GW:1 * GW]
            f_g = sig[:, 1 * GW:2 * GW]
            o_g = sig[:, 2 * GW:3 * GW]
            g_g = jnp.tanh(g_t[:, 3 * GW:])
            c_new = f_g * c + i_g * g_g
            h_new = o_g * jnp.tanh(c_new)
            live = lens > t                                   # (R, GW) bool
            h = jnp.where(live, h_new, h)
            c = jnp.where(live, c_new, c)
            x_last = jnp.where(live, x_ref[pl.ds(t * R, R), :], x_last)

        # ---- reverse direction at t = len-1: ONE step from a zero state, so no
        # recurrent matmul and no f*c term (both exactly zero); a single
        # (R,128)@(128,512) matmul on the tracked x_last.
        gb = (jnp.dot(x_last, wg_ref[:, 2 * GS:3 * GS],
                      preferred_element_type=jnp.float32)
              + b_ref[:, GS:2 * GS])
        i_b = jax.nn.sigmoid(gb[:, 0 * GW:1 * GW])
        o_b = jax.nn.sigmoid(gb[:, 2 * GW:3 * GW])
        g_b = jnp.tanh(gb[:, 3 * GW:])
        h_b = o_b * jnp.tanh(i_b * g_b)

        # ---- projection (+ optional max pooling); output stays packed 4 words per
        # row, i.e. a lane-dense (R, 128) store.
        wc = jnp.concatenate([h, h_b], axis=-1).astype(MM_DTYPE)          # (R, 2*GW)
        proj = (jnp.dot(wc, wp_ref[...], preferred_element_type=jnp.float32)
                + b_ref[:, 2 * GS:])
        if MAXPOOL_K > 1:
            # TODO(synk): lane-sparse epilogue; acceptable because maxpool is off by default.
            p4 = proj.reshape(R, 4, PROJECTION_SIZE)
            proj = jnp.max(
                p4[..., :OUT_DIM * MAXPOOL_K].reshape(R, 4, OUT_DIM, MAXPOOL_K),
                axis=-1).reshape(R, 4 * OUT_DIM)
        out_ref[...] = proj.astype(out_ref.dtype)

    return kernel


# --- tile selection (VMEM budget + parallel grid steps for v7x) --------------
def _choose_tile(np_rows: int, L: int) -> int:
    GW = 4 * HIDDEN_SIZE
    # per packed row (bytes): bf16 x block (double buffered) + f32 gates scratch
    # + states / temporaries / lens / out headroom.
    per_row = L * GW * 2 * 2 + L * 4 * GW * 4 + 12 * 1024
    budget = 20 * 1024 * 1024          # well under v7x's 64 MiB physical VMEM
    vmem_rows = max(16, (budget // per_row) // 16 * 16)
    if np_rows >= 32:
        steps = 4                      # keep both v7x TensorCores busy
    elif np_rows >= 16:
        steps = 2
    else:
        steps = 1
    tile = min(vmem_rows, _round_up(-(-np_rows // steps), 16))
    return max(16, tile)


# --- parameter packing (one-time, outside the per-call path) ----------------
def pack_params(params):
    """Reorder gates to [i|f|o|g], block-expand every weight for the
    4-words-per-128-lane-group layout, pack into 3 operands, cast to bf16."""
    H, E, P = HIDDEN_SIZE, INPUT_SIZE, PROJECTION_SIZE
    assert E == H and 4 * H == 128

    def reorder(w):   # gate columns [i|f|g|o] -> [i|f|o|g]
        w = np.asarray(w)
        return np.concatenate(
            [w[..., :2 * H], w[..., 3 * H:4 * H], w[..., 2 * H:3 * H]], axis=-1)

    A_f = reorder(params["wih_f"])              # (E, 4H)
    U_f = reorder(params["whh_f"])              # (H, 4H)
    A_b = reorder(params["wih_b"])              # (E, 4H)
    b_f = reorder(params["b_f"])[0]             # (4H,)
    b_b = reorder(params["b_b"])[0]
    Wp = np.asarray(params["wproj"])            # (2H, P)
    bp = np.asarray(params["bproj"])[0]         # (P,)

    def expand_gate(A):
        # (E, 4H) -> (4E, 16H): word-slot rows, gate-major cols.
        # slot s of gate tg sits at rows [E*s, E*(s+1)) x cols [4H*tg + H*s, ... + H).
        out = np.zeros((4 * E, 16 * H), np.float32)
        for s in range(4):
            for tg in range(4):
                out[E * s:E * (s + 1),
                    4 * H * tg + H * s:4 * H * tg + H * (s + 1)] = A[:, H * tg:H * (tg + 1)]
        return out

    def expand_bias(b):   # (4H,) -> (1, 16H): gate-major, tiled over the 4 word slots
        return np.tile(b.reshape(4, 1, H), (1, 4, 1)).reshape(1, 16 * H)

    Wp_exp = np.zeros((8 * H, 4 * P), np.float32)             # (256, 4P)
    for s in range(4):
        Wp_exp[H * s:H * (s + 1), P * s:P * (s + 1)] = Wp[:H]
        Wp_exp[4 * H + H * s:4 * H + H * (s + 1), P * s:P * (s + 1)] = Wp[H:]

    w_gates = np.concatenate([expand_gate(A_f), expand_gate(U_f), expand_gate(A_b)], axis=1)
    b_all = np.concatenate([expand_bias(b_f), expand_bias(b_b),
                            np.tile(bp.reshape(1, P), (1, 4))], axis=1)

    return dict(w_gates=jnp.asarray(w_gates, MM_DTYPE),       # (128, 1536)
                w_proj=jnp.asarray(Wp_exp, MM_DTYPE),         # (256, 128)
                b_all=jnp.asarray(b_all, jnp.float32))        # (1, 1152)


# --- wrapper ---------------------------------------------------------------
@jax.jit
def embedding_network_forward(x, lengths, packed):
    """x: (B, T, L, E) float32; lengths: (B, T) int32 (each >= 1, as required by
    pack_padded_sequence); packed: output of pack_params."""
    B, T, L, E = x.shape
    H = HIDDEN_SIZE
    GW = 4 * H
    assert E == INPUT_SIZE and E == H and GW == 128

    N = B * T                                  # flattened (batch, word) rows
    NP = -(-N // 4)                            # packed rows (4 words / 128-lane row)
    tile = _choose_tile(NP, L)
    NP_pad = _round_up(max(NP, tile), tile)
    n_tiles = NP_pad // tile
    N_pad = NP_pad * 4

    # ---- relayout in XLA (one cheap HBM transpose; keeps all lane shuffles out
    # of the kernel): bf16 cast, 4 words per 128-lane group, timestep-major
    # within each row tile, padded rows use length 1 + zero embeddings.
    xw = x.reshape(N, L, E).astype(MM_DTYPE)
    lw = lengths.reshape(N).astype(jnp.int32)
    if N_pad != N:
        xw = jnp.pad(xw, ((0, N_pad - N), (0, 0), (0, 0)))
        lw = jnp.pad(lw, (0, N_pad - N), constant_values=1)
    x_packed = (xw.reshape(n_tiles, tile, 4, L, E)
                  .transpose(0, 3, 1, 2, 4)                   # (tiles, L, rows, 4, E)
                  .reshape(n_tiles * L * tile, 4 * E))        # (L*NP_pad, 128)
    lens_packed = jnp.repeat(lw.reshape(NP_pad, 4), H, axis=1)  # (NP_pad, 128)

    kernel = _make_kernel(tile, L)
    out = pl.pallas_call(
        kernel,
        out_shape=jax.ShapeDtypeStruct((NP_pad, OUT_W), jnp.float32),
        grid=(n_tiles,),
        in_specs=[
            pl.BlockSpec((L * tile, GW), lambda i: (i, 0)),                      # x (packed)
            pl.BlockSpec((tile, GW), lambda i: (i, 0)),                          # lengths
            pl.BlockSpec((GW, 12 * GW), lambda i: (0, 0)),                       # LSTM weights
            pl.BlockSpec((2 * GW, 4 * PROJECTION_SIZE), lambda i: (0, 0)),       # projection
            pl.BlockSpec((1, 8 * GW + 4 * PROJECTION_SIZE), lambda i: (0, 0)),   # biases
        ],
        out_specs=pl.BlockSpec((tile, OUT_W), lambda i: (i, 0)),
        scratch_shapes=[pltpu.VMEM((L * tile, 4 * GW), jnp.float32)],
        compiler_params=pltpu.CompilerParams(
            dimension_semantics=("parallel",),
            vmem_limit_bytes=48 * 1024 * 1024),
    )(x_packed, lens_packed, packed["w_gates"], packed["w_proj"], packed["b_all"])

    # unpack: (NP_pad, 4*OUT_DIM) -> (N, OUT_DIM) -> (B, T, OUT_DIM); free reshapes,
    # equivalent to the module's embeddings.transpose(0, 1).
    return out.reshape(NP_pad * 4, OUT_DIM)[:N].reshape(B, T, OUT_DIM)


# --- deterministic parameter init (PyTorch shapes, pre-transposed) ----------
def init_params(key):
    H, E, P = HIDDEN_SIZE, INPUT_SIZE, PROJECTION_SIZE
    ks = jax.random.split(key, 9)
    scale = 0.1

    def mk(k, shape):
        return jax.random.normal(k, shape, jnp.float32) * scale

    return dict(
        # weight_ih_l0 (4H,E), weight_hh_l0 (4H,H) -> stored transposed
        wih_f=mk(ks[0], (4 * H, E)).T,
        whh_f=mk(ks[1], (4 * H, H)).T,
        b_f=(mk(ks[2], (4 * H,)) + mk(ks[3], (4 * H,))).reshape(1, 4 * H),
        # reverse direction: whh_b never affects the output (zero initial state,
        # single step), so it is not materialized at all.
        wih_b=mk(ks[4], (4 * H, E)).T,
        b_b=(mk(ks[5], (4 * H,)) + mk(ks[6], (4 * H,))).reshape(1, 4 * H),
        wproj=mk(ks[7], (P, 2 * H)).T,
        bproj=mk(ks[8], (P,)).reshape(1, P),
    )


# --- pure-JAX reference (same math & matmul dtypes, no Pallas) ---------------
def reference_forward(x, lengths, params):
    B, T, L, E = x.shape
    H = HIDDEN_SIZE
    bf = MM_DTYPE
    wih_f = params["wih_f"].astype(bf)
    whh_f = params["whh_f"].astype(bf)
    wih_b = params["wih_b"].astype(bf)
    wproj = params["wproj"].astype(bf)
    b_f, b_b, bproj = params["b_f"], params["b_b"], params["bproj"]

    outs = []
    for i in range(T):
        xi = x[:, i].astype(bf)                      # (B, L, E)
        h = jnp.zeros((B, H), jnp.float32)
        c = jnp.zeros((B, H), jnp.float32)
        for t in range(L):
            gates = (jnp.dot(xi[:, t], wih_f, preferred_element_type=jnp.float32)
                     + jnp.dot(h.astype(bf), whh_f, preferred_element_type=jnp.float32)
                     + b_f)
            i_g = jax.nn.sigmoid(gates[:, :H])
            f_g = jax.nn.sigmoid(gates[:, H:2 * H])
            g_g = jnp.tanh(gates[:, 2 * H:3 * H])
            o_g = jax.nn.sigmoid(gates[:, 3 * H:])
            c_new = f_g * c + i_g * g_g
            h_new = o_g * jnp.tanh(c_new)
            m = (lengths[:, i] > t).astype(jnp.float32)[:, None]
            h = m * h_new + (1 - m) * h
            c = m * c_new + (1 - m) * c
        # reverse direction: one step on x[len-1] from a zero state
        x_last = xi[jnp.arange(B), lengths[:, i] - 1]                    # (B, E)
        gates_b = jnp.dot(x_last, wih_b, preferred_element_type=jnp.float32) + b_b
        i_b = jax.nn.sigmoid(gates_b[:, :H])
        g_b = jnp.tanh(gates_b[:, 2 * H:3 * H])
        o_b = jax.nn.sigmoid(gates_b[:, 3 * H:])
        h_b = o_b * jnp.tanh(i_b * g_b)
        proj = (jnp.dot(jnp.concatenate([h, h_b], axis=-1).astype(bf), wproj,
                        preferred_element_type=jnp.float32) + bproj)
        if MAXPOOL_K > 1:
            proj = jnp.max(
                proj[:, :OUT_DIM * MAXPOOL_K].reshape(B, OUT_DIM, MAXPOOL_K), axis=-1)
        outs.append(proj)
    return jnp.stack(outs, axis=1)


if __name__ == "__main__":
    key = jax.random.PRNGKey(0)
    B, T, L = 2, 4, 6   # batch, num address words, max decomposition length
    k_x, k_len, k_p = jax.random.split(key, 3)

    x = jax.random.normal(k_x, (B, T, L, INPUT_SIZE), jnp.float32)
    lengths = jax.random.randint(k_len, (B, T), 1, L + 1).astype(jnp.int32)
    params = init_params(k_p)
    packed = pack_params(params)

    out = embedding_network_forward(x, lengths, packed)
    out = jax.block_until_ready(out)

    ref = reference_forward(x, lengths, params)
    assert out.shape == (B, T, OUT_DIM), out.shape
    np.testing.assert_allclose(np.asarray(out), np.asarray(ref), rtol=5e-3, atol=5e-3)

    print("KERNEL_OK")
</pallas_src>

<mosaic_0001>
module attributes {stable_mosaic.version = 11 : i64} {
  func.func @kernel(%arg0: i32, %arg1: memref<96x128xbf16, #tpu.memory_space<vmem>>, %arg2: memref<16x128xi32, #tpu.memory_space<vmem>>, %arg3: memref<128x1536xbf16, #tpu.memory_space<vmem>>, %arg4: memref<256x128xbf16, #tpu.memory_space<vmem>>, %arg5: memref<1x1152xf32, #tpu.memory_space<vmem>>, %arg6: memref<16x128xf32, #tpu.memory_space<vmem>>, %arg7: memref<96x512xf32, #tpu.memory_space<vmem>>) attributes {dimension_semantics = [#tpu.dimension_semantics<parallel>], iteration_bounds = array<i64: 1>, scalar_prefetch = 0 : i64, scratch_operands = 1 : i64, tpu.core_type = #tpu.core_type<tc>, window_params = [{transform_indices = @transform_0, window_bounds = array<i64: 96, 128>}, {transform_indices = @transform_1, window_bounds = array<i64: 16, 128>}, {pipeline_mode = #tpu.pipeline_mode<synchronous>, transform_indices = @transform_2, window_bounds = array<i64: 128, 1536>}, {pipeline_mode = #tpu.pipeline_mode<synchronous>, transform_indices = @transform_3, window_bounds = array<i64: 256, 128>}, {pipeline_mode = #tpu.pipeline_mode<synchronous>, transform_indices = @transform_4, window_bounds = array<i64: 1, 1152>}, {transform_indices = @transform_5, window_bounds = array<i64: 16, 128>}]} {
    %c0 = arith.constant 0 : index
    %c0_0 = arith.constant 0 : index
    %0 = vector.load %arg2[%c0, %c0_0] : memref<16x128xi32, #tpu.memory_space<vmem>>, vector<16x128xi32>
    %c0_1 = arith.constant 0 : index
    %c0_2 = arith.constant 0 : index
    %1 = vector.load %arg1[%c0_1, %c0_2] : memref<96x128xbf16, #tpu.memory_space<vmem>>, vector<96x128xbf16>
    %c0_3 = arith.constant 0 : index
    %c0_4 = arith.constant 0 : index
    %2 = vector.load %arg3[%c0_3, %c0_4] : memref<128x1536xbf16, #tpu.memory_space<vmem>>, vector<128x512xbf16>
    %cst = arith.constant dense<0.000000e+00> : vector<96x512xf32>
    %3 = tpu.matmul %1, %2, %cst {dimension_numbers = #tpu.dot_dimension_numbers<[1], [0], [0], [1], [0, 0, 1, 1], [], []>} : vector<96x128xbf16>, vector<128x512xbf16>, vector<96x512xf32> -> vector<96x512xf32>
    %c0_5 = arith.constant 0 : index
    %c0_6 = arith.constant 0 : index
    %4 = vector.load %arg5[%c0_5, %c0_6] : memref<1x1152xf32, #tpu.memory_space<vmem>>, vector<1x512xf32>
    %5 = vector.broadcast %4 : vector<1x512xf32> to vector<96x512xf32>
    %6 = arith.addf %3, %5 : vector<96x512xf32>
    %c0_7 = arith.constant 0 : index
    %c0_8 = arith.constant 0 : index
    %7 = vector.load %arg7[%c0_7, %c0_8] : memref<96x512xf32, #tpu.memory_space<vmem>>, vector<96x512xf32>
    tpu.vector_store %arg7[%c0_7, %c0_8], %6 {strides = array<i32>} : memref<96x512xf32, #tpu.memory_space<vmem>>, vector<96x512xf32>,
    %c0_9 = arith.constant 0 : index
    %c512 = arith.constant 512 : index
    %8 = vector.load %arg3[%c0_9, %c512] : memref<128x1536xbf16, #tpu.memory_space<vmem>>, vector<128x512xbf16>
    %cst_10 = arith.constant 0.000000e+00 : f32
    %9 = vector.broadcast %cst_10 : f32 to vector<16x128xf32>
    %cst_11 = arith.constant 0.000000e+00 : f32
    %10 = vector.broadcast %cst_11 : f32 to vector<16x128xf32>
    %cst_12 = arith.constant 0.000000e+00 : bf16
    %11 = vector.broadcast %cst_12 : bf16 to vector<16x128xbf16>
    %c0_13 = arith.constant 0 : index
    %c0_14 = arith.constant 0 : index
    %12 = vector.load %arg7[%c0_13, %c0_14] : memref<96x512xf32, #tpu.memory_space<vmem>>, vector<16x512xf32>
    %13 = arith.truncf %9 : vector<16x128xf32> to vector<16x128xbf16>
    %cst_15 = arith.constant dense<0.000000e+00> : vector<16x512xf32>
    %14 = tpu.matmul %13, %8, %cst_15 {dimension_numbers = #tpu.dot_dimension_numbers<[1], [0], [0], [1], [0, 0, 1, 1], [], []>} : vector<16x128xbf16>, vector<128x512xbf16>, vector<16x512xf32> -> vector<16x512xf32>
    %15 = arith.addf %12, %14 : vector<16x512xf32>
    %16 = vector.extract_strided_slice %15 {offsets = [0, 0], sizes = [16, 384], strides = [1, 1]} : vector<16x512xf32> to vector<16x384xf32>
    %17 = arith.negf %16 : vector<16x384xf32>
    %18 = math.exp %17 : vector<16x384xf32>
    %cst_16 = arith.constant 1.000000e+00 : f32
    %19 = vector.broadcast %cst_16 : f32 to vector<16x384xf32>
    %20 = arith.addf %19, %18 : vector<16x384xf32>
    %21 = arith.divf %19, %20 : vector<16x384xf32>
    %22 = vector.extract_strided_slice %21 {offsets = [0, 0], sizes = [16, 128], strides = [1, 1]} : vector<16x384xf32> to vector<16x128xf32>
    %23 = vector.extract_strided_slice %21 {offsets = [0, 128], sizes = [16, 128], strides = [1, 1]} : vector<16x384xf32> to vector<16x128xf32>
    %24 = vector.extract_strided_slice %21 {offsets = [0, 256], sizes = [16, 128], strides = [1, 1]} : vector<16x384xf32> to vector<16x128xf32>
    %25 = vector.extract_strided_slice %15 {offsets = [0, 384], sizes = [16, 128], strides = [1, 1]} : vector<16x512xf32> to vector<16x128xf32>
    %26 = math.tanh %25 : vector<16x128xf32>
    %27 = arith.mulf %23, %10 : vector<16x128xf32>
    %28 = arith.mulf %22, %26 : vector<16x128xf32>
    %29 = arith.addf %27, %28 : vector<16x128xf32>
    %30 = math.tanh %29 : vector<16x128xf32>
    %31 = arith.mulf %24, %30 : vector<16x128xf32>
    %c0_i32 = arith.constant 0 : i32
    %32 = vector.broadcast %c0_i32 : i32 to vector<16x128xi32>
    %33 = arith.cmpi sgt, %0, %32 : vector<16x128xi32>
    %34 = arith.select %33, %31, %9 : vector<16x128xi1>, vector<16x128xf32>
    %35 = arith.select %33, %29, %10 : vector<16x128xi1>, vector<16x128xf32>
    %c0_17 = arith.constant 0 : index
    %c0_18 = arith.constant 0 : index
    %36 = vector.load %arg1[%c0_17, %c0_18] : memref<96x128xbf16, #tpu.memory_space<vmem>>, vector<16x128xbf16>
    %37 = arith.select %33, %36, %11 : vector<16x128xi1>, vector<16x128xbf16>
    %c16 = arith.constant 16 : index
    %c0_19 = arith.constant 0 : index
    %38 = vector.load %arg7[%c16, %c0_19] : memref<96x512xf32, #tpu.memory_space<vmem>>, vector<16x512xf32>
    %39 = arith.truncf %34 : vector<16x128xf32> to vector<16x128xbf16>
    %cst_20 = arith.constant dense<0.000000e+00> : vector<16x512xf32>
    %40 = tpu.matmul %39, %8, %cst_20 {dimension_numbers = #tpu.dot_dimension_numbers<[1], [0], [0], [1], [0, 0, 1, 1], [], []>} : vector<16x128xbf16>, vector<128x512xbf16>, vector<16x512xf32> -> vector<16x512xf32>
    %41 = arith.addf %38, %40 : vector<16x512xf32>
    %42 = vector.extract_strided_slice %41 {offsets = [0, 0], sizes = [16, 384], strides = [1, 1]} : vector<16x512xf32> to vector<16x384xf32>
    %43 = arith.negf %42 : vector<16x384xf32>
    %44 = math.exp %43 : vector<16x384xf32>
    %cst_21 = arith.constant 1.000000e+00 : f32
    %45 = vector.broadcast %cst_21 : f32 to vector<16x384xf32>
    %46 = arith.addf %45, %44 : vector<16x384xf32>
    %47 = arith.divf %45, %46 : vector<16x384xf32>
    %48 = vector.extract_strided_slice %47 {offsets = [0, 0], sizes = [16, 128], strides = [1, 1]} : vector<16x384xf32> to vector<16x128xf32>
    %49 = vector.extract_strided_slice %47 {offsets = [0, 128], sizes = [16, 128], strides = [1, 1]} : vector<16x384xf32> to vector<16x128xf32>
    %50 = vector.extract_strided_slice %47 {offsets = [0, 256], sizes = [16, 128], strides = [1, 1]} : vector<16x384xf32> to vector<16x128xf32>
    %51 = vector.extract_strided_slice %41 {offsets = [0, 384], sizes = [16, 128], strides = [1, 1]} : vector<16x512xf32> to vector<16x128xf32>
    %52 = math.tanh %51 : vector<16x128xf32>
    %53 = arith.mulf %49, %35 : vector<16x128xf32>
    %54 = arith.mulf %48, %52 : vector<16x128xf32>
    %55 = arith.addf %53, %54 : vector<16x128xf32>
    %56 = math.tanh %55 : vector<16x128xf32>
    %57 = arith.mulf %50, %56 : vector<16x128xf32>
    %c1_i32 = arith.constant 1 : i32
    %58 = vector.broadcast %c1_i32 : i32 to vector<16x128xi32>
    %59 = arith.cmpi sgt, %0, %58 : vector<16x128xi32>
    %60 = arith.select %59, %57, %34 : vector<16x128xi1>, vector<16x128xf32>
    %61 = arith.select %59, %55, %35 : vector<16x128xi1>, vector<16x128xf32>
    %c16_22 = arith.constant 16 : index
    %c0_23 = arith.constant 0 : index
    %62 = vector.load %arg1[%c16_22, %c0_23] : memref<96x128xbf16, #tpu.memory_space<vmem>>, vector<16x128xbf16>
    %63 = arith.select %59, %62, %37 : vector<16x128xi1>, vector<16x128xbf16>
    %c32 = arith.constant 32 : index
    %c0_24 = arith.constant 0 : index
    %64 = vector.load %arg7[%c32, %c0_24] : memref<96x512xf32, #tpu.memory_space<vmem>>, vector<16x512xf32>
    %65 = arith.truncf %60 : vector<16x128xf32> to vector<16x128xbf16>
    %cst_25 = arith.constant dense<0.000000e+00> : vector<16x512xf32>
    %66 = tpu.matmul %65, %8, %cst_25 {dimension_numbers = #tpu.dot_dimension_numbers<[1], [0], [0], [1], [0, 0, 1, 1], [], []>} : vector<16x128xbf16>, vector<128x512xbf16>, vector<16x512xf32> -> vector<16x512xf32>
    %67 = arith.addf %64, %66 : vector<16x512xf32>
    %68 = vector.extract_strided_slice %67 {offsets = [0, 0], sizes = [16, 384], strides = [1, 1]} : vector<16x512xf32> to vector<16x384xf32>
    %69 = arith.negf %68 : vector<16x384xf32>
    %70 = math.exp %69 : vector<16x384xf32>
    %cst_26 = arith.constant 1.000000e+00 : f32
    %71 = vector.broadcast %cst_26 : f32 to vector<16x384xf32>
    %72 = arith.addf %71, %70 : vector<16x384xf32>
    %73 = arith.divf %71, %72 : vector<16x384xf32>
    %74 = vector.extract_strided_slice %73 {offsets = [0, 0], sizes = [16, 128], strides = [1, 1]} : vector<16x384xf32> to vector<16x128xf32>
    %75 = vector.extract_strided_slice %73 {offsets = [0, 128], sizes = [16, 128], strides = [1, 1]} : vector<16x384xf32> to vector<16x128xf32>
    %76 = vector.extract_strided_slice %73 {offsets = [0, 256], sizes = [16, 128], strides = [1, 1]} : vector<16x384xf32> to vector<16x128xf32>
    %77 = vector.extract_strided_slice %67 {offsets = [0, 384], sizes = [16, 128], strides = [1, 1]} : vector<16x512xf32> to vector<16x128xf32>
    %78 = math.tanh %77 : vector<16x128xf32>
    %79 = arith.mulf %75, %61 : vector<16x128xf32>
    %80 = arith.mulf %74, %78 : vector<16x128xf32>
    %81 = arith.addf %79, %80 : vector<16x128xf32>
    %82 = math.tanh %81 : vector<16x128xf32>
    %83 = arith.mulf %76, %82 : vector<16x128xf32>
    %c2_i32 = arith.constant 2 : i32
    %84 = vector.broadcast %c2_i32 : i32 to vector<16x128xi32>
    %85 = arith.cmpi sgt, %0, %84 : vector<16x128xi32>
    %86 = arith.select %85, %83, %60 : vector<16x128xi1>, vector<16x128xf32>
    %87 = arith.select %85, %81, %61 : vector<16x128xi1>, vector<16x128xf32>
    %c32_27 = arith.constant 32 : index
    %c0_28 = arith.constant 0 : index
    %88 = vector.load %arg1[%c32_27, %c0_28] : memref<96x128xbf16, #tpu.memory_space<vmem>>, vector<16x128xbf16>
    %89 = arith.select %85, %88, %63 : vector<16x128xi1>, vector<16x128xbf16>
    %c48 = arith.constant 48 : index
    %c0_29 = arith.constant 0 : index
    %90 = vector.load %arg7[%c48, %c0_29] : memref<96x512xf32, #tpu.memory_space<vmem>>, vector<16x512xf32>
    %91 = arith.truncf %86 : vector<16x128xf32> to vector<16x128xbf16>
    %cst_30 = arith.constant dense<0.000000e+00> : vector<16x512xf32>
    %92 = tpu.matmul %91, %8, %cst_30 {dimension_numbers = #tpu.dot_dimension_numbers<[1], [0], [0], [1], [0, 0, 1, 1], [], []>} : vector<16x128xbf16>, vector<128x512xbf16>, vector<16x512xf32> -> vector<16x512xf32>
    %93 = arith.addf %90, %92 : vector<16x512xf32>
    %94 = vector.extract_strided_slice %93 {offsets = [0, 0], sizes = [16, 384], strides = [1, 1]} : vector<16x512xf32> to vector<16x384xf32>
    %95 = arith.negf %94 : vector<16x384xf32>
    %96 = math.exp %95 : vector<16x384xf32>
    %cst_31 = arith.constant 1.000000e+00 : f32
    %97 = vector.broadcast %cst_31 : f32 to vector<16x384xf32>
    %98 = arith.addf %97, %96 : vector<16x384xf32>
    %99 = arith.divf %97, %98 : vector<16x384xf32>
    %100 = vector.extract_strided_slice %99 {offsets = [0, 0], sizes = [16, 128], strides = [1, 1]} : vector<16x384xf32> to vector<16x128xf32>
    %101 = vector.extract_strided_slice %99 {offsets = [0, 128], sizes = [16, 128], strides = [1, 1]} : vector<16x384xf32> to vector<16x128xf32>
    %102 = vector.extract_strided_slice %99 {offsets = [0, 256], sizes = [16, 128], strides = [1, 1]} : vector<16x384xf32> to vector<16x128xf32>
    %103 = vector.extract_strided_slice %93 {offsets = [0, 384], sizes = [16, 128], strides = [1, 1]} : vector<16x512xf32> to vector<16x128xf32>
    %104 = math.tanh %103 : vector<16x128xf32>
    %105 = arith.mulf %101, %87 : vector<16x128xf32>
    %106 = arith.mulf %100, %104 : vector<16x128xf32>
    %107 = arith.addf %105, %106 : vector<16x128xf32>
    %108 = math.tanh %107 : vector<16x128xf32>
    %109 = arith.mulf %102, %108 : vector<16x128xf32>
    %c3_i32 = arith.constant 3 : i32
    %110 = vector.broadcast %c3_i32 : i32 to vector<16x128xi32>
    %111 = arith.cmpi sgt, %0, %110 : vector<16x128xi32>
    %112 = arith.select %111, %109, %86 : vector<16x128xi1>, vector<16x128xf32>
    %113 = arith.select %111, %107, %87 : vector<16x128xi1>, vector<16x128xf32>
    %c48_32 = arith.constant 48 : index
    %c0_33 = arith.constant 0 : index
    %114 = vector.load %arg1[%c48_32, %c0_33] : memref<96x128xbf16, #tpu.memory_space<vmem>>, vector<16x128xbf16>
    %115 = arith.select %111, %114, %89 : vector<16x128xi1>, vector<16x128xbf16>
    %c64 = arith.constant 64 : index
    %c0_34 = arith.constant 0 : index
    %116 = vector.load %arg7[%c64, %c0_34] : memref<96x512xf32, #tpu.memory_space<vmem>>, vector<16x512xf32>
    %117 = arith.truncf %112 : vector<16x128xf32> to vector<16x128xbf16>
    %cst_35 = arith.constant dense<0.000000e+00> : vector<16x512xf32>
    %118 = tpu.matmul %117, %8, %cst_35 {dimension_numbers = #tpu.dot_dimension_numbers<[1], [0], [0], [1], [0, 0, 1, 1], [], []>} : vector<16x128xbf16>, vector<128x512xbf16>, vector<16x512xf32> -> vector<16x512xf32>
    %119 = arith.addf %116, %118 : vector<16x512xf32>
    %120 = vector.extract_strided_slice %119 {offsets = [0, 0], sizes = [16, 384], strides = [1, 1]} : vector<16x512xf32> to vector<16x384xf32>
    %121 = arith.negf %120 : vector<16x384xf32>
    %122 = math.exp %121 : vector<16x384xf32>
    %cst_36 = arith.constant 1.000000e+00 : f32
    %123 = vector.broadcast %cst_36 : f32 to vector<16x384xf32>
    %124 = arith.addf %123, %122 : vector<16x384xf32>
    %125 = arith.divf %123, %124 : vector<16x384xf32>
    %126 = vector.extract_strided_slice %125 {offsets = [0, 0], sizes = [16, 128], strides = [1, 1]} : vector<16x384xf32> to vector<16x128xf32>
    %127 = vector.extract_strided_slice %125 {offsets = [0, 128], sizes = [16, 128], strides = [1, 1]} : vector<16x384xf32> to vector<16x128xf32>
    %128 = vector.extract_strided_slice %125 {offsets = [0, 256], sizes = [16, 128], strides = [1, 1]} : vector<16x384xf32> to vector<16x128xf32>
    %129 = vector.extract_strided_slice %119 {offsets = [0, 384], sizes = [16, 128], strides = [1, 1]} : vector<16x512xf32> to vector<16x128xf32>
    %130 = math.tanh %129 : vector<16x128xf32>
    %131 = arith.mulf %127, %113 : vector<16x128xf32>
    %132 = arith.mulf %126, %130 : vector<16x128xf32>
    %133 = arith.addf %131, %132 : vector<16x128xf32>
    %134 = math.tanh %133 : vector<16x128xf32>
    %135 = arith.mulf %128, %134 : vector<16x128xf32>
    %c4_i32 = arith.constant 4 : i32
    %136 = vector.broadcast %c4_i32 : i32 to vector<16x128xi32>
    %137 = arith.cmpi sgt, %0, %136 : vector<16x128xi32>
    %138 = arith.select %137, %135, %112 : vector<16x128xi1>, vector<16x128xf32>
    %139 = arith.select %137, %133, %113 : vector<16x128xi1>, vector<16x128xf32>
    %c64_37 = arith.constant 64 : index
    %c0_38 = arith.constant 0 : index
    %140 = vector.load %arg1[%c64_37, %c0_38] : memref<96x128xbf16, #tpu.memory_space<vmem>>, vector<16x128xbf16>
    %141 = arith.select %137, %140, %115 : vector<16x128xi1>, vector<16x128xbf16>
    %c80 = arith.constant 80 : index
    %c0_39 = arith.constant 0 : index
    %142 = vector.load %arg7[%c80, %c0_39] : memref<96x512xf32, #tpu.memory_space<vmem>>, vector<16x512xf32>
    %143 = arith.truncf %138 : vector<16x128xf32> to vector<16x128xbf16>
    %cst_40 = arith.constant dense<0.000000e+00> : vector<16x512xf32>
    %144 = tpu.matmul %143, %8, %cst_40 {dimension_numbers = #tpu.dot_dimension_numbers<[1], [0], [0], [1], [0, 0, 1, 1], [], []>} : vector<16x128xbf16>, vector<128x512xbf16>, vector<16x512xf32> -> vector<16x512xf32>
    %145 = arith.addf %142, %144 : vector<16x512xf32>
    %146 = vector.extract_strided_slice %145 {offsets = [0, 0], sizes = [16, 384], strides = [1, 1]} : vector<16x512xf32> to vector<16x384xf32>
    %147 = arith.negf %146 : vector<16x384xf32>
    %148 = math.exp %147 : vector<16x384xf32>
    %cst_41 = arith.constant 1.000000e+00 : f32
    %149 = vector.broadcast %cst_41 : f32 to vector<16x384xf32>
    %150 = arith.addf %149, %148 : vector<16x384xf32>
    %151 = arith.divf %149, %150 : vector<16x384xf32>
    %152 = vector.extract_strided_slice %151 {offsets = [0, 0], sizes = [16, 128], strides = [1, 1]} : vector<16x384xf32> to vector<16x128xf32>
    %153 = vector.extract_strided_slice %151 {offsets = [0, 128], sizes = [16, 128], strides = [1, 1]} : vector<16x384xf32> to vector<16x128xf32>
    %154 = vector.extract_strided_slice %151 {offsets = [0, 256], sizes = [16, 128], strides = [1, 1]} : vector<16x384xf32> to vector<16x128xf32>
    %155 = vector.extract_strided_slice %145 {offsets = [0, 384], sizes = [16, 128], strides = [1, 1]} : vector<16x512xf32> to vector<16x128xf32>
    %156 = math.tanh %155 : vector<16x128xf32>
    %157 = arith.mulf %153, %139 : vector<16x128xf32>
    %158 = arith.mulf %152, %156 : vector<16x128xf32>
    %159 = arith.addf %157, %158 : vector<16x128xf32>
    %160 = math.tanh %159 : vector<16x128xf32>
    %161 = arith.mulf %154, %160 : vector<16x128xf32>
    %c5_i32 = arith.constant 5 : i32
    %162 = vector.broadcast %c5_i32 : i32 to vector<16x128xi32>
    %163 = arith.cmpi sgt, %0, %162 : vector<16x128xi32>
    %164 = arith.select %163, %161, %138 : vector<16x128xi1>, vector<16x128xf32>
    %c80_42 = arith.constant 80 : index
    %c0_43 = arith.constant 0 : index
    %165 = vector.load %arg1[%c80_42, %c0_43] : memref<96x128xbf16, #tpu.memory_space<vmem>>, vector<16x128xbf16>
    %166 = arith.select %163, %165, %141 : vector<16x128xi1>, vector<16x128xbf16>
    %c0_44 = arith.constant 0 : index
    %c1024 = arith.constant 1024 : index
    %167 = vector.load %arg3[%c0_44, %c1024] : memref<128x1536xbf16, #tpu.memory_space<vmem>>, vector<128x512xbf16>
    %cst_45 = arith.constant dense<0.000000e+00> : vector<16x512xf32>
    %168 = tpu.matmul %166, %167, %cst_45 {dimension_numbers = #tpu.dot_dimension_numbers<[1], [0], [0], [1], [0, 0, 1, 1], [], []>} : vector<16x128xbf16>, vector<128x512xbf16>, vector<16x512xf32> -> vector<16x512xf32>
    %c0_46 = arith.constant 0 : index
    %c512_47 = arith.constant 512 : index
    %169 = vector.load %arg5[%c0_46, %c512_47] : memref<1x1152xf32, #tpu.memory_space<vmem>>, vector<1x512xf32>
    %170 = vector.broadcast %169 : vector<1x512xf32> to vector<16x512xf32>
    %171 = arith.addf %168, %170 : vector<16x512xf32>
    %172 = vector.extract_strided_slice %171 {offsets = [0, 0], sizes = [16, 128], strides = [1, 1]} : vector<16x512xf32> to vector<16x128xf32>
    %173 = arith.negf %172 : vector<16x128xf32>
    %174 = math.exp %173 : vector<16x128xf32>
    %cst_48 = arith.constant 1.000000e+00 : f32
    %175 = vector.broadcast %cst_48 : f32 to vector<16x128xf32>
    %176 = arith.addf %175, %174 : vector<16x128xf32>
    %177 = arith.divf %175, %176 : vector<16x128xf32>
    %178 = vector.extract_strided_slice %171 {offsets = [0, 256], sizes = [16, 128], strides = [1, 1]} : vector<16x512xf32> to vector<16x128xf32>
    %179 = arith.negf %178 : vector<16x128xf32>
    %180 = math.exp %179 : vector<16x128xf32>
    %cst_49 = arith.constant 1.000000e+00 : f32
    %181 = vector.broadcast %cst_49 : f32 to vector<16x128xf32>
    %182 = arith.addf %181, %180 : vector<16x128xf32>
    %183 = arith.divf %181, %182 : vector<16x128xf32>
    %184 = vector.extract_strided_slice %171 {offsets = [0, 384], sizes = [16, 128], strides = [1, 1]} : vector<16x512xf32> to vector<16x128xf32>
    %185 = math.tanh %184 : vector<16x128xf32>
    %186 = arith.mulf %177, %185 : vector<16x128xf32>
    %187 = math.tanh %186 : vector<16x128xf32>
    %188 = arith.mulf %183, %187 : vector<16x128xf32>
    %189 = tpu.concatenate %164, %188 in 1 : vector<16x128xf32>, vector<16x128xf32> -> vector<16x256xf32>
    %190 = arith.truncf %189 : vector<16x256xf32> to vector<16x256xbf16>
    %c0_50 = arith.constant 0 : index
    %c0_51 = arith.constant 0 : index
    %191 = vector.load %arg4[%c0_50, %c0_51] : memref<256x128xbf16, #tpu.memory_space<vmem>>, vector<256x128xbf16>
    %cst_52 = arith.constant dense<0.000000e+00> : vector<16x128xf32>
    %192 = tpu.matmul %190, %191, %cst_52 {dimension_numbers = #tpu.dot_dimension_numbers<[1], [0], [0], [1], [0, 0, 1, 1], [], []>} : vector<16x256xbf16>, vector<256x128xbf16>, vector<16x128xf32> -> vector<16x128xf32>
    %c0_53 = arith.constant 0 : index
    %c1024_54 = arith.constant 1024 : index
    %193 = vector.load %arg5[%c0_53, %c1024_54] : memref<1x1152xf32, #tpu.memory_space<vmem>>, vector<1x128xf32>
    %194 = vector.broadcast %193 : vector<1x128xf32> to vector<16x128xf32>
    %195 = arith.addf %192, %194 : vector<16x128xf32>
    %c0_55 = arith.constant 0 : index
    %c0_56 = arith.constant 0 : index
    %196 = vector.load %arg6[%c0_55, %c0_56] : memref<16x128xf32, #tpu.memory_space<vmem>>, vector<16x128xf32>
    tpu.vector_store %arg6[%c0_55, %c0_56], %195 {strides = array<i32>} : memref<16x128xf32, #tpu.memory_space<vmem>>, vector<16x128xf32>,
    return
  }
  func.func @transform_0(%arg0: i32) -> (i32, i32) {
    %c0_i32 = arith.constant 0 : i32
    %c0_i32_0 = arith.constant 0 : i32
    return %arg0, %c0_i32 : i32, i32
  }
  func.func @transform_1(%arg0: i32) -> (i32, i32) {
    %c0_i32 = arith.constant 0 : i32
    %c0_i32_0 = arith.constant 0 : i32
    return %arg0, %c0_i32 : i32, i32
  }
  func.func @transform_2(%arg0: i32) -> (i32, i32) {
    %c0_i32 = arith.constant 0 : i32
    %c0_i32_0 = arith.constant 0 : i32
    %c0_i32_1 = arith.constant 0 : i32
    return %c0_i32, %c0_i32_0 : i32, i32
  }
  func.func @transform_3(%arg0: i32) -> (i32, i32) {
    %c0_i32 = arith.constant 0 : i32
    %c0_i32_0 = arith.constant 0 : i32
    %c0_i32_1 = arith.constant 0 : i32
    return %c0_i32, %c0_i32_0 : i32, i32
  }
  func.func @transform_4(%arg0: i32) -> (i32, i32) {
    %c0_i32 = arith.constant 0 : i32
    %c0_i32_0 = arith.constant 0 : i32
    %c0_i32_1 = arith.constant 0 : i32
    return %c0_i32, %c0_i32_0 : i32, i32
  }
  func.func @transform_5(%arg0: i32) -> (i32, i32) {
    %c0_i32 = arith.constant 0 : i32
    %c0_i32_0 = arith.constant 0 : i32
    return %arg0, %c0_i32 : i32, i32
  }
}

</mosaic_0001>

<bundles_post_ra>
// kernel: embedding_network_forward.1
= control target key start
LH: loop header
LB: loop body
LE: loop exit
PB: predicated region body
PF: predicated region fallthrough
CT: control target
= control target key end

     0   :  { %10 = vsyncpa [#allocation4], 0  ;;  %s3268_s21 = smov [#allocation3]   ;;  %s3269_s23 = smov 768   ;;  %s4650_s0 = inlined_call_operand.vmem [shape: bf16[96,128], index: 0, kind: input, shape index: {}]   ;;  %s4651_s1 = inlined_call_operand.vmem [shape: s32[16,128], index: 1, kind: input, shape index: {}]   ;;  %s4652_s2 = inlined_call_operand.hbm [shape: bf16[128,1536], index: 2, kind: input, shape index: {}]   ;;  %s4653_s3 = inlined_call_operand.vmem [shape: bf16[256,128], index: 3, kind: input, shape index: {}]   ;;  %s4654_s4 = inlined_call_operand.vmem [shape: f32[1,1152], index: 4, kind: input, shape index: {}]   ;;  %s4655_s5 = inlined_call_operand.vmem [shape: f32[16,128], index: 5, kind: output, shape index: {}]  }
   0x1   :  { %s19_s20 = sshll.u32 %s4652_s2, 4  ;;  %s21_s22 = sshll.u32 %s3268_s21, 4  ;;  %s20_s20 = int_to_ptr.hbm [resolvable:$true] %s19_s20  ;;  %s22_s22 = int_to_ptr.vmem [resolvable:$true] %s21_s22 }
   0x2   :  { %s3270_s24 = smov 48  }
   0x3   :  { %27 = dma.hbm_to_vmem [thread:$0]  %s20_s20, 12288, %s22_s22, [#allocation4], %s3269_s23, %s3269_s23, %s3270_s24  }
   0x4   :  { %3266 = dma.done.wait [#allocation4], 12288  }
   0x5   :  { %3267 = vsyncadd [#allocation4], 4294955008  ;;  %v2555_v0 = vld [vmem:[#allocation3 + $0x2a0] sm:$0xf]  ;;  %v2945_v1 = vld [vmem:[#allocation3 + $0x2cc] sm:$0xf0] }
   0x6   :  { %v2943_v2 = vld [vmem:[#allocation3 + $0x2a4] sm:$0xf]  ;;  %v2556_v3 = vor.u32 %v2945_v1, %v2555_v0  ;;  %v2557_v4 = vld [vmem:[#allocation3 + $0x2d0] sm:$0xf0]  ;;  %v2563_v5 = vld [vmem:[#allocation3 + $0x2a8] sm:$0xf] }
   0x7   :  { %v2946_v6 = vld [vmem:[#allocation3 + $0x2d4] sm:$0xf0]  ;;  %v2560_v7 = vor.u32 %v2943_v2, %v2557_v4  ;;  %v2944_v9 = vld [vmem:[#allocation3 + $0x2ac] sm:$0xf]  ;;  %v2565_v10 = vld [vmem:[#allocation3 + $0x2d8] sm:$0xf0] }
   0x8   :  { %v2564_v8 = vor.u32 %v2946_v6, %v2563_v5  ;;  %v2539_v11 = vld [vmem:[#allocation3 + $0x240] sm:$0xf]  ;;  %289 = vmatpush.bf16.msra.mxu0 %v2556_v3  ;;  %v2568_v12 = vor.u32 %v2944_v9, %v2565_v10  ;;  %v2941_v13 = vld [vmem:[#allocation3 + $0x26c] sm:$0xf0]  ;;  %v2939_v14 = vld [vmem:[#allocation3 + $0x244] sm:$0xf] }
   0x9   :  { %v2541_v15 = vld [vmem:[#allocation3 + $0x270] sm:$0xf0]  ;;  %328 = vmatpush.bf16.msra.mxu1 %v2560_v7  ;;  %v2540_v16 = vor.u32 %v2941_v13, %v2539_v11  ;;  %v2547_v18 = vld [vmem:[#allocation3 + $0x248] sm:$0xf]  ;;  %v2942_v19 = vld [vmem:[#allocation3 + $0x274] sm:$0xf0] }
   0xa   :  { %367 = vmatpush.bf16.msra.mxu2 %v2564_v8  ;;  %v2544_v17 = vor.u32 %v2939_v14, %v2541_v15  ;;  %v2940_v20 = vld [vmem:[#allocation3 + $0x24c] sm:$0xf]  ;;  %406 = vmatpush.bf16.msra.mxu3 %v2568_v12  ;;  %v2548_v21 = vor.u32 %v2942_v19, %v2547_v18  ;;  %v2549_v22 = vld [vmem:[#allocation3 + $0x278] sm:$0xf0]  ;;  %v2523_v23 = vld [vmem:[#allocation3 + $0x1e0] sm:$0xf] }
   0xb   :  { %v2937_v24 = vld [vmem:[#allocation3 + $0x20c] sm:$0xf0]  ;;  %v2552_v25 = vor.u32 %v2940_v20, %v2549_v22  ;;  %v2935_v26 = vld [vmem:[#allocation3 + $0x1e4] sm:$0xf]  ;;  %v2525_v27 = vld [vmem:[#allocation3 + $0x210] sm:$0xf0] }
   0xc   :  { %v2531_v28 = vld [vmem:[#allocation3 + $0x1e8] sm:$0xf]  ;;  %290 = vmatpush.bf16.msra.mxu0 %v2540_v16  ;;  %v2524_v29 = vor.u32 %v2937_v24, %v2523_v23  ;;  %v2938_v30 = vld [vmem:[#allocation3 + $0x214] sm:$0xf0]  ;;  %v2936_v31 = vld [vmem:[#allocation3 + $0x1ec] sm:$0xf]  ;;  %v2528_v33 = vor.u32 %v2935_v26, %v2525_v27 }
   0xd   :  { %v2533_v32 = vld [vmem:[#allocation3 + $0x218] sm:$0xf0]  ;;  %329 = vmatpush.bf16.msra.mxu1 %v2544_v17  ;;  %v2532_v34 = vor.u32 %v2938_v30, %v2531_v28  ;;  %v2507_v35 = vld [vmem:[#allocation3 + $0x180] sm:$0xf]  ;;  %v2933_v36 = vld [vmem:[#allocation3 + $0x1ac] sm:$0xf0] }
   0xe   :  { %368 = vmatpush.bf16.msra.mxu2 %v2548_v21  ;;  %v2931_v37 = vld [vmem:[#allocation3 + $0x184] sm:$0xf]  ;;  %407 = vmatpush.bf16.msra.mxu3 %v2552_v25  ;;  %v2536_v38 = vor.u32 %v2936_v31, %v2533_v32  ;;  %v2509_v39 = vld [vmem:[#allocation3 + $0x1b0] sm:$0xf0]  ;;  %v2515_v40 = vld [vmem:[#allocation3 + $0x188] sm:$0xf]  ;;  %v2508_v44 = vor.u32 %v2933_v36, %v2507_v35 }
   0xf   :  { %v2934_v41 = vld [vmem:[#allocation3 + $0x1b4] sm:$0xf0]  ;;  %v2932_v42 = vld [vmem:[#allocation3 + $0x18c] sm:$0xf]  ;;  %v2517_v43 = vld [vmem:[#allocation3 + $0x1b8] sm:$0xf0]  ;;  %v2512_v45 = vor.u32 %v2931_v37, %v2509_v39 }
  0x10   :  { %291 = vmatpush.bf16.msra.mxu0 %v2524_v29  ;;  %v2516_v46 = vor.u32 %v2934_v41, %v2515_v40  ;;  %v2491_v47 = vld [vmem:[#allocation3 + $0x120] sm:$0xf]  ;;  %v2929_v48 = vld [vmem:[#allocation3 + $0x14c] sm:$0xf0]  ;;  %v2927_v49 = vld [vmem:[#allocation3 + $0x124] sm:$0xf]  ;;  %v2520_v50 = vor.u32 %v2932_v42, %v2517_v43 }
  0x11   :  { %330 = vmatpush.bf16.msra.mxu1 %v2528_v33  ;;  %v2493_v51 = vld [vmem:[#allocation3 + $0x150] sm:$0xf0]  ;;  %v2499_v52 = vld [vmem:[#allocation3 + $0x128] sm:$0xf]  ;;  %v2930_v53 = vld [vmem:[#allocation3 + $0x154] sm:$0xf0]  ;;  %v2492_v56 = vor.u32 %v2929_v48, %v2491_v47 }
  0x12   :  { %369 = vmatpush.bf16.msra.mxu2 %v2532_v34  ;;  %408 = vmatpush.bf16.msra.mxu3 %v2536_v38  ;;  %v2928_v54 = vld [vmem:[#allocation3 + $0x12c] sm:$0xf]  ;;  %v2501_v55 = vld [vmem:[#allocation3 + $0x158] sm:$0xf0]  ;;  %v2496_v57 = vor.u32 %v2927_v49, %v2493_v51  ;;  %v2500_v58 = vor.u32 %v2930_v53, %v2499_v52  ;;  %v2475_v59 = vld [vmem:[#allocation3 + $0xc0] sm:$0xf] }
  0x13   :  { %v2925_v60 = vld [vmem:[#allocation3 + $0xec] sm:$0xf0]  ;;  %v2923_v61 = vld [vmem:[#allocation3 + $0xc4] sm:$0xf]  ;;  %v2504_v62 = vor.u32 %v2928_v54, %v2501_v55  ;;  %v2477_v63 = vld [vmem:[#allocation3 + $0xf0] sm:$0xf0] }
  0x14   :  { %292 = vmatpush.bf16.msra.mxu0 %v2508_v44  ;;  %v2483_v0 = vld [vmem:[#allocation3 + $0xc8] sm:$0xf]  ;;  %v2926_v1 = vld [vmem:[#allocation3 + $0xf4] sm:$0xf0]  ;;  %v2924_v2 = vld [vmem:[#allocation3 + $0xcc] sm:$0xf]  ;;  %v2476_v4 = vor.u32 %v2925_v60, %v2475_v59  ;;  %v2480_v5 = vor.u32 %v2923_v61, %v2477_v63 }
  0x15   :  { %331 = vmatpush.bf16.msra.mxu1 %v2512_v45  ;;  %v2485_v3 = vld [vmem:[#allocation3 + $0xf8] sm:$0xf0]  ;;  %v2484_v6 = vor.u32 %v2926_v1, %v2483_v0  ;;  %v2459_v7 = vld [vmem:[#allocation3 + $0x60] sm:$0xf]  ;;  %v2921_v8 = vld [vmem:[#allocation3 + $0x8c] sm:$0xf0] }
  0x16   :  { %370 = vmatpush.bf16.msra.mxu2 %v2516_v46  ;;  %409 = vmatpush.bf16.msra.mxu3 %v2520_v50  ;;  %v2919_v9 = vld [vmem:[#allocation3 + $0x64] sm:$0xf]  ;;  %v2488_v10 = vor.u32 %v2924_v2, %v2485_v3  ;;  %v2461_v11 = vld [vmem:[#allocation3 + $0x90] sm:$0xf0]  ;;  %v2467_v12 = vld [vmem:[#allocation3 + $0x68] sm:$0xf]  ;;  %v2460_v16 = vor.u32 %v2921_v8, %v2459_v7 }
  0x17   :  { %v2922_v13 = vld [vmem:[#allocation3 + $0x94] sm:$0xf0]  ;;  %v2920_v14 = vld [vmem:[#allocation3 + $0x6c] sm:$0xf]  ;;  %v2469_v15 = vld [vmem:[#allocation3 + $0x98] sm:$0xf0]  ;;  %v2464_v18 = vor.u32 %v2919_v9, %v2461_v11 }
  0x18   :  { %293 = vmatpush.bf16.msra.mxu0 %v2492_v56  ;;  %v2443_v17 = vld [vmem:[#allocation3] sm:$0xf]  ;;  %v2468_v19 = vor.u32 %v2922_v13, %v2467_v12  ;;  %v2917_v20 = vld [vmem:[#allocation3 + $0x2c] sm:$0xf0]  ;;  %v2915_v21 = vld [vmem:[#allocation3 + $0x4] sm:$0xf]  ;;  %v2472_v23 = vor.u32 %v2920_v14, %v2469_v15 }
  0x19   :  { %332 = vmatpush.bf16.msra.mxu1 %v2496_v57  ;;  %v2445_v22 = vld [vmem:[#allocation3 + $0x30] sm:$0xf0]  ;;  %v2451_v24 = vld [vmem:[#allocation3 + $0x8] sm:$0xf]  ;;  %v2918_v25 = vld [vmem:[#allocation3 + $0x34] sm:$0xf0]  ;;  %v2444_v30 = vor.u32 %v2917_v20, %v2443_v17 }
  0x1a   :  { %371 = vmatpush.bf16.msra.mxu2 %v2500_v58  ;;  %410 = vmatpush.bf16.msra.mxu3 %v2504_v62  ;;  %v2916_v26 = vld [vmem:[#allocation3 + $0xc] sm:$0xf]  ;;  %v2453_v27 = vld [vmem:[#allocation3 + $0x38] sm:$0xf0]  ;;  %v2683_v28 = vld [vmem:[#allocation3 + $0x2b0] sm:$0xf]  ;;  %v2448_v33 = vor.u32 %v2915_v21, %v2445_v22  ;;  %v2452_v34 = vor.u32 %v2918_v25, %v2451_v24 }
  0x1b   :  { %v2977_v29 = vld [vmem:[#allocation3 + $0x2dc] sm:$0xf0]  ;;  %v2975_v31 = vld [vmem:[#allocation3 + $0x2b4] sm:$0xf]  ;;  %v2685_v32 = vld [vmem:[#allocation3 + $0x2e0] sm:$0xf0]  ;;  %v2456_v37 = vor.u32 %v2916_v26, %v2453_v27 }
  0x1c   :  { %294 = vmatpush.bf16.msra.mxu0 %v2476_v4  ;;  %v2909_v35 = vld [vmem:[%s4650_s0] sm:$0xff]  ;;  %v2691_v36 = vld [vmem:[#allocation3 + $0x2b8] sm:$0xf]  ;;  %v3308_v38 = vor.u32 %v2977_v29, %v2683_v28  ;;  %v2978_v39 = vld [vmem:[#allocation3 + $0x2e4] sm:$0xf0]  ;;  %v3310_v41 = vor.u32 %v2975_v31, %v2685_v32 }
  0x1d   :  { %333 = vmatpush.bf16.msra.mxu1 %v2480_v5  ;;  %v2667_v40 = vld [vmem:[#allocation3 + $0x250] sm:$0xf]  ;;  %v2973_v42 = vld [vmem:[#allocation3 + $0x27c] sm:$0xf0]  ;;  %v2976_v43 = vld [vmem:[#allocation3 + $0x2bc] sm:$0xf]  ;;  %v3312_v47 = vor.u32 %v2978_v39, %v2691_v36 }
  0x1e   :  { %372 = vmatpush.bf16.msra.mxu2 %v2484_v6  ;;  %411 = vmatpush.bf16.msra.mxu3 %v2488_v10  ;;  %v2693_v44 = vld [vmem:[#allocation3 + $0x2e8] sm:$0xf0]  ;;  %v2971_v45 = vld [vmem:[#allocation3 + $0x254] sm:$0xf]  ;;  %v2669_v46 = vld [vmem:[#allocation3 + $0x280] sm:$0xf0]  ;;  %v3315_v48 = vor.u32 %v2973_v42, %v2667_v40 }
  0x1f   :  { %v3317_v49 = vor.u32 %v2976_v43, %v2693_v44  ;;  %v2675_v50 = vld [vmem:[#allocation3 + $0x258] sm:$0xf]  ;;  %v2974_v51 = vld [vmem:[#allocation3 + $0x284] sm:$0xf0]  ;;  %v2651_v52 = vld [vmem:[#allocation3 + $0x1f0] sm:$0xf]  ;;  %v3320_v53 = vor.u32 %v2971_v45, %v2669_v46 }
  0x20   :  { %295 = vmatpush.bf16.msra.mxu0 %v2460_v16  ;;  %v2969_v54 = vld [vmem:[#allocation3 + $0x21c] sm:$0xf0]  ;;  %v2972_v55 = vld [vmem:[#allocation3 + $0x25c] sm:$0xf]  ;;  %v2677_v56 = vld [vmem:[#allocation3 + $0x288] sm:$0xf0]  ;;  %v3323_v59 = vor.u32 %v2974_v51, %v2675_v50 }
  0x21   :  { %334 = vmatpush.bf16.msra.mxu1 %v2464_v18  ;;  %v2967_v57 = vld [vmem:[#allocation3 + $0x1f4] sm:$0xf]  ;;  %v2653_v58 = vld [vmem:[#allocation3 + $0x220] sm:$0xf0]  ;;  %v3327_v60 = vor.u32 %v2969_v54, %v2651_v52  ;;  %v3329_v61 = vor.u32 %v2972_v55, %v2677_v56  ;;  %v2659_v62 = vld [vmem:[#allocation3 + $0x1f8] sm:$0xf] }
  0x22   :  { %373 = vmatpush.bf16.msra.mxu2 %v2468_v19  ;;  %412 = vmatpush.bf16.msra.mxu3 %v2472_v23  ;;  %v2970_v63 = vld [vmem:[#allocation3 + $0x224] sm:$0xf0]  ;;  %v2635_v0 = vld [vmem:[#allocation3 + $0x190] sm:$0xf]  ;;  %v3332_v1 = vor.u32 %v2967_v57, %v2653_v58  ;;  %v2965_v2 = vld [vmem:[#allocation3 + $0x1bc] sm:$0xf0] }
  0x23   :  { %v2968_v3 = vld [vmem:[#allocation3 + $0x1fc] sm:$0xf]  ;;  %v2661_v4 = vld [vmem:[#allocation3 + $0x228] sm:$0xf0]  ;;  %v2963_v5 = vld [vmem:[#allocation3 + $0x194] sm:$0xf]  ;;  %v3335_v7 = vor.u32 %v2970_v63, %v2659_v62  ;;  %v3339_v8 = vor.u32 %v2965_v2, %v2635_v0 }
  0x24   :  { %296 = vmatpush.bf16.msra.mxu0 %v2444_v30  ;;  %v2637_v6 = vld [vmem:[#allocation3 + $0x1c0] sm:$0xf0]  ;;  %v3341_v9 = vor.u32 %v2968_v3, %v2661_v4  ;;  %v2643_v10 = vld [vmem:[#allocation3 + $0x198] sm:$0xf]  ;;  %v2966_v11 = vld [vmem:[#allocation3 + $0x1c4] sm:$0xf0] }
  0x25   :  { %335 = vmatpush.bf16.msra.mxu1 %v2448_v33  ;;  %v3344_v12 = vor.u32 %v2963_v5, %v2637_v6  ;;  %v3347_v13 = vor.u32 %v2966_v11, %v2643_v10  ;;  %v2910_v14 = vld [vmem:[%s4650_s0 + $0x8] sm:$0xff]  ;;  %v2619_v15 = vld [vmem:[#allocation3 + $0x130] sm:$0xf]  ;;  %v2961_v16 = vld [vmem:[#allocation3 + $0x15c] sm:$0xf0] }
  0x26   :  { %374 = vmatpush.bf16.msra.mxu2 %v2452_v34  ;;  %413 = vmatpush.bf16.msra.mxu3 %v2456_v37  ;;  %v2959_v17 = vld [vmem:[#allocation3 + $0x134] sm:$0xf]  ;;  %v3356_v18 = vor.u32 %v2961_v16, %v2619_v15  ;;  %v2621_v19 = vld [vmem:[#allocation3 + $0x160] sm:$0xf0]  ;;  %v2964_v20 = vld [vmem:[#allocation3 + $0x19c] sm:$0xf] }
  0x27   :  { %297 = vmatmul.bf16.vlgmr.msra.gmra.mxu0 %v2909_v35  ;;  %v2645_v21 = vld [vmem:[#allocation3 + $0x1c8] sm:$0xf0]  ;;  %v3358_v22 = vor.u32 %v2959_v17, %v2621_v19  ;;  %v2627_v24 = vld [vmem:[#allocation3 + $0x138] sm:$0xf]  ;;  %v2962_v25 = vld [vmem:[#allocation3 + $0x164] sm:$0xf0] }
  0x28   :  { %693 = vmatpush.bf16.msrb.mxu0 %v3308_v38  ;;  %336 = vmatmul.bf16.vlgmr.msra.gmra.mxu1 %v2909_v35  ;;  %v3360_v23 = vor.u32 %v2964_v20, %v2645_v21  ;;  %v2603_v26 = vld [vmem:[#allocation3 + $0xd0] sm:$0xf]  ;;  %v3363_v27 = vor.u32 %v2962_v25, %v2627_v24  ;;  %v2957_v28 = vld [vmem:[#allocation3 + $0xfc] sm:$0xf0]  ;;  %v2955_v29 = vld [vmem:[#allocation3 + $0xd4] sm:$0xf] }
  0x29   :  { %707 = vmatpush.bf16.msrb.mxu1 %v3310_v41  ;;  %375 = vmatmul.bf16.vlgmr.msra.gmra.mxu2 %v2909_v35  ;;  %v2605_v30 = vld [vmem:[#allocation3 + $0x100] sm:$0xf0]  ;;  %v3367_v31 = vor.u32 %v2957_v28, %v2603_v26  ;;  %v2960_v33 = vld [vmem:[#allocation3 + $0x13c] sm:$0xf]  ;;  %v2629_v34 = vld [vmem:[#allocation3 + $0x168] sm:$0xf0] }
  0x2a   :  { %414 = vmatmul.bf16.vlgmr.msra.gmra.mxu3 %v2909_v35  ;;  %721 = vmatpush.bf16.msrb.mxu2 %v3312_v47  ;;  %v3369_v32 = vor.u32 %v2955_v29, %v2605_v30  ;;  %v3372_v35 = vor.u32 %v2960_v33, %v2629_v34  ;;  %v2911_v36 = vld [vmem:[%s4650_s0 + $0x10] sm:$0xff]  ;;  %v2611_v37 = vld [vmem:[#allocation3 + $0xd8] sm:$0xf]  ;;  %v2958_v39 = vld [vmem:[#allocation3 + $0x104] sm:$0xf0]  ;;  %v3271_v24 = vmov 0  }
  0x2b   :  { %735 = vmatpush.bf16.msrb.mxu3 %v3317_v49  ;;  %v2587_v40 = vld [vmem:[#allocation3 + $0x70] sm:$0xf]  ;;  %v3380_v42 = vor.u32 %v2958_v39, %v2611_v37  ;;  %v2953_v43 = vld [vmem:[#allocation3 + $0x9c] sm:$0xf0]  ;;  %v2951_v44 = vld [vmem:[#allocation3 + $0x74] sm:$0xf] }
  0x2c   :  { %694 = vmatpush.bf16.msrb.mxu0 %v3315_v48  ;;  %v2589_v45 = vld [vmem:[#allocation3 + $0xa0] sm:$0xf0]  ;;  %v3382_v46 = vor.u32 %v2953_v43, %v2587_v40  ;;  %v2956_v51 = vld [vmem:[#allocation3 + $0xdc] sm:$0xf]  ;;  %v2613_v52 = vld [vmem:[#allocation3 + $0x108] sm:$0xf0] }
  0x2d   :  { %708 = vmatpush.bf16.msrb.mxu1 %v3320_v53  ;;  %v3384_v50 = vor.u32 %v2951_v44, %v2589_v45  ;;  %v2595_v54 = vld [vmem:[#allocation3 + $0x78] sm:$0xf]  ;;  %v3387_v55 = vor.u32 %v2956_v51, %v2613_v52  ;;  %v2954_v56 = vld [vmem:[#allocation3 + $0xa4] sm:$0xf0]  ;;  %v2571_v62 = vld [vmem:[#allocation3 + $0x10] sm:$0xf] }
  0x2e   :  { %722 = vmatpush.bf16.msrb.mxu2 %v3323_v59  ;;  %v3391_v57 = vor.u32 %v2954_v56, %v2595_v54  ;;  %v2912_v58 = vld [vmem:[%s4650_s0 + $0x18] sm:$0xff]  ;;  %v2949_v63 = vld [vmem:[#allocation3 + $0x3c] sm:$0xf0]  ;;  %v2947_v0 = vld [vmem:[#allocation3 + $0x14] sm:$0xf] }
  0x2f   :  { %736 = vmatpush.bf16.msrb.mxu3 %v3329_v61  ;;  %v3398_v2 = vor.u32 %v2949_v63, %v2571_v62  ;;  %v2573_v3 = vld [vmem:[#allocation3 + $0x40] sm:$0xf0]  ;;  %v2952_v4 = vld [vmem:[#allocation3 + $0x7c] sm:$0xf]  ;;  %v2597_v5 = vld [vmem:[#allocation3 + $0xa8] sm:$0xf0] }
  0x30   :  { %695 = vmatpush.bf16.msrb.mxu0 %v3327_v60  ;;  %4688 = vst [vmem:[#allocation6_spill] sm:$0xff] %v3391_v57  ;;  %v3400_v6 = vor.u32 %v2947_v0, %v2573_v3  ;;  %v3402_v10 = vor.u32 %v2952_v4, %v2597_v5  ;;  %v2579_v11 = vld [vmem:[#allocation3 + $0x18] sm:$0xf]  ;;  %v2948_v15 = vld [vmem:[#allocation3 + $0x1c] sm:$0xf]  ;;  %v2913_v20 = vld [vmem:[%s4650_s0 + $0x20] sm:$0xff] }
  0x31   :  { %709 = vmatpush.bf16.msrb.mxu1 %v3332_v1  ;;  %4689 = vst [vmem:[#allocation7_spill] sm:$0xff] %v3398_v2  ;;  %v2581_v17 = vld [vmem:[#allocation3 + $0x48] sm:$0xf0] }
  0x32   :  { %723 = vmatpush.bf16.msrb.mxu2 %v3335_v7  ;;  %4690 = vst [vmem:[#allocation8_spill] sm:$0xff] %v3400_v6  ;;  %v3409_v19 = vor.u32 %v2948_v15, %v2581_v17  ;;  %v2914_v21 = vld [vmem:[%s4650_s0 + $0x28] sm:$0xff] }
  0x33   :  { %737 = vmatpush.bf16.msrb.mxu3 %v3341_v9  ;;  %4691 = vst [vmem:[#allocation9_spill] sm:$0xff] %v3402_v10 }
  0x34   :  { %696 = vmatpush.bf16.msrb.mxu0 %v3339_v8  ;;  %4693 = vst [vmem:[#allocation11_spill] sm:$0xff] %v3409_v19 }
  0x35   :  { %710 = vmatpush.bf16.msrb.mxu1 %v3344_v12 }
  0x36   :  { %724 = vmatpush.bf16.msrb.mxu2 %v3347_v13 }
  0x37   :  { %302 = vmatmul.bf16.gmra.mxu0 %v2910_v14  ;;  %738 = vmatpush.bf16.msrb.mxu3 %v3360_v23 }
  0x38   :  { %341 = vmatmul.bf16.gmra.mxu1 %v2910_v14  ;;  %697 = vmatpush.bf16.msrb.mxu0 %v3356_v18 }
  0x39   :  { %380 = vmatmul.bf16.gmra.mxu2 %v2910_v14  ;;  %711 = vmatpush.bf16.msrb.mxu1 %v3358_v22 }
  0x3a   :  { %419 = vmatmul.bf16.gmra.mxu3 %v2910_v14  ;;  %725 = vmatpush.bf16.msrb.mxu2 %v3363_v27  ;;  %v2950_v14 = vld [vmem:[#allocation3 + $0x44] sm:$0xf0] }
  0x3b   :  { %739 = vmatpush.bf16.msrb.mxu3 %v3372_v35  ;;  %v3405_v16 = vor.u32 %v2950_v14, %v2579_v11 }
  0x3c   :  { %698 = vmatpush.bf16.msrb.mxu0 %v3367_v31 }
  0x3d   :  { %712 = vmatpush.bf16.msrb.mxu1 %v3369_v32  ;;  %4692 = vst [vmem:[#allocation10_spill] sm:$0xff] %v3405_v16 }
  0x3e   :  { %726 = vmatpush.bf16.msrb.mxu2 %v3380_v42 }
  0x3f   :  { %740 = vmatpush.bf16.msrb.mxu3 %v3387_v55 }
  0x40   :  { %699 = vmatpush.bf16.msrb.mxu0 %v3382_v46 }
  0x41   :  { %713 = vmatpush.bf16.msrb.mxu1 %v3384_v50 }
  0x42   :  { %727 = vmatpush.bf16.msrb.mxu2 %v3391_v57 }
  0x43   :  { %741 = vmatpush.bf16.msrb.mxu3 %v3402_v10 }
  0x44   :  { %700 = vmatpush.bf16.msrb.mxu0 %v3398_v2 }
  0x45   :  { %714 = vmatpush.bf16.msrb.mxu1 %v3400_v6 }
  0x46   :  { %728 = vmatpush.bf16.msrb.mxu2 %v3405_v16 }
  0x47   :  { %307 = vmatmul.bf16.gmra.mxu0 %v2911_v36  ;;  %742 = vmatpush.bf16.msrb.mxu3 %v3409_v19 }
  0x48   :  { %346 = vmatmul.bf16.gmra.mxu1 %v2911_v36  ;;  %904 = vmatpush.bf16.msra.mxu0 %v3308_v38 }
  0x49   :  { %385 = vmatmul.bf16.gmra.mxu2 %v2911_v36  ;;  %918 = vmatpush.bf16.msra.mxu1 %v3310_v41 }
  0x4a   :  { %424 = vmatmul.bf16.gmra.mxu3 %v2911_v36  ;;  %932 = vmatpush.bf16.msra.mxu2 %v3312_v47 }
  0x4b   :  { %946 = vmatpush.bf16.msra.mxu3 %v3317_v49 }
  0x4c   :  { %905 = vmatpush.bf16.msra.mxu0 %v3315_v48 }
  0x4d   :  { %919 = vmatpush.bf16.msra.mxu1 %v3320_v53 }
  0x4e   :  { %933 = vmatpush.bf16.msra.mxu2 %v3323_v59 }
  0x4f   :  { %947 = vmatpush.bf16.msra.mxu3 %v3329_v61 }
  0x50   :  { %906 = vmatpush.bf16.msra.mxu0 %v3327_v60 }
  0x51   :  { %920 = vmatpush.bf16.msra.mxu1 %v3332_v1 }
  0x52   :  { %934 = vmatpush.bf16.msra.mxu2 %v3335_v7 }
  0x53   :  { %948 = vmatpush.bf16.msra.mxu3 %v3341_v9 }
  0x54   :  { %907 = vmatpush.bf16.msra.mxu0 %v3339_v8 }
  0x55   :  { %921 = vmatpush.bf16.msra.mxu1 %v3344_v12 }
  0x56   :  { %935 = vmatpush.bf16.msra.mxu2 %v3347_v13 }
  0x57   :  { %312 = vmatmul.bf16.gmra.mxu0 %v2912_v58  ;;  %949 = vmatpush.bf16.msra.mxu3 %v3360_v23 }
  0x58   :  { %351 = vmatmul.bf16.gmra.mxu1 %v2912_v58  ;;  %908 = vmatpush.bf16.msra.mxu0 %v3356_v18 }
  0x59   :  { %390 = vmatmul.bf16.gmra.mxu2 %v2912_v58  ;;  %922 = vmatpush.bf16.msra.mxu1 %v3358_v22 }
  0x5a   :  { %429 = vmatmul.bf16.gmra.mxu3 %v2912_v58  ;;  %936 = vmatpush.bf16.msra.mxu2 %v3363_v27 }
  0x5b   :  { %950 = vmatpush.bf16.msra.mxu3 %v3372_v35 }
  0x5c   :  { %909 = vmatpush.bf16.msra.mxu0 %v3367_v31 }
  0x5d   :  { %923 = vmatpush.bf16.msra.mxu1 %v3369_v32 }
  0x5e   :  { %937 = vmatpush.bf16.msra.mxu2 %v3380_v42 }
  0x5f   :  { %951 = vmatpush.bf16.msra.mxu3 %v3387_v55 }
  0x60   :  { %910 = vmatpush.bf16.msra.mxu0 %v3382_v46 }
  0x61   :  { %924 = vmatpush.bf16.msra.mxu1 %v3384_v50 }
  0x62   :  { %938 = vmatpush.bf16.msra.mxu2 %v3391_v57 }
  0x63   :  { %952 = vmatpush.bf16.msra.mxu3 %v3402_v10 }
  0x64   :  { %911 = vmatpush.bf16.msra.mxu0 %v3398_v2 }
  0x65   :  { %925 = vmatpush.bf16.msra.mxu1 %v3400_v6 }
  0x66   :  { %939 = vmatpush.bf16.msra.mxu2 %v3405_v16 }
  0x67   :  { %317 = vmatmul.bf16.gmra.mxu0 %v2913_v20  ;;  %953 = vmatpush.bf16.msra.mxu3 %v3409_v19 }
  0x68   :  { %356 = vmatmul.bf16.gmra.mxu1 %v2913_v20 }
  0x69   :  { %395 = vmatmul.bf16.gmra.mxu2 %v2913_v20 }
  0x6a   :  { %434 = vmatmul.bf16.gmra.mxu3 %v2913_v20 }
  0x77   :  { %322 = vmatmul.bf16.gmra.mxu0 %v2914_v21 }
  0x78   :  { %361 = vmatmul.bf16.gmra.mxu1 %v2914_v21 }
  0x79   :  { %400 = vmatmul.bf16.gmra.mxu2 %v2914_v21 }
  0x7a   :  { %439 = vmatmul.bf16.gmra.mxu3 %v2914_v21 }
  0x87   :  { %701 = vmatmul.bf16.vlgmr.msrb.gmra.mxu0 %v3271_v24 }
  0x88   :  { %715 = vmatmul.bf16.vlgmr.msrb.gmra.mxu1 %v3271_v24  ;;  %1115 = vmatpush.bf16.msrb.mxu0 %v3308_v38 }
  0x89   :  { %729 = vmatmul.bf16.vlgmr.msrb.gmra.mxu2 %v3271_v24  ;;  %1129 = vmatpush.bf16.msrb.mxu1 %v3310_v41 }
  0x8a   :  { %743 = vmatmul.bf16.vlgmr.msrb.gmra.mxu3 %v3271_v24  ;;  %1143 = vmatpush.bf16.msrb.mxu2 %v3312_v47 }
  0x8b   :  { %1157 = vmatpush.bf16.msrb.mxu3 %v3317_v49 }
  0x8c   :  { %1116 = vmatpush.bf16.msrb.mxu0 %v3315_v48 }
  0x8d   :  { %1130 = vmatpush.bf16.msrb.mxu1 %v3320_v53 }
  0x8e   :  { %1144 = vmatpush.bf16.msrb.mxu2 %v3323_v59 }
  0x8f   :  { %1158 = vmatpush.bf16.msrb.mxu3 %v3329_v61 }
  0x90   :  { %1117 = vmatpush.bf16.msrb.mxu0 %v3327_v60 }
  0x91   :  { %1131 = vmatpush.bf16.msrb.mxu1 %v3332_v1 }
  0x92   :  { %1145 = vmatpush.bf16.msrb.mxu2 %v3335_v7 }
  0x93   :  { %1159 = vmatpush.bf16.msrb.mxu3 %v3341_v9 }
  0x94   :  { %1118 = vmatpush.bf16.msrb.mxu0 %v3339_v8 }
  0x95   :  { %1132 = vmatpush.bf16.msrb.mxu1 %v3344_v12 }
  0x96   :  { %1146 = vmatpush.bf16.msrb.mxu2 %v3347_v13 }
  0x97   :  { %1160 = vmatpush.bf16.msrb.mxu3 %v3360_v23 }
  0x98   :  { %1119 = vmatpush.bf16.msrb.mxu0 %v3356_v18 }
  0x99   :  { %1133 = vmatpush.bf16.msrb.mxu1 %v3358_v22 }
  0x9a   :  { %1147 = vmatpush.bf16.msrb.mxu2 %v3363_v27 }
  0x9b   :  { %1161 = vmatpush.bf16.msrb.mxu3 %v3372_v35 }
  0x9c   :  { %1120 = vmatpush.bf16.msrb.mxu0 %v3367_v31 }
  0x9d   :  { %1134 = vmatpush.bf16.msrb.mxu1 %v3369_v32 }
  0x9e   :  { %1148 = vmatpush.bf16.msrb.mxu2 %v3380_v42 }
  0x9f   :  { %1162 = vmatpush.bf16.msrb.mxu3 %v3387_v55 }
  0xa0   :  { %1121 = vmatpush.bf16.msrb.mxu0 %v3382_v46 }
  0xa1   :  { %1135 = vmatpush.bf16.msrb.mxu1 %v3384_v50 }
  0xa2   :  { %1149 = vmatpush.bf16.msrb.mxu2 %v3391_v57 }
  0xa3   :  { %1163 = vmatpush.bf16.msrb.mxu3 %v3402_v10 }
  0xa4   :  { %v298_v25 = vpop.f32.mrf.mxu0  ;;  %1122 = vmatpush.bf16.msrb.mxu0 %v3398_v2 }
  0xa5   :  { %v337_v26 = vpop.f32.mrf.mxu1  ;;  %1136 = vmatpush.bf16.msrb.mxu1 %v3400_v6 }
  0xa6   :  { %1150 = vmatpush.bf16.msrb.mxu2 %v3405_v16 }
  0xa7   :  { %1164 = vmatpush.bf16.msrb.mxu3 %v3409_v19 }
  0xac   :  { %v376_v28 = vpop.f32.mrf.mxu2  ;;  %v300_v30 = vpop.f32.mrf.mxu0 }
  0xad   :  { %v3483_v29 = vpop.f32.mrf.mxu3  ;;  %v339_v33 = vpop.f32.mrf.mxu1 }
  0xb4   :  { %v3485_v34 = vpop.f32.mrf.mxu2  ;;  %v3489_v37 = vpop.f32.mrf.mxu0 }
  0xb5   :  { %v3487_v36 = vpop.f32.mrf.mxu3  ;;  %v3491_v39 = vpop.f32.mrf.mxu1 }
  0xb6   :  { %4694 = vst [vmem:[#allocation12_spill] sm:$0xff] %v3491_v39 }
  0xbc   :  { %v3493_v40 = vpop.f32.mrf.mxu2  ;;  %v3497_v44 = vpop.f32.mrf.mxu0 }
  0xbd   :  { %4695 = vst [vmem:[#allocation13_spill] sm:$0xff] %v3493_v40  ;;  %v3495_v43 = vpop.f32.mrf.mxu3  ;;  %v3499_v45 = vpop.f32.mrf.mxu1 }
  0xbe   :  { %4696 = vst [vmem:[#allocation14_spill] sm:$0xff] %v3495_v43 }
  0xbf   :  { %4697 = vst [vmem:[#allocation15_spill] sm:$0xff] %v3497_v44 }
  0xc0   :  { %4698 = vst [vmem:[#allocation16_spill] sm:$0xff] %v3499_v45 }
  0xc4   :  { %v3501_v51 = vpop.f32.mrf.mxu2  ;;  %v3505_v54 = vpop.f32.mrf.mxu0 }
  0xc5   :  { %4699 = vst [vmem:[#allocation17_spill] sm:$0xff] %v3501_v51  ;;  %v3503_v52 = vpop.f32.mrf.mxu3  ;;  %v3507_v56 = vpop.f32.mrf.mxu1 }
  0xc6   :  { %4700 = vst [vmem:[#allocation18_spill] sm:$0xff] %v3503_v52 }
  0xc7   :  { %4701 = vst [vmem:[#allocation19_spill] sm:$0xff] %v3505_v54 }
  0xc8   :  { %4702 = vst [vmem:[#allocation20_spill] sm:$0xff] %v3507_v56 }
  0xcc   :  { %v3509_v58 = vpop.f32.mrf.mxu2  ;;  %v3513_v63 = vpop.f32.mrf.mxu0 }
  0xcd   :  { %4703 = vst [vmem:[#allocation21_spill] sm:$0xff] %v3509_v58  ;;  %v3511_v62 = vpop.f32.mrf.mxu3  ;;  %v3515_v0 = vpop.f32.mrf.mxu1 }
  0xce   :  { %4704 = vst [vmem:[#allocation22_spill] sm:$0xff] %v3511_v62 }
  0xcf   :  { %4705 = vst [vmem:[#allocation23_spill] sm:$0xff] %v3513_v63 }
  0xd0   :  { %4706 = vst [vmem:[#allocation24_spill] sm:$0xff] %v3515_v0 }
  0xd4   :  { %v3517_v3 = vpop.f32.mrf.mxu2  ;;  %v3521_v5 = vpop.f32.mrf.mxu0 }
  0xd5   :  { %4707 = vst [vmem:[#allocation25_spill] sm:$0xff] %v3517_v3  ;;  %v3519_v4 = vpop.f32.mrf.mxu3  ;;  %v3523_v11 = vpop.f32.mrf.mxu1 }
  0xd6   :  { %4708 = vst [vmem:[#allocation26_spill] sm:$0xff] %v3519_v4 }
  0xd7   :  { %4709 = vst [vmem:[#allocation27_spill] sm:$0xff] %v3521_v5 }
  0xd8   :  { %4710 = vst [vmem:[#allocation28_spill] sm:$0xff] %v3523_v11 }
  0xdc   :  { %v3525_v14 = vpop.f32.mrf.mxu2  ;;  %v3529_v17 = vpop.f32.mrf.mxu0 }
  0xdd   :  { %4711 = vst [vmem:[#allocation29_spill] sm:$0xff] %v3525_v14  ;;  %v3527_v15 = vpop.f32.mrf.mxu3  ;;  %v3531_v20 = vpop.f32.mrf.mxu1 }
  0xde   :  { %4712 = vst [vmem:[#allocation30_spill] sm:$0xff] %v3527_v15 }
  0xdf   :  { %4713 = vst [vmem:[#allocation31_spill] sm:$0xff] %v3529_v17 }
  0xe0   :  { %4714 = vst [vmem:[#allocation32_spill] sm:$0xff] %v3531_v20 }
  0xe4   :  { %v3533_v21 = vpop.f32.mrf.mxu2  ;;  %v3537_v62 = vpop.f32.mrf.mxu0 }
  0xe5   :  { %4715 = vst [vmem:[#allocation33_spill] sm:$0xff] %v3533_v21  ;;  %v3535_v24 = vpop.f32.mrf.mxu3  ;;  %v3539_v3 = vpop.f32.mrf.mxu1 }
  0xe6   :  { %4716 = vst [vmem:[#allocation34_spill] sm:$0xff] %v3535_v24 }
  0xe7   :  { %4717 = vst [vmem:[#allocation35_spill] sm:$0xff] %v3537_v62 }
  0xe8   :  { %4718 = vst [vmem:[#allocation36_spill] sm:$0xff] %v3539_v3 }
  0xec   :  { %v3541_v4 = vpop.f32.mrf.mxu2  ;;  %v3545_v11 = vpop.f32.mrf.mxu0 }
  0xed   :  { %4719 = vst [vmem:[#allocation37_spill] sm:$0xff] %v3541_v4  ;;  %v3543_v5 = vpop.f32.mrf.mxu3  ;;  %v3547_v14 = vpop.f32.mrf.mxu1  ;;  %v83_v4 = vld [vmem:[%s4654_s4] sm:$0xf] }
  0xee   :  { %4720 = vst [vmem:[#allocation38_spill] sm:$0xff] %v3543_v5  ;;  %v3576_v63 = vperm.slane %v83_v4, 2 }
  0xef   :  { %4721 = vst [vmem:[#allocation39_spill] sm:$0xff] %v3545_v11 }
  0xf0   :  { %4722 = vst [vmem:[#allocation40_spill] sm:$0xff] %v3547_v14  ;;  %v3568_v14 = vperm.slane %v83_v4, 0  ;;  %v377_v56 = vadd.f32 %v376_v28, %v3576_v63 }
  0xf1   :  { %4734 = vst [vmem:[#allocation52_spill] sm:$0xff] %v3576_v63 }
  0xf2   :  { %4731 = vst [vmem:[#allocation49_spill] sm:$0xff] %v3568_v14 }
  0xf4   :  { %v3549_v15 = vpop.f32.mrf.mxu2  ;;  %v3553_v20 = vpop.f32.mrf.mxu0 }
  0xf5   :  { %4723 = vst [vmem:[#allocation41_spill] sm:$0xff] %v3549_v15  ;;  %v3551_v17 = vpop.f32.mrf.mxu3  ;;  %v3555_v21 = vpop.f32.mrf.mxu1  ;;  %v3570_v15 = vperm.slane %v83_v4, 1 }
  0xf6   :  { %4724 = vst [vmem:[#allocation42_spill] sm:$0xff] %v3551_v17 }
  0xf7   :  { %4725 = vst [vmem:[#allocation43_spill] sm:$0xff] %v3553_v20  ;;  %v299_v20 = vadd.f32 %v298_v25, %v3568_v14  ;;  %v301_v25 = vadd.f32 %v300_v30, %v3568_v14  ;;  %v379_v30 = vadd.f32 %v3485_v34, %v3576_v63 }
  0xf8   :  { %4726 = vst [vmem:[#allocation44_spill] sm:$0xff] %v3555_v21 }
  0xf9   :  { %4732 = vst [vmem:[#allocation50_spill] sm:$0xff] %v3570_v15 }
  0xfc   :  { %v3557_v24 = vpop.f32.mrf.mxu2  ;;  %v3562_v3 = vpop.f32.mrf.mxu0 }
  0xfd   :  { %4727 = vst [vmem:[#allocation45_spill] sm:$0xff] %v3557_v24  ;;  %v3564_v5 = vpop.f32.mrf.mxu1  ;;  %v3566_v11 = vpop.f32.mrf.mxu3  ;;  %v338_v24 = vadd.f32 %v337_v26, %v3570_v15 }
  0xfe   :  { %4728 = vst [vmem:[#allocation46_spill] sm:$0xff] %v3562_v3 }
  0xff   :  { %4729 = vst [vmem:[#allocation47_spill] sm:$0xff] %v3564_v5 }
 0x100   :  { %4730 = vst [vmem:[#allocation48_spill] sm:$0xff] %v3566_v11 }
 0x104   :  { %v3573_v17 = vpop.f32.mrf.mxu2  ;;  %v702_v21 = vpop.f32.mrf.mxu0 }
 0x105   :  { %4733 = vst [vmem:[#allocation51_spill] sm:$0xff] %v3573_v17  ;;  %v749_v62 = vadd.f32 %v702_v21, %v299_v20  ;;  %v716_v0 = vpop.f32.mrf.mxu1  ;;  %v3578_v5 = vpop.f32.mrf.mxu3  ;;  %v340_v17 = vadd.f32 %v339_v33, %v3570_v15 }
 0x106   :  { %v750_v3 = vadd.f32 %v716_v0, %v338_v24  ;;  %4735 = vst [vmem:[#allocation53_spill] sm:$0xff] %v3578_v5  ;;  %v3583_v5 = vperm.slane %v83_v4, 3 }
 0x107   :  { %v2697_v58 = vmul.f32 -1.442695, %v749_v62 }
 0x108   :  { %v2698_v11 = vmul.f32 -1.442695, %v750_v3  ;;  %4736 = vst [vmem:[#allocation54_spill] sm:$0xff] %v3583_v5 }
 0x109   :  { %3024 = vpow2.f32 %v2697_v58 }
 0x10a   :  { %3026 = vpow2.f32 %v2698_v11 }
 0x10c   :  { %v730_v54 = vpop.f32.mrf.mxu2  ;;  %v704_v52 = vpop.f32.mrf.mxu0 }
 0x10d   :  { %v751_v26 = vadd.f32 %v730_v54, %v377_v56  ;;  %v753_v20 = vadd.f32 %v704_v52, %v301_v25  ;;  %v718_v21 = vpop.f32.mrf.mxu1  ;;  %v744_v33 = vpop.f32.mrf.mxu3  ;;  %v416_v54 = vadd.f32 %v3483_v29, %v3583_v5  ;;  %v418_v29 = vadd.f32 %v3487_v36, %v3583_v5 }
 0x10e   :  { %v754_v51 = vadd.f32 %v718_v21, %v340_v17 }
 0x10f   :  { %v2699_v43 = vmul.f32 -1.442695, %v751_v26  ;;  %v3025_v0 = vpop.eup %3024  ;;  %v2700_v62 = vmul.f32 -1.442695, %v753_v20  ;;  %v752_v4 = vadd.f32 %v744_v33, %v416_v54 }
 0x110   :  { %v3027_v24 = vpop.eup %3026  ;;  %v775_v58 = vadd.f32 1.0, %v3025_v0  ;;  %v2701_v28 = vmul.f32 -1.442695, %v754_v51 }
 0x111   :  { %3028 = vpow2.f32 %v2699_v43  ;;  %v776_v3 = vadd.f32 1.0, %v3027_v24 }
 0x112   :  { %3030 = vpow2.f32 %v2700_v62  ;;  %v790_v33 = vand.u32 2147483647, %v775_v58  ;;  %vm786_vm1 = vweird.f32 %v775_v58 }
 0x113   :  { %3032 = vrcp.f32 %v775_v58  ;;  %vm801_vm3 = vweird.f32 %v776_v3 }
 0x114   :  { %3034 = vrcp.f32 %v776_v3  ;;  %v732_v52 = vpop.f32.mrf.mxu2  ;;  %vm791_vm5 = vcmp.eq.f32.partialorder %v790_v33, 8.507059e+37 }
 0x115   :  { %3036 = vpow2.f32 %v2701_v28  ;;  %v755_v56 = vadd.f32 %v732_v52, %v379_v30  ;;  %v807_v30 = vand.u32 2147483648, %v776_v3  ;;  %v792_v52 = vand.u32 2147483648, %v775_v58  ;;  %v746_v54 = vpop.f32.mrf.mxu3 }
 0x117   :  { %v3029_v11 = vpop.eup %3028  ;;  %v2702_v17 = vmul.f32 -1.442695, %v755_v56  ;;  %v808_v44 = vor.u32 1.1754944e-38, %v807_v30 }
 0x118   :  { %v3031_v25 = vpop.eup %3030  ;;  %v3589_v43 = vadd.f32 1.0, %v3029_v11  ;;  %v805_v11 = vand.u32 2147483647, %v776_v3 }
 0x119   :  { %v3033_v51 = vpop.eup %3032  ;;  %v3591_v26 = vadd.f32 1.0, %v3031_v25  ;;  %3038 = vpow2.f32 %v2702_v17 }
 0x11a   :  { %v3035_v34 = vpop.eup %3034  ;;  %v782_v20 = vmul.f32 %v3033_v51, %v775_v58  ;;  %3040 = vrcp.f32 %v3589_v43  ;;  %vm787_vm0 = vweird.f32 %v3033_v51  ;;  %v3609_v58 = vld [vmem:[%s4651_s1] sm:$0xff]  ;;  %vm806_vm7 = vcmp.eq.f32.partialorder %v805_v11, 8.507059e+37 }
 0x11b   :  { %v3037_v21 = vpop.eup %3036  ;;  %v797_v0 = vmul.f32 %v3035_v34, %v776_v3  ;;  %3042 = vtanh.f32 %v752_v4  ;;  %vm802_vm2 = vweird.f32 %v3035_v34  ;;  %vm788_vm4 = vmor %vm786_vm1, %vm787_vm0  ;;  %vm883_vm8 = vcmp.gt.s32.totalorder %v3609_v58, 0 }
 0x11c   :  { %v783_v62 = vsub.f32 1.0, %v782_v20  ;;  %3044 = vrcp.f32 %v3591_v26  ;;  %v3597_v24 = vadd.f32 1.0, %v3037_v21  ;;  %v756_v21 = vadd.f32 %v746_v54, %v418_v29  ;;  %vm803_vm6 = vmor %vm801_vm3, %vm802_vm2 }
 0x11d   :  { %v798_v28 = vsub.f32 1.0, %v797_v0  ;;  %vm816_vm9 = vweird.f32 %v3589_v43  ;;  %vm831_vm14 = vweird.f32 %v3591_v26 }
 0x11e   :  { %v784_v56 = vmul.f32 %v3033_v51, %v783_v62  ;;  %3046 = vrcp.f32 %v3597_v24  ;;  %v793_v62 = vor.u32 1.1754944e-38, %v792_v52  ;;  %vm846_vm15 = vweird.f32 %v3597_v24 }
 0x11f   :  { %v3039_v17 = vpop.eup %3038  ;;  %v799_v4 = vmul.f32 %v3035_v34, %v798_v28 }
 0x120   :  { %v3600_v36 = vpop.eup %3040  ;;  %v785_v25 = vadd.f32 %v3033_v51, %v784_v56  ;;  %v3602_v20 = vadd.f32 1.0, %v3039_v17 }
 0x121   :  { %v3043_v0 = vpop.eup %3042  ;;  %v812_v5 = vmul.f32 %v3600_v36, %v3589_v43  ;;  %v800_v45 = vadd.f32 %v3035_v34, %v799_v4  ;;  %vm817_vm10 = vweird.f32 %v3600_v36 }
 0x122   :  { %v3045_v28 = vpop.eup %3044  ;;  %v789_v3 = vsel %vm788_vm4, %v3033_v51, %v785_v25  ;;  %3048 = vrcp.f32 %v3602_v20  ;;  %vm3628_vm13 = vmor %vm816_vm9, %vm817_vm10 }
 0x123   :  { %v813_v29 = vsub.f32 1.0, %v812_v5  ;;  %v794_v54 = vsel %vm791_vm5, %v793_v62, %v789_v3  ;;  %v804_v56 = vsel %vm803_vm6, %v3035_v34, %v800_v45  ;;  %v827_v33 = vmul.f32 %v3045_v28, %v3591_v26 }
 0x124   :  { %v3047_v52 = vpop.eup %3046  ;;  %v809_v17 = vsel %vm806_vm7, %v808_v44, %v804_v56  ;;  %v875_v4 = vmul.f32 %v3043_v0, %v794_v54  ;;  %3050 = vtanh.f32 %v756_v21  ;;  %v822_v5 = vand.u32 2147483648, %v3589_v43 }
 0x125   :  { %v814_v40 = vmul.f32 %v3600_v36, %v813_v29  ;;  %v873_v30 = vmul.f32 0.0, %v809_v17  ;;  %v828_v51 = vsub.f32 1.0, %v827_v33  ;;  %v842_v25 = vmul.f32 %v3047_v52, %v3597_v24 }
 0x126   :  { %v835_v45 = vand.u32 2147483647, %v3591_v26  ;;  %v837_v34 = vand.u32 2147483648, %v3591_v26  ;;  %v852_v3 = vand.u32 2147483648, %v3597_v24  ;;  %vm832_vm11 = vweird.f32 %v3045_v28 }
 0x127   :  { %v877_v44 = vadd.f32 %v875_v4, %v873_v30  ;;  %v843_v11 = vsub.f32 1.0, %v842_v25  ;;  %v829_v21 = vmul.f32 %v3045_v28, %v828_v51  ;;  %v815_v62 = vadd.f32 %v3600_v36, %v814_v40  ;;  %vm833_vm0 = vmor %vm831_vm14, %vm832_vm11 }
 0x128   :  { %v3049_v0 = vpop.eup %3048  ;;  %v850_v29 = vand.u32 2147483647, %v3597_v24  ;;  %vm847_vm12 = vweird.f32 %v3047_v52  ;;  %v820_v4 = vand.u32 2147483647, %v3589_v43  ;;  %v838_v25 = vor.u32 1.1754944e-38, %v837_v34  ;;  %v3646_v24 = vld [vmem:[%s4651_s1 + $0x8] sm:$0xff] }
 0x129   :  { %3052 = vtanh.f32 %v877_v44  ;;  %v844_v54 = vmul.f32 %v3047_v52, %v843_v11  ;;  %v857_v56 = vmul.f32 %v3049_v0, %v3602_v20  ;;  %v830_v40 = vadd.f32 %v3045_v28, %v829_v21  ;;  %vm848_vm2 = vmor %vm846_vm15, %vm847_vm12 }
 0x12a   :  { %v3051_v33 = vpop.eup %3050  ;;  %v3636_v30 = vsel %vm883_vm8, %v877_v44, 0.0  ;;  %v853_v63 = vor.u32 1.1754944e-38, %v852_v3  ;;  %vm836_vm1 = vcmp.eq.f32.partialorder %v835_v45, 8.507059e+37  ;;  %v819_v43 = vsel %vm3628_vm13, %v3600_v36, %v815_v62  ;;  %vm3725_vm12 = vmpackc.low %vm883_vm8, %vm883_vm8 }
 0x12b   :  { %v858_v51 = vsub.f32 1.0, %v857_v56  ;;  %v845_v11 = vadd.f32 %v3047_v52, %v844_v54  ;;  %v834_v39 = vsel %vm833_vm0, %v3045_v28, %v830_v40  ;;  %v823_v26 = vor.u32 1.1754944e-38, %v822_v5 }
 0x12c   :  { %v839_v21 = vsel %vm836_vm1, %v838_v25, %v834_v39  ;;  %vm851_vm3 = vcmp.eq.f32.partialorder %v850_v29, 8.507059e+37  ;;  %vm821_vm4 = vcmp.eq.f32.partialorder %v820_v4, 8.507059e+37  ;;  %vm884_vm5 = vcmp.gt.s32.totalorder %v3646_v24, 0  ;;  %v4740_v25 = vld [vmem:[#allocation12_spill] sm:$0xff] }
 0x12d   :  { %v849_v15 = vsel %vm848_vm2, %v3047_v52, %v845_v11  ;;  %v859_v34 = vmul.f32 %v3049_v0, %v858_v51  ;;  %v876_v28 = vmul.f32 %v3051_v33, %v839_v21  ;;  %v824_v54 = vsel %vm821_vm4, %v823_v26, %v819_v43  ;;  %vm2703_vm11 = vmpackc.low %vm884_vm5, %vm883_vm8 }
 0x12e   :  { %v854_v44 = vsel %vm851_vm3, %v853_v63, %v849_v15  ;;  %vm862_vm6 = vweird.f32 %v3049_v0  ;;  %v867_v52 = vand.u32 2147483648, %v3602_v20  ;;  %vm861_vm7 = vweird.f32 %v3602_v20  ;;  %vm3737_vm13 = vmpackc.low %vm884_vm5, %vm884_vm5 }
 0x12f   :  { %v3053_v45 = vpop.eup %3052  ;;  %v874_v3 = vmul.f32 0.0, %v854_v44  ;;  %v860_v5 = vadd.f32 %v3049_v0, %v859_v34  ;;  %v865_v15 = vand.u32 2147483647, %v3602_v20  ;;  %vm863_vm9 = vmor %vm861_vm7, %vm862_vm6  ;;  %v304_v20 = vadd.f32 %v3489_v37, %v3568_v14 }
 0x130   :  { %v881_v56 = vmul.f32 %v3053_v45, %v824_v54  ;;  %v868_v29 = vor.u32 1.1754944e-38, %v867_v52  ;;  %v4741_v45 = vld [vmem:[#allocation52_spill] sm:$0xff]  ;;  %vm1095_vm6 = vcmp.gt.s32.totalorder %v3646_v24, 1 }
 0x131   :  { %v878_v36 = vadd.f32 %v876_v28, %v874_v3  ;;  %v864_v62 = vsel %vm863_vm9, %v3049_v0, %v860_v5  ;;  %vm866_vm10 = vcmp.eq.f32.partialorder %v865_v15, 8.507059e+37  ;;  %v4739_v0 = vld [vmem:[#allocation50_spill] sm:$0xff]  ;;  %v4742_v3 = vld [vmem:[#allocation13_spill] sm:$0xff]  ;;  %v4744_v5 = vld [vmem:[#allocation16_spill] sm:$0xff] }
 0x132   :  { %v3651_v39 = vsel %vm883_vm8, %v881_v56, 0.0  ;;  %v869_v17 = vsel %vm866_vm10, %v868_v29, %v864_v62  ;;  %v343_v11 = vadd.f32 %v4740_v25, %v4739_v0  ;;  %v382_v54 = vadd.f32 %v4742_v3, %v4741_v45  ;;  %vm1103_vm10 = vmpackc.low %vm1095_vm6, %vm1095_vm6 }
 0x133   :  { %3054 = vtanh.f32 %v878_v36  ;;  %v3656_v63 = vsel %vm884_vm5, %v878_v36, 0.0  ;;  %v345_v37 = vadd.f32 %v4744_v5, %v4739_v0  ;;  %vm1094_vm8 = vcmp.gt.s32.totalorder %v3609_v58, 1 }
 0x134   :  { %vm1102_vm7 = vmpackc.low %vm1094_vm8, %vm1094_vm8 }
 0x139   :  { %v3055_v33 = vpop.eup %3054 }
 0x13a   :  { %v882_v4 = vmul.f32 %v3055_v33, %v869_v17 }
 0x13c   :  { %v2704_v40 = vpack.c.bf16 %v882_v4, %v881_v56  ;;  %v3666_v51 = vsel %vm884_vm5, %v882_v4, 0.0  ;;  %v4743_v56 = vld [vmem:[#allocation15_spill] sm:$0xff] }
 0x13d   :  { %v306_v36 = vadd.f32 %v4743_v56, %v3568_v14  ;;  %v4746_v56 = vld [vmem:[#allocation54_spill] sm:$0xff] }
 0x13e   :  { %2705 = vmatmul.msk.bf16.vlgmr.msra.gmra.mxu0 %vm2703_vm11, %v2704_v40  ;;  %2708 = vmatmul.msk.bf16.vlgmr.msra.gmra.mxu1 %vm2703_vm11, %v2704_v40 }
 0x13f   :  { %2711 = vmatmul.msk.bf16.vlgmr.msra.gmra.mxu2 %vm2703_vm11, %v2704_v40  ;;  %2714 = vmatmul.msk.bf16.vlgmr.msra.gmra.mxu3 %vm2703_vm11, %v2704_v40 }
 0x140   :  { %1326 = vmatpush.bf16.msra.mxu0 %v3308_v38  ;;  %1340 = vmatpush.bf16.msra.mxu1 %v3310_v41 }
 0x141   :  { %1354 = vmatpush.bf16.msra.mxu2 %v3312_v47  ;;  %1368 = vmatpush.bf16.msra.mxu3 %v3317_v49 }
 0x144   :  { %1327 = vmatpush.bf16.msra.mxu0 %v3315_v48  ;;  %1341 = vmatpush.bf16.msra.mxu1 %v3320_v53 }
 0x145   :  { %1355 = vmatpush.bf16.msra.mxu2 %v3323_v59  ;;  %1369 = vmatpush.bf16.msra.mxu3 %v3329_v61 }
 0x148   :  { %1328 = vmatpush.bf16.msra.mxu0 %v3327_v60  ;;  %1342 = vmatpush.bf16.msra.mxu1 %v3332_v1 }
 0x149   :  { %1356 = vmatpush.bf16.msra.mxu2 %v3335_v7  ;;  %1370 = vmatpush.bf16.msra.mxu3 %v3341_v9 }
 0x14c   :  { %1329 = vmatpush.bf16.msra.mxu0 %v3339_v8  ;;  %1343 = vmatpush.bf16.msra.mxu1 %v3344_v12 }
 0x14d   :  { %1357 = vmatpush.bf16.msra.mxu2 %v3347_v13  ;;  %1371 = vmatpush.bf16.msra.mxu3 %v3360_v23 }
 0x150   :  { %1330 = vmatpush.bf16.msra.mxu0 %v3356_v18  ;;  %1344 = vmatpush.bf16.msra.mxu1 %v3358_v22 }
 0x151   :  { %1358 = vmatpush.bf16.msra.mxu2 %v3363_v27  ;;  %1372 = vmatpush.bf16.msra.mxu3 %v3372_v35 }
 0x154   :  { %1331 = vmatpush.bf16.msra.mxu0 %v3367_v31  ;;  %1345 = vmatpush.bf16.msra.mxu1 %v3369_v32 }
 0x155   :  { %1359 = vmatpush.bf16.msra.mxu2 %v3380_v42  ;;  %1373 = vmatpush.bf16.msra.mxu3 %v3387_v55 }
 0x158   :  { %1332 = vmatpush.bf16.msra.mxu0 %v3382_v46  ;;  %1346 = vmatpush.bf16.msra.mxu1 %v3384_v50 }
 0x159   :  { %1360 = vmatpush.bf16.msra.mxu2 %v3391_v57  ;;  %1374 = vmatpush.bf16.msra.mxu3 %v3402_v10 }
 0x15c   :  { %1333 = vmatpush.bf16.msra.mxu0 %v3398_v2  ;;  %1347 = vmatpush.bf16.msra.mxu1 %v3400_v6 }
 0x15d   :  { %1361 = vmatpush.bf16.msra.mxu2 %v3405_v16  ;;  %1375 = vmatpush.bf16.msra.mxu3 %v3409_v19 }
 0x1bb   :  { %v913_v43 = vpop.f32.mrf.mxu0  ;;  %v927_v26 = vpop.f32.mrf.mxu1 }
 0x1bc   :  { %v960_v21 = vadd.f32 %v913_v43, %v304_v20  ;;  %v961_v34 = vadd.f32 %v927_v26, %v343_v11 }
 0x1be   :  { %v2715_v44 = vmul.f32 -1.442695, %v960_v21  ;;  %v2716_v28 = vmul.f32 -1.442695, %v961_v34  ;;  %v4745_v34 = vld [vmem:[#allocation17_spill] sm:$0xff] }
 0x1c0   :  { %3056 = vpow2.f32 %v2715_v44  ;;  %v384_v44 = vadd.f32 %v4745_v34, %v4741_v45 }
 0x1c1   :  { %3058 = vpow2.f32 %v2716_v28 }
 0x1c2   :  { %v941_v52 = vpop.f32.mrf.mxu2  ;;  %v955_v20 = vpop.f32.mrf.mxu3 }
 0x1c3   :  { %v962_v15 = vadd.f32 %v941_v52, %v382_v54  ;;  %v915_v62 = vpop.f32.mrf.mxu0  ;;  %v929_v29 = vpop.f32.mrf.mxu1 }
 0x1c4   :  { %v964_v33 = vadd.f32 %v915_v62, %v306_v36  ;;  %v965_v17 = vadd.f32 %v929_v29, %v345_v37  ;;  %v4747_v36 = vld [vmem:[#allocation14_spill] sm:$0xff] }
 0x1c5   :  { %v2717_v4 = vmul.f32 -1.442695, %v962_v15  ;;  %v421_v5 = vadd.f32 %v4747_v36, %v4746_v56  ;;  %v3720_v37 = vld [vmem:[%s4650_s0] sm:$0xf]  ;;  %v3732_v29 = vld [vmem:[%s4650_s0 + $0x4] sm:$0xf] }
 0x1c6   :  { %v3057_v40 = vpop.eup %3056  ;;  %v2718_v25 = vmul.f32 -1.442695, %v964_v33  ;;  %v2719_v26 = vmul.f32 -1.442695, %v965_v17  ;;  %v4759_v52 = vsel %vm3737_vm13, %v3732_v29, 0 }
 0x1c7   :  { %v3059_v11 = vpop.eup %3058  ;;  %v986_v43 = vadd.f32 1.0, %v3057_v40  ;;  %3060 = vpow2.f32 %v2717_v4  ;;  %v963_v40 = vadd.f32 %v955_v20, %v421_v5 }
 0x1c8   :  { %v3710_v21 = vadd.f32 1.0, %v3059_v11  ;;  %3062 = vpow2.f32 %v2718_v25 }
 0x1c9   :  { %3064 = vrcp.f32 %v986_v43  ;;  %v1001_v5 = vand.u32 2147483647, %v986_v43  ;;  %vm997_vm1 = vweird.f32 %v986_v43 }
 0x1ca   :  { %3066 = vrcp.f32 %v3710_v21  ;;  %v943_v28 = vpop.f32.mrf.mxu2  ;;  %v1016_v20 = vand.u32 2147483647, %v3710_v21  ;;  %vm1012_vm15 = vweird.f32 %v3710_v21 }
 0x1cb   :  { %3068 = vpow2.f32 %v2719_v26  ;;  %v966_v3 = vadd.f32 %v943_v28, %v384_v44  ;;  %v4752_v26 = vld [vmem:[#allocation18_spill] sm:$0xff]  ;;  %vm3765_vm2 = vcmp.eq.f32.partialorder %v1001_v5, 8.507059e+37 }
 0x1cc   :  { %v423_v34 = vadd.f32 %v4752_v26, %v4746_v56  ;;  %v1018_v56 = vand.u32 2147483648, %v3710_v21  ;;  %vm1017_vm5 = vcmp.eq.f32.partialorder %v1016_v20, 8.507059e+37 }
 0x1cd   :  { %v3061_v54 = vpop.eup %3060  ;;  %v2720_v15 = vmul.f32 -1.442695, %v966_v3  ;;  %v957_v3 = vpop.f32.mrf.mxu3 }
 0x1ce   :  { %v3063_v62 = vpop.eup %3062  ;;  %v3741_v17 = vadd.f32 1.0, %v3061_v54  ;;  %v967_v45 = vadd.f32 %v957_v3, %v423_v34  ;;  %v1019_v3 = vor.u32 1.1754944e-38, %v1018_v56 }
 0x1cf   :  { %v3065_v4 = vpop.eup %3064  ;;  %v3743_v25 = vadd.f32 1.0, %v3063_v62  ;;  %3070 = vpow2.f32 %v2720_v15  ;;  %v1003_v62 = vand.u32 2147483648, %v986_v43 }
 0x1d0   :  { %v3067_v11 = vpop.eup %3066  ;;  %v993_v28 = vmul.f32 %v3065_v4, %v986_v43  ;;  %3072 = vrcp.f32 %v3741_v17  ;;  %vm998_vm14 = vweird.f32 %v3065_v4  ;;  %vm1027_vm9 = vweird.f32 %v3741_v17  ;;  %v1101_v43 = vld [vmem:[%s4650_s0 + $0xc] sm:$0xf] }
 0x1d1   :  { %v3069_v36 = vpop.eup %3068  ;;  %v1008_v54 = vmul.f32 %v3067_v11, %v3710_v21  ;;  %3074 = vrcp.f32 %v3743_v25  ;;  %vm1013_vm0 = vweird.f32 %v3067_v11  ;;  %vm999_vm3 = vmor %vm997_vm1, %vm998_vm14  ;;  %v1033_v20 = vand.u32 2147483648, %v3741_v17 }
 0x1d2   :  { %v994_v15 = vsub.f32 1.0, %v993_v28  ;;  %v3757_v26 = vadd.f32 1.0, %v3069_v36  ;;  %3076 = vtanh.f32 %v963_v40  ;;  %v1004_v40 = vor.u32 1.1754944e-38, %v1003_v62  ;;  %vm3774_vm4 = vmor %vm1012_vm15, %vm1013_vm0  ;;  %v1100_v62 = vld [vmem:[%s4650_s0 + $0x8] sm:$0xf] }
 0x1d3   :  { %v1009_v44 = vsub.f32 1.0, %v1008_v54  ;;  %v3818_v57 = vsel %vm1103_vm10, %v1101_v43, %v4759_v52  ;;  %vm1042_vm0 = vweird.f32 %v3743_v25 }
 0x1d4   :  { %v995_v0 = vmul.f32 %v3065_v4, %v994_v15  ;;  %3078 = vrcp.f32 %v3757_v26  ;;  %v1061_v10 = vand.u32 2147483647, %v3757_v26  ;;  %4760 = vst [vmem:[#allocation13_spill] sm:$0xff] %v3818_v57  ;;  %vm1057_vm13 = vweird.f32 %v3757_v26 }
 0x1d5   :  { %v3071_v14 = vpop.eup %3070  ;;  %v1010_v19 = vmul.f32 %v3067_v11, %v1009_v44  ;;  %3080 = vtanh.f32 %v967_v45 }
 0x1d6   :  { %v3763_v28 = vpop.eup %3072  ;;  %v996_v36 = vadd.f32 %v3065_v4, %v995_v0  ;;  %v3769_v34 = vadd.f32 1.0, %v3071_v14 }
 0x1d7   :  { %v1023_v15 = vmul.f32 %v3763_v28, %v3741_v17  ;;  %v1011_v44 = vadd.f32 %v3067_v11, %v1010_v19  ;;  %v3075_v21 = vpop.eup %3074  ;;  %vm1028_vm11 = vweird.f32 %v3763_v28 }
 0x1d8   :  { %v1000_v0 = vsel %vm999_vm3, %v3065_v4, %v996_v36  ;;  %3082 = vrcp.f32 %v3769_v34  ;;  %v3077_v14 = vpop.eup %3076  ;;  %v1038_v45 = vmul.f32 %v3075_v21, %v3743_v25  ;;  %vm1043_vm14 = vweird.f32 %v3075_v21  ;;  %vm3823_vm15 = vmor %vm1027_vm9, %vm1028_vm11 }
 0x1d9   :  { %v1024_v56 = vsub.f32 1.0, %v1023_v15  ;;  %v1005_v5 = vsel %vm3765_vm2, %v1004_v40, %v1000_v0  ;;  %v1015_v19 = vsel %vm3774_vm4, %v3067_v11, %v1011_v44  ;;  %v1063_v0 = vand.u32 2147483648, %v3757_v26  ;;  %vm1044_vm1 = vmor %vm1042_vm0, %vm1043_vm14 }
 0x1da   :  { %v3079_v4 = vpop.eup %3078  ;;  %v1020_v36 = vsel %vm1017_vm5, %v1019_v3, %v1015_v19  ;;  %v1086_v54 = vmul.f32 %v3077_v14, %v1005_v5  ;;  %v1039_v15 = vsub.f32 1.0, %v1038_v45  ;;  %v1046_v3 = vand.u32 2147483647, %v3743_v25 }
 0x1db   :  { %v1025_v40 = vmul.f32 %v3763_v28, %v1024_v56  ;;  %v1084_v11 = vmul.f32 %v1020_v36, %v3636_v30  ;;  %v1053_v44 = vmul.f32 %v3079_v4, %v3757_v26  ;;  %v1048_v14 = vand.u32 2147483648, %v3743_v25  ;;  %v3081_v19 = vpop.eup %3080 }
 0x1dc   :  { %v4757_v56 = vsel %vm3725_vm12, %v3720_v37, 0  ;;  %v1040_v16 = vmul.f32 %v3075_v21, %v1039_v15  ;;  %vm1058_vm12 = vweird.f32 %v3079_v4  ;;  %v1064_v43 = vor.u32 1.1754944e-38, %v1063_v0 }
 0x1dd   :  { %v3809_v5 = vsel %vm1102_vm7, %v1100_v62, %v4757_v56  ;;  %v1088_v45 = vadd.f32 %v1086_v54, %v1084_v11  ;;  %v1054_v36 = vsub.f32 1.0, %v1053_v44  ;;  %v1026_v2 = vadd.f32 %v3763_v28, %v1025_v40  ;;  %vm1059_vm2 = vmor %vm1057_vm13, %vm1058_vm12 }
 0x1de   :  { %4758 = vst [vmem:[#allocation12_spill] sm:$0xff] %v3809_v5  ;;  %v3083_v6 = vpop.eup %3082  ;;  %v1031_v40 = vand.u32 2147483647, %v3741_v17  ;;  %v1041_v11 = vadd.f32 %v3075_v21, %v1040_v16  ;;  %v1049_v15 = vor.u32 1.1754944e-38, %v1048_v14  ;;  %vm1047_vm3 = vcmp.eq.f32.partialorder %v1046_v3, 8.507059e+37 }
 0x1df   :  { %3084 = vtanh.f32 %v1088_v45  ;;  %v1055_v37 = vmul.f32 %v3079_v4, %v1054_v36  ;;  %v1068_v62 = vmul.f32 %v3083_v6, %v3769_v34  ;;  %v3832_v29 = vsel %vm1094_vm8, %v1088_v45, %v3636_v30 }
 0x1e0   :  { %v1045_v56 = vsel %vm1044_vm1, %v3075_v21, %v1041_v11  ;;  %v1030_v16 = vsel %vm3823_vm15, %v3763_v28, %v1026_v2  ;;  %v1034_v17 = vor.u32 1.1754944e-38, %v1033_v20  ;;  %vm1062_vm4 = vcmp.eq.f32.partialorder %v1061_v10, 8.507059e+37  ;;  %v4766_v11 = vld [vmem:[#allocation8_spill] sm:$0xff] }
 0x1e1   :  { %v1069_v33 = vsub.f32 1.0, %v1068_v62  ;;  %v1056_v44 = vadd.f32 %v3079_v4, %v1055_v37  ;;  %v1050_v25 = vsel %vm1047_vm3, %v1049_v15, %v1045_v56  ;;  %vm1032_vm5 = vcmp.eq.f32.partialorder %v1031_v40, 8.507059e+37  ;;  %v4768_v15 = vld [vmem:[#allocation11_spill] sm:$0xff] }
 0x1e2   :  { %v1087_v52 = vmul.f32 %v3081_v19, %v1050_v25  ;;  %v1035_v37 = vsel %vm1032_vm5, %v1034_v17, %v1030_v16  ;;  %vm1073_vm7 = vweird.f32 %v3083_v6  ;;  %v1078_v28 = vand.u32 2147483648, %v3769_v34  ;;  %v4771_v16 = vld [vmem:[#allocation50_spill] sm:$0xff]  ;;  %v4772_v17 = vld [vmem:[#allocation20_spill] sm:$0xff] }
 0x1e3   :  { %v1060_v36 = vsel %vm1059_vm2, %v3079_v4, %v1056_v44  ;;  %v1070_v30 = vmul.f32 %v3083_v6, %v1069_v33  ;;  %vm1072_vm9 = vweird.f32 %v3769_v34  ;;  %v1076_v4 = vand.u32 2147483647, %v3769_v34  ;;  %v4765_v34 = vld [vmem:[#allocation7_spill] sm:$0xff]  ;;  %v4767_v33 = vld [vmem:[#allocation10_spill] sm:$0xff]  ;;  %v4769_v44 = vld [vmem:[#allocation49_spill] sm:$0xff] }
 0x1e4   :  { %v1065_v45 = vsel %vm1062_vm4, %v1064_v43, %v1060_v36  ;;  %vm1074_vm10 = vmor %vm1072_vm9, %vm1073_vm7  ;;  %v1079_v3 = vor.u32 1.1754944e-38, %v1078_v28  ;;  %v4770_v43 = vld [vmem:[#allocation19_spill] sm:$0xff]  ;;  %v348_v25 = vadd.f32 %v4772_v17, %v4771_v16  ;;  %vm1306_vm3 = vcmp.gt.s32.totalorder %v3646_v24, 2 }
 0x1e5   :  { %v3085_v26 = vpop.eup %3084  ;;  %v1085_v14 = vmul.f32 %v1065_v45, %v3656_v63  ;;  %v1071_v21 = vadd.f32 %v3083_v6, %v1070_v30  ;;  %vm1077_vm11 = vcmp.eq.f32.partialorder %v1076_v4, 8.507059e+37  ;;  %v309_v56 = vadd.f32 %v4770_v43, %v4769_v44  ;;  %v4776_v4 = vld [vmem:[#allocation24_spill] sm:$0xff]  ;;  %vm3964_vm7 = vmpackc.low %vm1306_vm3, %vm1306_vm3 }
 0x1e6   :  { %v1092_v62 = vmul.f32 %v3085_v26, %v1035_v37  ;;  %v4773_v37 = vld [vmem:[#allocation52_spill] sm:$0xff] }
 0x1e7   :  { %v1089_v0 = vadd.f32 %v1087_v52, %v1085_v14  ;;  %v1075_v20 = vsel %vm1074_vm10, %v3083_v6, %v1071_v21  ;;  %v4763_v6 = vld [vmem:[#allocation6_spill] sm:$0xff]  ;;  %v4775_v21 = vld [vmem:[#allocation23_spill] sm:$0xff] }
 0x1e8   :  { %v3842_v2 = vsel %vm1094_vm8, %v1092_v62, %v3651_v39  ;;  %v1080_v54 = vsel %vm1077_vm11, %v1079_v3, %v1075_v20  ;;  %v4774_v62 = vld [vmem:[#allocation21_spill] sm:$0xff]  ;;  %v311_v28 = vadd.f32 %v4775_v21, %v4769_v44  ;;  %v350_v20 = vadd.f32 %v4776_v4, %v4771_v16  ;;  %v4778_v4 = vld [vmem:[#allocation54_spill] sm:$0xff] }
 0x1e9   :  { %3086 = vtanh.f32 %v1089_v0  ;;  %v3848_v10 = vsel %vm1095_vm6, %v1089_v0, %v3656_v63  ;;  %v387_v0 = vadd.f32 %v4774_v62, %v4773_v37  ;;  %vm1305_vm8 = vcmp.gt.s32.totalorder %v3609_v58, 2 }
 0x1ea   :  { %vm3947_vm4 = vmpackc.low %vm1305_vm8, %vm1305_vm8 }
 0x1ef   :  { %v3087_v19 = vpop.eup %3086 }
 0x1f0   :  { %v1093_v39 = vmul.f32 %v3087_v19, %v1080_v54 }
 0x1f2   :  { %v3855_v40 = vsel %vm1095_vm6, %v1093_v39, %v3666_v51  ;;  %v4764_v51 = vld [vmem:[#allocation9_spill] sm:$0xff] }
 0x1f3   :  { %v1114_v63 = vpack.c.bf16 %v3855_v40, %v3842_v2 }
 0x1f5   :  { %1123 = vmatmul.bf16.vlgmr.msrb.gmra.mxu0 %v1114_v63  ;;  %1137 = vmatmul.bf16.vlgmr.msrb.gmra.mxu1 %v1114_v63 }
 0x1f6   :  { %1151 = vmatmul.bf16.vlgmr.msrb.gmra.mxu2 %v1114_v63  ;;  %1165 = vmatmul.bf16.vlgmr.msrb.gmra.mxu3 %v1114_v63 }
 0x1f7   :  { %1537 = vmatpush.bf16.msrb.mxu0 %v3308_v38  ;;  %1551 = vmatpush.bf16.msrb.mxu1 %v3310_v41 }
 0x1f8   :  { %1565 = vmatpush.bf16.msrb.mxu2 %v3312_v47  ;;  %1579 = vmatpush.bf16.msrb.mxu3 %v3317_v49 }
 0x1fb   :  { %1538 = vmatpush.bf16.msrb.mxu0 %v3315_v48  ;;  %1552 = vmatpush.bf16.msrb.mxu1 %v3320_v53 }
 0x1fc   :  { %1566 = vmatpush.bf16.msrb.mxu2 %v3323_v59  ;;  %1580 = vmatpush.bf16.msrb.mxu3 %v3329_v61 }
 0x1ff   :  { %1539 = vmatpush.bf16.msrb.mxu0 %v3327_v60  ;;  %1553 = vmatpush.bf16.msrb.mxu1 %v3332_v1 }
 0x200   :  { %1567 = vmatpush.bf16.msrb.mxu2 %v3335_v7  ;;  %1581 = vmatpush.bf16.msrb.mxu3 %v3341_v9 }
 0x203   :  { %1540 = vmatpush.bf16.msrb.mxu0 %v3339_v8  ;;  %1554 = vmatpush.bf16.msrb.mxu1 %v3344_v12 }
 0x204   :  { %1568 = vmatpush.bf16.msrb.mxu2 %v3347_v13  ;;  %1582 = vmatpush.bf16.msrb.mxu3 %v3360_v23 }
 0x207   :  { %1541 = vmatpush.bf16.msrb.mxu0 %v3356_v18  ;;  %1555 = vmatpush.bf16.msrb.mxu1 %v3358_v22 }
 0x208   :  { %1569 = vmatpush.bf16.msrb.mxu2 %v3363_v27  ;;  %1583 = vmatpush.bf16.msrb.mxu3 %v3372_v35 }
 0x20b   :  { %1542 = vmatpush.bf16.msrb.mxu0 %v3367_v31  ;;  %1556 = vmatpush.bf16.msrb.mxu1 %v3369_v32 }
 0x20c   :  { %1570 = vmatpush.bf16.msrb.mxu2 %v3380_v42  ;;  %1584 = vmatpush.bf16.msrb.mxu3 %v3387_v55 }
 0x20f   :  { %1543 = vmatpush.bf16.msrb.mxu0 %v3382_v46  ;;  %1557 = vmatpush.bf16.msrb.mxu1 %v3384_v50 }
 0x210   :  { %1571 = vmatpush.bf16.msrb.mxu2 %v4763_v6  ;;  %1585 = vmatpush.bf16.msrb.mxu3 %v4764_v51 }
 0x213   :  { %1544 = vmatpush.bf16.msrb.mxu0 %v4765_v34  ;;  %1558 = vmatpush.bf16.msrb.mxu1 %v4766_v11 }
 0x214   :  { %1572 = vmatpush.bf16.msrb.mxu2 %v4767_v33  ;;  %1586 = vmatpush.bf16.msrb.mxu3 %v4768_v15 }
 0x272   :  { %v1124_v36 = vpop.f32.mrf.mxu0  ;;  %v1138_v30 = vpop.f32.mrf.mxu1 }
 0x273   :  { %v1171_v45 = vadd.f32 %v1124_v36, %v309_v56  ;;  %v1172_v52 = vadd.f32 %v1138_v30, %v348_v25 }
 0x275   :  { %v2721_v26 = vmul.f32 -1.442695, %v1171_v45  ;;  %v2722_v14 = vmul.f32 -1.442695, %v1172_v52 }
 0x277   :  { %3088 = vpow2.f32 %v2721_v26 }
 0x278   :  { %3090 = vpow2.f32 %v2722_v14  ;;  %v4777_v14 = vld [vmem:[#allocation25_spill] sm:$0xff] }
 0x279   :  { %v1152_v3 = vpop.f32.mrf.mxu2  ;;  %v1166_v25 = vpop.f32.mrf.mxu3  ;;  %v389_v62 = vadd.f32 %v4777_v14, %v4773_v37  ;;  %v4780_v14 = vld [vmem:[#allocation26_spill] sm:$0xff] }
 0x27a   :  { %v1173_v19 = vadd.f32 %v1152_v3, %v387_v0  ;;  %v1126_v54 = vpop.f32.mrf.mxu0  ;;  %v1140_v39 = vpop.f32.mrf.mxu1 }
 0x27b   :  { %v1175_v63 = vadd.f32 %v1126_v54, %v311_v28  ;;  %v1176_v43 = vadd.f32 %v1140_v39, %v350_v20  ;;  %v4779_v20 = vld [vmem:[#allocation22_spill] sm:$0xff] }
 0x27c   :  { %v2723_v56 = vmul.f32 -1.442695, %v1173_v19  ;;  %v426_v3 = vadd.f32 %v4779_v20, %v4778_v4 }
 0x27d   :  { %v3089_v17 = vpop.eup %3088  ;;  %v2724_v36 = vmul.f32 -1.442695, %v1175_v63  ;;  %v2725_v52 = vmul.f32 -1.442695, %v1176_v43 }
 0x27e   :  { %v3091_v30 = vpop.eup %3090  ;;  %v1197_v45 = vadd.f32 1.0, %v3089_v17  ;;  %3092 = vpow2.f32 %v2723_v56  ;;  %v1174_v43 = vadd.f32 %v1166_v25, %v426_v3 }
 0x27f   :  { %v1198_v26 = vadd.f32 1.0, %v3091_v30  ;;  %3094 = vpow2.f32 %v2724_v36 }
 0x280   :  { %3096 = vrcp.f32 %v1197_v45  ;;  %v1212_v20 = vand.u32 2147483647, %v1197_v45  ;;  %vm1208_vm15 = vweird.f32 %v1197_v45 }
 0x281   :  { %3098 = vrcp.f32 %v1198_v26  ;;  %v1154_v0 = vpop.f32.mrf.mxu2  ;;  %v1168_v30 = vpop.f32.mrf.mxu3  ;;  %v1227_v16 = vand.u32 2147483647, %v1198_v26  ;;  %vm1223_vm14 = vweird.f32 %v1198_v26 }
 0x282   :  { %3100 = vpow2.f32 %v2725_v52  ;;  %v1177_v21 = vadd.f32 %v1154_v0, %v389_v62  ;;  %v428_v62 = vadd.f32 %v4780_v14, %v4778_v4  ;;  %vm3919_vm0 = vcmp.eq.f32.partialorder %v1212_v20, 8.507059e+37 }
 0x283   :  { %vm1228_vm2 = vcmp.eq.f32.partialorder %v1227_v16, 8.507059e+37 }
 0x284   :  { %v3093_v28 = vpop.eup %3092  ;;  %v2726_v19 = vmul.f32 -1.442695, %v1177_v21 }
 0x285   :  { %v3095_v54 = vpop.eup %3094  ;;  %v3905_v39 = vadd.f32 1.0, %v3093_v28  ;;  %v1214_v28 = vand.u32 2147483648, %v1197_v45 }
 0x286   :  { %v3097_v63 = vpop.eup %3096  ;;  %v3907_v56 = vadd.f32 1.0, %v3095_v54  ;;  %3102 = vpow2.f32 %v2726_v19  ;;  %v1229_v19 = vand.u32 2147483648, %v1198_v26  ;;  %v1178_v54 = vadd.f32 %v1168_v30, %v428_v62 }
 0x287   :  { %v3099_v17 = vpop.eup %3098  ;;  %v1204_v36 = vmul.f32 %v3097_v63, %v1197_v45  ;;  %3104 = vrcp.f32 %v3905_v39  ;;  %vm1209_vm6 = vweird.f32 %v3097_v63  ;;  %vm1238_vm5 = vweird.f32 %v3905_v39  ;;  %v3959_v45 = vld [vmem:[%s4650_s0 + $0x14] sm:$0xf] }
 0x288   :  { %v3101_v52 = vpop.eup %3100  ;;  %v1219_v0 = vmul.f32 %v3099_v17, %v1198_v26  ;;  %3106 = vrcp.f32 %v3907_v56  ;;  %vm1224_vm12 = vweird.f32 %v3099_v17  ;;  %v1230_v30 = vor.u32 1.1754944e-38, %v1229_v19  ;;  %vm1210_vm13 = vmor %vm1208_vm15, %vm1209_vm6  ;;  %4788 = vst [vmem:[#allocation16_spill] sm:$0xff] %v3959_v45 }
 0x289   :  { %v1205_v21 = vsub.f32 1.0, %v1204_v36  ;;  %v3914_v25 = vadd.f32 1.0, %v3101_v52  ;;  %3108 = vtanh.f32 %v1174_v43  ;;  %vm3928_vm1 = vmor %vm1223_vm14, %vm1224_vm12  ;;  %vm1253_vm14 = vweird.f32 %v3907_v56 }
 0x28a   :  { %v1220_v3 = vsub.f32 1.0, %v1219_v0  ;;  %v1215_v0 = vor.u32 1.1754944e-38, %v1214_v28 }
 0x28b   :  { %v1206_v37 = vmul.f32 %v3097_v63, %v1205_v21  ;;  %3110 = vrcp.f32 %v3914_v25  ;;  %v1272_v34 = vand.u32 2147483647, %v3914_v25  ;;  %vm1268_vm12 = vweird.f32 %v3914_v25 }
 0x28c   :  { %v3103_v14 = vpop.eup %3102  ;;  %v1221_v4 = vmul.f32 %v3099_v17, %v1220_v3  ;;  %3112 = vtanh.f32 %v1178_v54  ;;  %v3942_v54 = vld [vmem:[%s4650_s0 + $0x10] sm:$0xf] }
 0x28d   :  { %v3917_v36 = vpop.eup %3104  ;;  %v1207_v44 = vadd.f32 %v3097_v63, %v1206_v37  ;;  %v3923_v43 = vadd.f32 1.0, %v3103_v14 }
 0x28e   :  { %v1234_v62 = vmul.f32 %v3917_v36, %v3905_v39  ;;  %v1222_v21 = vadd.f32 %v3099_v17, %v1221_v4  ;;  %v3107_v26 = vpop.eup %3106  ;;  %vm1239_vm9 = vweird.f32 %v3917_v36 }
 0x28f   :  { %v1211_v37 = vsel %vm1210_vm13, %v3097_v63, %v1207_v44  ;;  %3114 = vrcp.f32 %v3923_v43  ;;  %v3109_v20 = vpop.eup %3108  ;;  %v1249_v19 = vmul.f32 %v3107_v26, %v3907_v56  ;;  %v4785_v44 = vmov 0  ;;  %vm3985_vm6 = vmor %vm1238_vm5, %vm1239_vm9 }
 0x290   :  { %v1235_v28 = vsub.f32 1.0, %v1234_v62  ;;  %v1216_v3 = vsel %vm3919_vm0, %v1215_v0, %v1211_v37  ;;  %v1226_v4 = vsel %vm3928_vm1, %v3099_v17, %v1222_v21  ;;  %v4786_v44 = vsel %vm3947_vm4, 4294967295, %v4785_v44 }
 0x291   :  { %4787 = vst [vmem:[#allocation15_spill] sm:$0xff] %v4786_v44  ;;  %v3111_v16 = vpop.eup %3110  ;;  %v1244_v63 = vand.u32 2147483648, %v3905_v39  ;;  %v1231_v17 = vsel %vm1228_vm2, %v1230_v30, %v1226_v4  ;;  %v1297_v14 = vmul.f32 %v3109_v20, %v1216_v3  ;;  %v1250_v62 = vsub.f32 1.0, %v1249_v19 }
 0x292   :  { %v1236_v52 = vmul.f32 %v3917_v36, %v1235_v28  ;;  %v1295_v0 = vmul.f32 %v1231_v17, %v3832_v29  ;;  %v1264_v21 = vmul.f32 %v3111_v16, %v3914_v25  ;;  %v4789_v37 = vmov 0  ;;  %v3113_v4 = vpop.eup %3112 }
 0x293   :  { %v4790_v37 = vsel %vm3964_vm7, 4294967295, %v4789_v37  ;;  %v1274_v30 = vand.u32 2147483648, %v3914_v25  ;;  %v1257_v20 = vand.u32 2147483647, %v3907_v56  ;;  %v1259_v28 = vand.u32 2147483648, %v3907_v56 }
 0x294   :  { %4791 = vst [vmem:[#allocation17_spill] sm:$0xff] %v4790_v37  ;;  %v1299_v19 = vadd.f32 %v1297_v14, %v1295_v0  ;;  %v1265_v17 = vsub.f32 1.0, %v1264_v21  ;;  %v1251_v15 = vmul.f32 %v3107_v26, %v1250_v62  ;;  %v1237_v11 = vadd.f32 %v3917_v36, %v1236_v52 }
 0x295   :  { %v3115_v33 = vpop.eup %3114  ;;  %vm1254_vm10 = vweird.f32 %v3107_v26  ;;  %vm1269_vm11 = vweird.f32 %v3111_v16  ;;  %v1242_v52 = vand.u32 2147483647, %v3905_v39  ;;  %v1275_v57 = vor.u32 1.1754944e-38, %v1274_v30 }
 0x296   :  { %3116 = vtanh.f32 %v1299_v19  ;;  %v1266_v44 = vmul.f32 %v3111_v16, %v1265_v17  ;;  %v1279_v3 = vmul.f32 %v3115_v33, %v3923_v43  ;;  %v1252_v0 = vadd.f32 %v3107_v26, %v1251_v15  ;;  %vm1255_vm15 = vmor %vm1253_vm14, %vm1254_vm10 }
 0x297   :  { %v3994_v62 = vsel %vm1305_vm8, %v1299_v19, %v3832_v29  ;;  %v1260_v17 = vor.u32 1.1754944e-38, %v1259_v28  ;;  %vm1270_vm0 = vmor %vm1268_vm12, %vm1269_vm11  ;;  %vm1258_vm13 = vcmp.eq.f32.partialorder %v1257_v20, 8.507059e+37  ;;  %v1241_v15 = vsel %vm3985_vm6, %v3917_v36, %v1237_v11 }
 0x298   :  { %v1280_v21 = vsub.f32 1.0, %v1279_v3  ;;  %v1267_v51 = vadd.f32 %v3111_v16, %v1266_v44  ;;  %v1256_v45 = vsel %vm1255_vm15, %v3107_v26, %v1252_v0  ;;  %v1245_v39 = vor.u32 1.1754944e-38, %v1244_v63 }
 0x299   :  { %v1261_v56 = vsel %vm1258_vm13, %v1260_v17, %v1256_v45  ;;  %vm1273_vm1 = vcmp.eq.f32.partialorder %v1272_v34, 8.507059e+37  ;;  %vm1243_vm2 = vcmp.eq.f32.partialorder %v1242_v52, 8.507059e+37  ;;  %vm1284_vm5 = vweird.f32 %v3115_v33 }
 0x29a   :  { %v1271_v37 = vsel %vm1270_vm0, %v3111_v16, %v1267_v51  ;;  %v1281_v29 = vmul.f32 %v3115_v33, %v1280_v21  ;;  %v1298_v5 = vmul.f32 %v3113_v4, %v1261_v56  ;;  %v1246_v44 = vsel %vm1243_vm2, %v1245_v39, %v1241_v15  ;;  %v4807_v21 = vld [vmem:[#allocation33_spill] sm:$0xff] }
 0x29b   :  { %v1276_v19 = vsel %vm1273_vm1, %v1275_v57, %v1271_v37  ;;  %v1289_v20 = vand.u32 2147483648, %v3923_v43  ;;  %vm1283_vm9 = vweird.f32 %v3923_v43  ;;  %v1287_v57 = vand.u32 2147483647, %v3923_v43 }
 0x29c   :  { %v3117_v25 = vpop.eup %3116  ;;  %v1296_v28 = vmul.f32 %v1276_v19, %v3848_v10  ;;  %v1282_v26 = vadd.f32 %v3115_v33, %v1281_v29  ;;  %vm1285_vm10 = vmor %vm1283_vm9, %vm1284_vm5  ;;  %v4808_v29 = vld [vmem:[#allocation54_spill] sm:$0xff] }
 0x29d   :  { %v1303_v3 = vmul.f32 %v3117_v25, %v1246_v44  ;;  %v1290_v11 = vor.u32 1.1754944e-38, %v1289_v20  ;;  %vm1288_vm11 = vcmp.eq.f32.partialorder %v1287_v57, 8.507059e+37  ;;  %v4809_v19 = vld [vmem:[#allocation30_spill] sm:$0xff] }
 0x29e   :  { %v1300_v30 = vadd.f32 %v1298_v5, %v1296_v28  ;;  %v1286_v34 = vsel %vm1285_vm10, %v3115_v33, %v1282_v26  ;;  %v431_v25 = vadd.f32 %v4809_v19, %v4808_v29 }
 0x29f   :  { %v1291_v5 = vsel %vm1288_vm11, %v1290_v11, %v1286_v34  ;;  %v4012_v63 = vsel %vm1305_vm8, %v1303_v3, %v3842_v2 }
 0x2a0   :  { %3118 = vtanh.f32 %v1300_v30  ;;  %v4005_v51 = vsel %vm1306_vm3, %v1300_v30, %v3848_v10 }
 0x2a6   :  { %v3119_v36 = vpop.eup %3118 }
 0x2a7   :  { %v1304_v16 = vmul.f32 %v3119_v36, %v1291_v5  ;;  %v4810_v5 = vld [vmem:[#allocation34_spill] sm:$0xff] }
 0x2a9   :  { %v4017_v10 = vsel %vm1306_vm3, %v1304_v16, %v3855_v40  ;;  %v433_v16 = vadd.f32 %v4810_v5, %v4808_v29 }
 0x2aa   :  { %v1325_v43 = vpack.c.bf16 %v4017_v10, %v4012_v63 }
 0x2ac   :  { %1334 = vmatmul.bf16.vlgmr.msra.gmra.mxu0 %v1325_v43  ;;  %1348 = vmatmul.bf16.vlgmr.msra.gmra.mxu1 %v1325_v43 }
 0x2ad   :  { %1362 = vmatmul.bf16.vlgmr.msra.gmra.mxu2 %v1325_v43  ;;  %1376 = vmatmul.bf16.vlgmr.msra.gmra.mxu3 %v1325_v43 }
 0x2ae   :  { %1748 = vmatpush.bf16.msra.mxu0 %v3308_v38  ;;  %1762 = vmatpush.bf16.msra.mxu1 %v3310_v41  ;;  %v4794_v38 = vld [vmem:[#allocation9_spill] sm:$0xff]  ;;  %v4795_v41 = vld [vmem:[#allocation7_spill] sm:$0xff] }
 0x2af   :  { %1776 = vmatpush.bf16.msra.mxu2 %v3312_v47  ;;  %1790 = vmatpush.bf16.msra.mxu3 %v3317_v49  ;;  %v4796_v47 = vld [vmem:[#allocation8_spill] sm:$0xff]  ;;  %v4798_v49 = vld [vmem:[#allocation11_spill] sm:$0xff] }
 0x2b2   :  { %1749 = vmatpush.bf16.msra.mxu0 %v3315_v48  ;;  %1763 = vmatpush.bf16.msra.mxu1 %v3320_v53  ;;  %v4797_v48 = vld [vmem:[#allocation10_spill] sm:$0xff]  ;;  %v4799_v53 = vld [vmem:[#allocation49_spill] sm:$0xff] }
 0x2b3   :  { %1777 = vmatpush.bf16.msra.mxu2 %v3323_v59  ;;  %1791 = vmatpush.bf16.msra.mxu3 %v3329_v61  ;;  %v4800_v59 = vld [vmem:[#allocation27_spill] sm:$0xff]  ;;  %v4801_v61 = vld [vmem:[#allocation50_spill] sm:$0xff] }
 0x2b6   :  { %1750 = vmatpush.bf16.msra.mxu0 %v3327_v60  ;;  %1764 = vmatpush.bf16.msra.mxu1 %v3332_v1  ;;  %v314_v60 = vadd.f32 %v4800_v59, %v4799_v53  ;;  %v4802_v1 = vld [vmem:[#allocation28_spill] sm:$0xff] }
 0x2b7   :  { %1778 = vmatpush.bf16.msra.mxu2 %v3335_v7  ;;  %1792 = vmatpush.bf16.msra.mxu3 %v3341_v9  ;;  %v353_v7 = vadd.f32 %v4802_v1, %v4801_v61 }
 0x2ba   :  { %1751 = vmatpush.bf16.msra.mxu0 %v3339_v8  ;;  %1765 = vmatpush.bf16.msra.mxu1 %v3344_v12 }
 0x2bb   :  { %1779 = vmatpush.bf16.msra.mxu2 %v3347_v13  ;;  %1793 = vmatpush.bf16.msra.mxu3 %v3360_v23  ;;  %v4803_v23 = vld [vmem:[#allocation52_spill] sm:$0xff] }
 0x2bc   :  { %v394_v17 = vadd.f32 %v4807_v21, %v4803_v23 }
 0x2be   :  { %1752 = vmatpush.bf16.msra.mxu0 %v3356_v18  ;;  %1766 = vmatpush.bf16.msra.mxu1 %v3358_v22 }
 0x2bf   :  { %1780 = vmatpush.bf16.msra.mxu2 %v3363_v27  ;;  %1794 = vmatpush.bf16.msra.mxu3 %v3372_v35  ;;  %v4804_v27 = vld [vmem:[#allocation29_spill] sm:$0xff] }
 0x2c2   :  { %1753 = vmatpush.bf16.msra.mxu0 %v3367_v31  ;;  %1767 = vmatpush.bf16.msra.mxu1 %v3369_v32  ;;  %v392_v31 = vadd.f32 %v4804_v27, %v4803_v23  ;;  %v4805_v32 = vld [vmem:[#allocation31_spill] sm:$0xff] }
 0x2c3   :  { %1781 = vmatpush.bf16.msra.mxu2 %v3380_v42  ;;  %1795 = vmatpush.bf16.msra.mxu3 %v3387_v55  ;;  %v316_v35 = vadd.f32 %v4805_v32, %v4799_v53  ;;  %v4806_v42 = vld [vmem:[#allocation32_spill] sm:$0xff] }
 0x2c6   :  { %1754 = vmatpush.bf16.msra.mxu0 %v3382_v46  ;;  %1768 = vmatpush.bf16.msra.mxu1 %v3384_v50  ;;  %v355_v46 = vadd.f32 %v4806_v42, %v4801_v61 }
 0x2c7   :  { %1782 = vmatpush.bf16.msra.mxu2 %v4763_v6  ;;  %1796 = vmatpush.bf16.msra.mxu3 %v4794_v38 }
 0x2ca   :  { %1755 = vmatpush.bf16.msra.mxu0 %v4795_v41  ;;  %1769 = vmatpush.bf16.msra.mxu1 %v4796_v47  ;;  %v4077_v41 = vld [vmem:[%s4651_s1] sm:$0xff] }
 0x2cb   :  { %1783 = vmatpush.bf16.msra.mxu2 %v4797_v48  ;;  %1797 = vmatpush.bf16.msra.mxu3 %v4798_v49  ;;  %vm1516_vm8 = vcmp.gt.s32.totalorder %v4077_v41, 3 }
 0x2cc   :  { %vm1524_vm5 = vmpackc.low %vm1516_vm8, %vm1516_vm8 }
 0x329   :  { %v1335_v8 = vpop.f32.mrf.mxu0  ;;  %v1349_v9 = vpop.f32.mrf.mxu1 }
 0x32a   :  { %v1382_v12 = vadd.f32 %v1335_v8, %v314_v60  ;;  %v1383_v13 = vadd.f32 %v1349_v9, %v353_v7 }
 0x32c   :  { %v2727_v18 = vmul.f32 -1.442695, %v1382_v12  ;;  %v2728_v22 = vmul.f32 -1.442695, %v1383_v13 }
 0x32e   :  { %3120 = vpow2.f32 %v2727_v18 }
 0x32f   :  { %3122 = vpow2.f32 %v2728_v22 }
 0x330   :  { %v1363_v50 = vpop.f32.mrf.mxu2  ;;  %v1377_v45 = vpop.f32.mrf.mxu3 }
 0x331   :  { %v1384_v55 = vadd.f32 %v1363_v50, %v392_v31  ;;  %v1337_v58 = vpop.f32.mrf.mxu0  ;;  %v1351_v24 = vpop.f32.mrf.mxu1  ;;  %v1385_v26 = vadd.f32 %v1377_v45, %v431_v25  ;;  %v1522_v45 = vld [vmem:[%s4650_s0 + $0x18] sm:$0xf] }
 0x332   :  { %v1386_v2 = vadd.f32 %v1337_v58, %v316_v35  ;;  %v1387_v40 = vadd.f32 %v1351_v24, %v355_v46  ;;  %v4103_v58 = vld [vmem:[%s4651_s1 + $0x8] sm:$0xff] }
 0x333   :  { %v2729_v6 = vmul.f32 -1.442695, %v1384_v55  ;;  %vm1517_vm2 = vcmp.gt.s32.totalorder %v4103_v58, 3 }
 0x334   :  { %v3121_v33 = vpop.eup %3120  ;;  %v2730_v37 = vmul.f32 -1.442695, %v1386_v2  ;;  %v2731_v52 = vmul.f32 -1.442695, %v1387_v40  ;;  %vm1525_vm10 = vmpackc.low %vm1517_vm2, %vm1517_vm2 }
 0x335   :  { %v3123_v4 = vpop.eup %3122  ;;  %v1408_v14 = vadd.f32 1.0, %v3121_v33  ;;  %3124 = vpow2.f32 %v2729_v6 }
 0x336   :  { %v1409_v0 = vadd.f32 1.0, %v3123_v4  ;;  %3126 = vpow2.f32 %v2730_v37 }
 0x337   :  { %3128 = vrcp.f32 %v1408_v14  ;;  %v1423_v38 = vand.u32 2147483647, %v1408_v14  ;;  %v1425_v48 = vand.u32 2147483648, %v1408_v14  ;;  %vm1419_vm12 = vweird.f32 %v1408_v14 }
 0x338   :  { %3130 = vrcp.f32 %v1409_v0  ;;  %v1365_v15 = vpop.f32.mrf.mxu2  ;;  %v1379_v11 = vpop.f32.mrf.mxu3  ;;  %v1440_v60 = vand.u32 2147483648, %v1409_v0  ;;  %v1438_v8 = vand.u32 2147483647, %v1409_v0  ;;  %vm1434_vm6 = vweird.f32 %v1409_v0 }
 0x339   :  { %3132 = vpow2.f32 %v2731_v52  ;;  %v1388_v39 = vadd.f32 %v1365_v15, %v394_v17  ;;  %v1389_v1 = vadd.f32 %v1379_v11, %v433_v16  ;;  %vm4086_vm15 = vcmp.eq.f32.partialorder %v1423_v38, 8.507059e+37 }
 0x33a   :  { %v1426_v27 = vor.u32 1.1754944e-38, %v1425_v48  ;;  %v1441_v32 = vor.u32 1.1754944e-38, %v1440_v60  ;;  %vm1439_vm1 = vcmp.eq.f32.partialorder %v1438_v8, 8.507059e+37  ;;  %v4820_v48 = vld [vmem:[#allocation13_spill] sm:$0xff] }
 0x33b   :  { %v3125_v56 = vpop.eup %3124  ;;  %v2732_v28 = vmul.f32 -1.442695, %v1388_v39  ;;  %v1523_v39 = vld [vmem:[%s4650_s0 + $0x1c] sm:$0xf] }
 0x33c   :  { %v3127_v44 = vpop.eup %3126  ;;  %v4067_v3 = vadd.f32 1.0, %v3125_v56 }
 0x33d   :  { %v3129_v30 = vpop.eup %3128  ;;  %v4069_v20 = vadd.f32 1.0, %v3127_v44  ;;  %3134 = vpow2.f32 %v2732_v28  ;;  %v4816_v44 = vld [vmem:[#allocation12_spill] sm:$0xff] }
 0x33e   :  { %v3131_v57 = vpop.eup %3130  ;;  %v1415_v34 = vmul.f32 %v3129_v30, %v1408_v14  ;;  %3136 = vrcp.f32 %v4067_v3  ;;  %vm1420_vm3 = vweird.f32 %v3129_v30  ;;  %vm1449_vm9 = vweird.f32 %v4067_v3 }
 0x33f   :  { %v3133_v36 = vpop.eup %3132  ;;  %v1430_v43 = vmul.f32 %v3131_v57, %v1409_v0  ;;  %3138 = vrcp.f32 %v4069_v20  ;;  %vm1435_vm14 = vweird.f32 %v3131_v57  ;;  %vm1421_vm0 = vmor %vm1419_vm12, %vm1420_vm3  ;;  %v1455_v4 = vand.u32 2147483648, %v4067_v3 }
 0x340   :  { %v1416_v47 = vsub.f32 1.0, %v1415_v34  ;;  %v4081_v49 = vadd.f32 1.0, %v3133_v36  ;;  %3140 = vtanh.f32 %v1385_v26  ;;  %vm4095_vm13 = vmor %vm1434_vm6, %vm1435_vm14  ;;  %v1468_v19 = vand.u32 2147483647, %v4069_v20 }
 0x341   :  { %v1431_v59 = vsub.f32 1.0, %v1430_v43  ;;  %v1470_v25 = vand.u32 2147483648, %v4069_v20  ;;  %v1453_v8 = vand.u32 2147483647, %v4067_v3  ;;  %vm1464_vm14 = vweird.f32 %v4069_v20 }
 0x342   :  { %v1417_v7 = vmul.f32 %v3129_v30, %v1416_v47  ;;  %3142 = vrcp.f32 %v4081_v49  ;;  %v1485_v56 = vand.u32 2147483648, %v4081_v49  ;;  %v1483_v43 = vand.u32 2147483647, %v4081_v49  ;;  %v4819_v47 = vld [vmem:[#allocation16_spill] sm:$0xff] }
 0x343   :  { %v3135_v9 = vpop.eup %3134  ;;  %v1432_v12 = vmul.f32 %v3131_v57, %v1431_v59  ;;  %3144 = vtanh.f32 %v1389_v1  ;;  %v4821_v59 = vsel %vm3964_vm7, %v4819_v47, %v4820_v48  ;;  %vm1479_vm7 = vweird.f32 %v4081_v49 }
 0x344   :  { %v4084_v13 = vpop.eup %3136  ;;  %v1418_v18 = vadd.f32 %v3129_v30, %v1417_v7  ;;  %v4090_v31 = vadd.f32 1.0, %v3135_v9  ;;  %v1471_v22 = vor.u32 1.1754944e-38, %v1470_v25  ;;  %v2831_v7 = vld [vmem:[#allocation3 + $0x2c0] sm:$0xf] }
 0x345   :  { %v1445_v35 = vmul.f32 %v4084_v13, %v4067_v3  ;;  %v1433_v42 = vadd.f32 %v3131_v57, %v1432_v12  ;;  %v3139_v46 = vpop.eup %3138  ;;  %vm1450_vm11 = vweird.f32 %v4084_v13 }
 0x346   :  { %v1422_v55 = vsel %vm1421_vm0, %v3129_v30, %v1418_v18  ;;  %3146 = vrcp.f32 %v4090_v31  ;;  %v3141_v24 = vpop.eup %3140  ;;  %v1460_v33 = vmul.f32 %v3139_v46, %v4069_v20  ;;  %v4817_v30 = vsel %vm3947_vm4, %v3942_v54, %v4816_v44  ;;  %vm4151_vm6 = vmor %vm1449_vm9, %vm1450_vm11 }
 0x347   :  { %v1446_v2 = vsub.f32 1.0, %v1445_v35  ;;  %v1427_v40 = vsel %vm4086_vm15, %v1426_v27, %v1422_v55  ;;  %v1437_v6 = vsel %vm4095_vm13, %v3131_v57, %v1433_v42  ;;  %v4136_v26 = vsel %vm1524_vm5, %v1522_v45, %v4817_v30 }
 0x348   :  { %v3143_v37 = vpop.eup %3142  ;;  %v1442_v14 = vsel %vm1439_vm1, %v1441_v32, %v1437_v6  ;;  %v1508_v52 = vmul.f32 %v3141_v24, %v1427_v40  ;;  %v1461_v17 = vsub.f32 1.0, %v1460_v33  ;;  %vm1465_vm3 = vweird.f32 %v3139_v46 }
 0x349   :  { %v1447_v0 = vmul.f32 %v4084_v13, %v1446_v2  ;;  %v1506_v21 = vmul.f32 %v1442_v14, %v3994_v62  ;;  %v1475_v15 = vmul.f32 %v3143_v37, %v4081_v49  ;;  %v3145_v57 = vpop.eup %3144  ;;  %v4146_v54 = vsel %vm1525_vm10, %v1523_v39, %v4821_v59  ;;  %vm1466_vm12 = vmor %vm1464_vm14, %vm1465_vm3 }
 0x34a   :  { %v1462_v36 = vmul.f32 %v3139_v46, %v1461_v17  ;;  %vm1480_vm4 = vweird.f32 %v3143_v37  ;;  %v1486_v32 = vor.u32 1.1754944e-38, %v1485_v56  ;;  %vm1469_vm0 = vcmp.eq.f32.partialorder %v1468_v19, 8.507059e+37  ;;  %v4825_v56 = vld [vmem:[#allocation36_spill] sm:$0xff] }
 0x34b   :  { %v1510_v34 = vadd.f32 %v1508_v52, %v1506_v21  ;;  %v1476_v11 = vsub.f32 1.0, %v1475_v15  ;;  %v1448_v16 = vadd.f32 %v4084_v13, %v1447_v0  ;;  %vm1481_vm15 = vmor %vm1479_vm7, %vm1480_vm4  ;;  %v1456_v20 = vor.u32 1.1754944e-38, %v1455_v4  ;;  %v4824_v15 = vld [vmem:[#allocation35_spill] sm:$0xff] }
 0x34c   :  { %v3147_v5 = vpop.eup %3146  ;;  %v1463_v9 = vadd.f32 %v3139_v46, %v1462_v36  ;;  %vm1484_vm13 = vcmp.eq.f32.partialorder %v1483_v43, 8.507059e+37  ;;  %vm1454_vm1 = vcmp.eq.f32.partialorder %v1453_v8, 8.507059e+37  ;;  %v1500_v45 = vand.u32 2147483648, %v4090_v31  ;;  %v3001_v8 = vld [vmem:[#allocation3 + $0x2ec] sm:$0xf0] }
 0x34d   :  { %3148 = vtanh.f32 %v1510_v34  ;;  %v1477_v60 = vmul.f32 %v3143_v37, %v1476_v11  ;;  %v1490_v1 = vmul.f32 %v3147_v5, %v4090_v31  ;;  %v4160_v12 = vsel %vm1516_vm8, %v1510_v34, %v3994_v62  ;;  %v4827_v11 = vld [vmem:[#allocation39_spill] sm:$0xff] }
 0x34e   :  { %v1467_v35 = vsel %vm1466_vm12, %v3139_v46, %v1463_v9  ;;  %v1452_v3 = vsel %vm4151_vm6, %v4084_v13, %v1448_v16  ;;  %vm1495_vm5 = vweird.f32 %v3147_v5  ;;  %vm1494_vm9 = vweird.f32 %v4090_v31  ;;  %v2835_v9 = vld [vmem:[#allocation3 + $0x2c8] sm:$0xf] }
 0x34f   :  { %v1491_v18 = vsub.f32 1.0, %v1490_v1  ;;  %v1478_v27 = vadd.f32 %v3143_v37, %v1477_v60  ;;  %v1472_v42 = vsel %vm1469_vm0, %v1471_v22, %v1467_v35  ;;  %v1457_v40 = vsel %vm1454_vm1, %v1456_v20, %v1452_v3  ;;  %vm1496_vm10 = vmor %vm1494_vm9, %vm1495_vm5 }
 0x350   :  { %v1509_v24 = vmul.f32 %v3145_v57, %v1472_v42  ;;  %v1501_v14 = vor.u32 1.1754944e-38, %v1500_v45  ;;  %v319_v39 = vadd.f32 %v4824_v15, %v4799_v53  ;;  %v358_v19 = vadd.f32 %v4825_v56, %v4801_v61  ;;  %v4826_v57 = vld [vmem:[#allocation37_spill] sm:$0xff]  ;;  %v2823_v45 = vld [vmem:[#allocation3 + $0x268] sm:$0xf]  ;;  %v2995_v15 = vld [vmem:[#allocation3 + $0x22c] sm:$0xf0] }
 0x351   :  { %v1482_v50 = vsel %vm1481_vm15, %v3143_v37, %v1478_v27  ;;  %v1492_v62 = vmul.f32 %v3147_v5, %v1491_v18  ;;  %v1498_v37 = vand.u32 2147483647, %v4090_v31  ;;  %v397_v34 = vadd.f32 %v4826_v57, %v4803_v23  ;;  %v3002_v27 = vld [vmem:[#allocation3 + $0x2f4] sm:$0xf0]  ;;  %v4831_v56 = vld [vmem:[#allocation42_spill] sm:$0xff] }
 0x352   :  { %v1487_v55 = vsel %vm1484_vm13, %v1486_v32, %v1482_v50  ;;  %v321_v36 = vadd.f32 %v4827_v11, %v4799_v53  ;;  %v2832_v22 = vor.u32 %v3001_v8, %v2831_v7  ;;  %v2836_v3 = vor.u32 %v3002_v27, %v2835_v9 }
 0x353   :  { %v3149_v49 = vpop.eup %3148  ;;  %v1507_v2 = vmul.f32 %v1487_v55, %v4005_v51  ;;  %v1493_v46 = vadd.f32 %v3147_v5, %v1492_v62  ;;  %vm1499_vm11 = vcmp.eq.f32.partialorder %v1498_v37, 8.507059e+37  ;;  %v4829_v62 = vld [vmem:[#allocation38_spill] sm:$0xff]  ;;  %v2999_v37 = vld [vmem:[#allocation3 + $0x294] sm:$0xf0]  ;;  %vm1727_vm4 = vcmp.gt.s32.totalorder %v4077_v41, 4 }
 0x354   :  { %v1514_v6 = vmul.f32 %v3149_v49, %v1457_v40  ;;  %v436_v55 = vadd.f32 %v4829_v62, %v4808_v29  ;;  %v4830_v49 = vld [vmem:[#allocation41_spill] sm:$0xff]  ;;  %v2819_v40 = vld [vmem:[#allocation3 + $0x260] sm:$0xf]  ;;  %v2992_v62 = vld [vmem:[#allocation3 + $0x1cc] sm:$0xf0] }
 0x355   :  { %v1511_v33 = vadd.f32 %v1509_v24, %v1507_v2  ;;  %v1497_v4 = vsel %vm1496_vm10, %v3147_v5, %v1493_v46  ;;  %v4828_v5 = vld [vmem:[#allocation40_spill] sm:$0xff]  ;;  %v399_v2 = vadd.f32 %v4830_v49, %v4803_v23  ;;  %vm4280_vm5 = vmpackc.low %vm1727_vm4, %vm1727_vm4 }
 0x356   :  { %v1502_v0 = vsel %vm1499_vm11, %v1501_v14, %v1497_v4  ;;  %v4178_v17 = vsel %vm1516_vm8, %v1514_v6, %v4012_v63  ;;  %v360_v16 = vadd.f32 %v4828_v5, %v4801_v61  ;;  %v2998_v6 = vld [vmem:[#allocation3 + $0x28c] sm:$0xf0]  ;;  %v3000_v14 = vld [vmem:[#allocation3 + $0x2cc] sm:$0xf] }
 0x357   :  { %3150 = vtanh.f32 %v1511_v33  ;;  %v4171_v13 = vsel %vm1517_vm2, %v1511_v33, %v4005_v51  ;;  %v2997_v5 = vld [vmem:[#allocation3 + $0x26c] sm:$0xf] }
 0x35d   :  { %v3151_v52 = vpop.eup %3150 }
 0x35e   :  { %v1515_v21 = vmul.f32 %v3151_v52, %v1502_v0  ;;  %v2837_v52 = vld [vmem:[#allocation3 + $0x2f8] sm:$0xf0] }
 0x360   :  { %v4183_v51 = vsel %vm1517_vm2, %v1515_v21, %v4017_v10  ;;  %v2820_v21 = vor.u32 %v2998_v6, %v2819_v40 }
 0x361   :  { %v1536_v31 = vpack.c.bf16 %v4183_v51, %v4178_v17 }
 0x363   :  { %1545 = vmatmul.bf16.vlgmr.msrb.gmra.mxu0 %v1536_v31  ;;  %1559 = vmatmul.bf16.vlgmr.msrb.gmra.mxu1 %v1536_v31 }
 0x364   :  { %1573 = vmatmul.bf16.vlgmr.msrb.gmra.mxu2 %v1536_v31  ;;  %1587 = vmatmul.bf16.vlgmr.msrb.gmra.mxu3 %v1536_v31  ;;  %v2807_v31 = vld [vmem:[#allocation3 + $0x200] sm:$0xf] }
 0x365   :  { %2122 = vmatpush.bf16.msrb.mxu0 %v2832_v22  ;;  %2136 = vmatpush.bf16.msrb.mxu1 %v2836_v3 }
 0x369   :  { %2123 = vmatpush.bf16.msrb.mxu0 %v2820_v21 }
 0x3e0   :  { %v1546_v63 = vpop.f32.mrf.mxu0  ;;  %v1560_v25 = vpop.f32.mrf.mxu1 }
 0x3e1   :  { %v1593_v28 = vadd.f32 %v1546_v63, %v319_v39  ;;  %v1594_v44 = vadd.f32 %v1560_v25, %v358_v19  ;;  %v438_v19 = vadd.f32 %v4831_v56, %v4808_v29  ;;  %v2824_v25 = vor.u32 %v2999_v37, %v2823_v45 }
 0x3e3   :  { %v2733_v30 = vmul.f32 -1.442695, %v1593_v28  ;;  %v2734_v10 = vmul.f32 -1.442695, %v1594_v44  ;;  %v2840_v28 = vor.u32 %v3000_v14, %v2837_v52  ;;  %v2811_v44 = vld [vmem:[#allocation3 + $0x208] sm:$0xf]  ;;  %2137 = vmatpush.bf16.msrb.mxu1 %v2824_v25 }
 0x3e5   :  { %3152 = vpow2.f32 %v2733_v30  ;;  %v2996_v30 = vld [vmem:[#allocation3 + $0x234] sm:$0xf0]  ;;  %2150 = vmatpush.bf16.msrb.mxu2 %v2840_v28  ;;  %v2799_v28 = vld [vmem:[#allocation3 + $0x1a8] sm:$0xf] }
 0x3e6   :  { %3154 = vpow2.f32 %v2734_v10 }
 0x3e7   :  { %v1574_v43 = vpop.f32.mrf.mxu2  ;;  %v1588_v59 = vpop.f32.mrf.mxu3 }
 0x3e8   :  { %v1595_v38 = vadd.f32 %v1574_v43, %v397_v34  ;;  %v1548_v47 = vpop.f32.mrf.mxu0  ;;  %v1562_v48 = vpop.f32.mrf.mxu1  ;;  %v1596_v33 = vadd.f32 %v1588_v59, %v436_v55 }
 0x3e9   :  { %v1597_v60 = vadd.f32 %v1548_v47, %v321_v36  ;;  %v1598_v1 = vadd.f32 %v1562_v48, %v360_v16  ;;  %v2808_v36 = vor.u32 %v2995_v15, %v2807_v31  ;;  %v2825_v16 = vld [vmem:[#allocation3 + $0x298] sm:$0xf0]  ;;  %v2812_v47 = vor.u32 %v2996_v30, %v2811_v44  ;;  %v2993_v44 = vld [vmem:[#allocation3 + $0x1d4] sm:$0xf0] }
 0x3ea   :  { %v2735_v18 = vmul.f32 -1.442695, %v1595_v38  ;;  %v2828_v48 = vor.u32 %v2997_v5, %v2825_v16 }
 0x3eb   :  { %v3153_v32 = vpop.eup %3152  ;;  %v2736_v35 = vmul.f32 -1.442695, %v1597_v60  ;;  %v2737_v50 = vmul.f32 -1.442695, %v1598_v1  ;;  %2124 = vmatpush.bf16.msrb.mxu0 %v2808_v36  ;;  %2138 = vmatpush.bf16.msrb.mxu1 %v2812_v47  ;;  %v2994_v47 = vld [vmem:[#allocation3 + $0x20c] sm:$0xf] }
 0x3ec   :  { %v3155_v20 = vpop.eup %3154  ;;  %v4197_v42 = vadd.f32 1.0, %v3153_v32  ;;  %3156 = vpow2.f32 %v2735_v18  ;;  %2151 = vmatpush.bf16.msrb.mxu2 %v2828_v48  ;;  %v2813_v48 = vld [vmem:[#allocation3 + $0x238] sm:$0xf0] }
 0x3ed   :  { %v4201_v24 = vadd.f32 1.0, %v3155_v20  ;;  %3158 = vpow2.f32 %v2736_v35 }
 0x3ee   :  { %3160 = vrcp.f32 %v4197_v42  ;;  %v1634_v0 = vand.u32 2147483647, %v4197_v42  ;;  %v1636_v34 = vand.u32 2147483648, %v4197_v42  ;;  %vm1630_vm3 = vweird.f32 %v4197_v42 }
 0x3ef   :  { %3162 = vrcp.f32 %v4201_v24  ;;  %v1576_v46 = vpop.f32.mrf.mxu2  ;;  %v1590_v11 = vpop.f32.mrf.mxu3  ;;  %v1651_v1 = vand.u32 2147483648, %v4201_v24  ;;  %v1649_v18 = vand.u32 2147483647, %v4201_v24  ;;  %vm1645_vm2 = vweird.f32 %v4201_v24 }
 0x3f0   :  { %3164 = vpow2.f32 %v2737_v50  ;;  %v1599_v4 = vadd.f32 %v1576_v46, %v399_v2  ;;  %vm4219_vm8 = vcmp.eq.f32.partialorder %v1634_v0, 8.507059e+37  ;;  %v1600_v22 = vadd.f32 %v1590_v11, %v438_v19  ;;  %v2795_v50 = vld [vmem:[#allocation3 + $0x1a0] sm:$0xf] }
 0x3f1   :  { %3166 = vtanh.f32 %v1596_v33  ;;  %v1637_v32 = vor.u32 1.1754944e-38, %v1636_v34  ;;  %v1652_v49 = vor.u32 1.1754944e-38, %v1651_v1  ;;  %vm4232_vm7 = vcmp.eq.f32.partialorder %v1649_v18, 8.507059e+37  ;;  %v2801_v33 = vld [vmem:[#allocation3 + $0x1d8] sm:$0xf0] }
 0x3f2   :  { %v3157_v39 = vpop.eup %3156  ;;  %v2738_v63 = vmul.f32 -1.442695, %v1599_v4  ;;  %v2796_v4 = vor.u32 %v2992_v62, %v2795_v50  ;;  %v2816_v62 = vor.u32 %v2994_v47, %v2813_v48  ;;  %v2759_v48 = vld [vmem:[#allocation3 + $0x80] sm:$0xf] }
 0x3f3   :  { %v3159_v10 = vpop.eup %3158  ;;  %v4210_v57 = vadd.f32 1.0, %v3157_v39 }
 0x3f4   :  { %v3161_v43 = vpop.eup %3160  ;;  %v4213_v38 = vadd.f32 1.0, %v3159_v10  ;;  %3168 = vpow2.f32 %v2738_v63  ;;  %2125 = vmatpush.bf16.msrb.mxu0 %v2796_v4  ;;  %v2986_v4 = vld [vmem:[#allocation3 + $0x10c] sm:$0xf0]  ;;  %2152 = vmatpush.bf16.msrb.mxu2 %v2816_v62  ;;  %v2777_v62 = vld [vmem:[#allocation3 + $0x118] sm:$0xf0] }
 0x3f5   :  { %v3163_v59 = vpop.eup %3162  ;;  %v1626_v60 = vmul.f32 %v3161_v43, %v4197_v42  ;;  %3170 = vrcp.f32 %v4210_v57  ;;  %v1666_v20 = vand.u32 2147483648, %v4210_v57  ;;  %vm1631_vm6 = vweird.f32 %v3161_v43 }
 0x3f6   :  { %v3165_v7 = vpop.eup %3164  ;;  %v1641_v8 = vmul.f32 %v3163_v59, %v4201_v24  ;;  %3172 = vrcp.f32 %v4213_v38  ;;  %vm1646_vm14 = vweird.f32 %v3163_v59  ;;  %vm1660_vm12 = vweird.f32 %v4210_v57  ;;  %vm1632_vm15 = vmor %vm1630_vm3, %vm1631_vm6 }
 0x3f7   :  { %v1627_v27 = vsub.f32 1.0, %v1626_v60  ;;  %v4225_v35 = vadd.f32 1.0, %v3165_v7  ;;  %v3167_v55 = vpop.eup %3166  ;;  %v1664_v52 = vand.u32 2147483647, %v4210_v57  ;;  %v4244_v0 = vor.u32 1.1754944e-38, %v1666_v20  ;;  %vm1647_vm0 = vmor %vm1645_vm2, %vm1646_vm14 }
 0x3f8   :  { %v1642_v3 = vsub.f32 1.0, %v1641_v8  ;;  %v1679_v39 = vand.u32 2147483647, %v4213_v38  ;;  %v1681_v56 = vand.u32 2147483648, %v4213_v38  ;;  %v2800_v7 = vor.u32 %v2993_v44, %v2799_v28  ;;  %v2988_v28 = vld [vmem:[#allocation3 + $0x14c] sm:$0xf] }
 0x3f9   :  { %v1628_v2 = vmul.f32 %v3161_v43, %v1627_v27  ;;  %3174 = vrcp.f32 %v4225_v35  ;;  %v1696_v34 = vand.u32 2147483648, %v4225_v35  ;;  %v1694_v1 = vand.u32 2147483647, %v4225_v35  ;;  %v2789_v44 = vld [vmem:[#allocation3 + $0x178] sm:$0xf0] }
 0x3fa   :  { %v3169_v40 = vpop.eup %3168  ;;  %v1643_v6 = vmul.f32 %v3163_v59, %v1642_v3  ;;  %3176 = vtanh.f32 %v1600_v22  ;;  %vm4272_vm1 = vcmp.eq.f32.partialorder %v1679_v39, 8.507059e+37  ;;  %v1682_v60 = vor.u32 1.1754944e-38, %v1681_v56  ;;  %v2989_v3 = vld [vmem:[#allocation3 + $0x16c] sm:$0xf0]  ;;  %2139 = vmatpush.bf16.msrb.mxu1 %v2800_v7  ;;  %v2775_v56 = vld [vmem:[#allocation3 + $0xe8] sm:$0xf] }
 0x3fb   :  { %v4236_v46 = vpop.eup %3170  ;;  %v1629_v45 = vadd.f32 %v3161_v43, %v1628_v2  ;;  %v4239_v37 = vadd.f32 1.0, %v3169_v40  ;;  %v2991_v2 = vld [vmem:[#allocation3 + $0x1ac] sm:$0xf]  ;;  %vm1690_vm2 = vweird.f32 %v4225_v35  ;;  %vm4315_vm6 = vcmp.eq.f32.partialorder %v1694_v1, 8.507059e+37  ;;  %v2983_v1 = vld [vmem:[#allocation3 + $0xac] sm:$0xf0] }
 0x3fc   :  { %v1656_v14 = vmul.f32 %v4236_v46, %v4210_v57  ;;  %v1644_v21 = vadd.f32 %v3163_v59, %v1643_v6  ;;  %v4249_v31 = vpop.eup %3172  ;;  %vm1661_vm13 = vweird.f32 %v4236_v46 }
 0x3fd   :  { %v1633_v15 = vsel %vm1632_vm15, %v3161_v43, %v1629_v45  ;;  %3178 = vrcp.f32 %v4239_v37  ;;  %v1671_v25 = vmul.f32 %v4249_v31, %v4213_v38  ;;  %vm4288_vm9 = vmor %vm1660_vm12, %vm1661_vm13  ;;  %vm1676_vm10 = vweird.f32 %v4249_v31  ;;  %v2771_v45 = vld [vmem:[#allocation3 + $0xe0] sm:$0xf] }
 0x3fe   :  { %v1657_v19 = vsub.f32 1.0, %v1656_v14  ;;  %v1638_v63 = vsel %vm4219_vm8, %v1637_v32, %v1633_v15  ;;  %v1648_v42 = vsel %vm1647_vm0, %v3163_v59, %v1644_v21  ;;  %v2783_v32 = vld [vmem:[#allocation3 + $0x140] sm:$0xf]  ;;  %vm1675_vm8 = vweird.f32 %v4213_v38 }
 0x3ff   :  { %v4260_v24 = vpop.eup %3174  ;;  %v1653_v30 = vsel %vm4232_vm7, %v1652_v49, %v1648_v42  ;;  %v1719_v10 = vmul.f32 %v3167_v55, %v1638_v63  ;;  %v1672_v16 = vsub.f32 1.0, %v1671_v25  ;;  %v2787_v55 = vld [vmem:[#allocation3 + $0x148] sm:$0xf]  ;;  %v2990_v49 = vld [vmem:[#allocation3 + $0x174] sm:$0xf0]  ;;  %v1697_v14 = vor.u32 1.1754944e-38, %v1696_v34  ;;  %vm4311_vm3 = vmor %vm1675_vm8, %vm1676_vm10 }
 0x400   :  { %v4266_v11 = vpop.eup %3176  ;;  %v1658_v36 = vmul.f32 %v4236_v46, %v1657_v19  ;;  %v1717_v5 = vmul.f32 %v1653_v30, %v4160_v12  ;;  %v1686_v43 = vmul.f32 %v4260_v24, %v4225_v35  ;;  %vm1691_vm11 = vweird.f32 %v4260_v24  ;;  %v2987_v19 = vld [vmem:[#allocation3 + $0x114] sm:$0xf0]  ;;  %v1733_v34 = vld [vmem:[%s4650_s0 + $0x20] sm:$0xf] }
 0x401   :  { %v1673_v27 = vmul.f32 %v4249_v31, %v1672_v16  ;;  %v2784_v35 = vor.u32 %v2989_v3, %v2783_v32  ;;  %vm4321_vm14 = vmor %vm1690_vm2, %vm1691_vm11  ;;  %vm1728_vm7 = vcmp.gt.s32.totalorder %v4103_v58, 4  ;;  %v2788_v25 = vor.u32 %v2990_v49, %v2787_v55 }
 0x402   :  { %v4292_v18 = vadd.f32 %v1719_v10, %v1717_v5  ;;  %v1687_v22 = vsub.f32 1.0, %v1686_v43  ;;  %v1659_v50 = vadd.f32 %v4236_v46, %v1658_v36  ;;  %v1734_v36 = vld [vmem:[%s4650_s0 + $0x24] sm:$0xf]  ;;  %vm4342_vm12 = vmpackc.low %vm1728_vm7, %vm1728_vm7  ;;  %v2772_v16 = vor.u32 %v2986_v4, %v2771_v45  ;;  %v2751_v45 = vld [vmem:[#allocation3 + $0x28] sm:$0xf] }
 0x403   :  { %v4296_v20 = vpop.eup %3178  ;;  %v1674_v21 = vadd.f32 %v4249_v31, %v1673_v27  ;;  %2126 = vmatpush.bf16.msrb.mxu0 %v2784_v35  ;;  %vm1665_vm15 = vcmp.eq.f32.partialorder %v1664_v52, 8.507059e+37  ;;  %2140 = vmatpush.bf16.msrb.mxu1 %v2788_v25  ;;  %v2776_v47 = vor.u32 %v2987_v19, %v2775_v56  ;;  %v2792_v59 = vor.u32 %v2988_v28, %v2789_v44  ;;  %v2984_v27 = vld [vmem:[#allocation3 + $0xb4] sm:$0xf0]  ;;  %v2982_v35 = vld [vmem:[#allocation3 + $0x8c] sm:$0xf] }
 0x404   :  { %3180 = vtanh.f32 %v4292_v18  ;;  %v1688_v40 = vmul.f32 %v4260_v24, %v1687_v22  ;;  %v1701_v6 = vmul.f32 %v4296_v20, %v4239_v37  ;;  %v1663_v10 = vsel %vm4288_vm9, %v4236_v46, %v1659_v50  ;;  %v2985_v50 = vld [vmem:[#allocation3 + $0xec] sm:$0xf]  ;;  %v2981_v4 = vld [vmem:[#allocation3 + $0x54] sm:$0xf0]  ;;  %v2765_v56 = vld [vmem:[#allocation3 + $0xb8] sm:$0xf0] }
 0x405   :  { %v1678_v30 = vsel %vm4311_vm3, %v4249_v31, %v1674_v21  ;;  %v2804_v31 = vor.u32 %v2991_v2, %v2801_v33  ;;  %v1668_v57 = vsel %vm1665_vm15, %v4244_v0, %v1663_v10  ;;  %v1737_v52 = vsel %vm4280_vm5, %v1733_v34, %v4136_v26  ;;  %v1943_v26 = vld [vmem:[%s4650_s0 + $0x2c] sm:$0xf]  ;;  %v2747_v2 = vld [vmem:[#allocation3 + $0x20] sm:$0xf] }
 0x406   :  { %v1702_v42 = vsub.f32 1.0, %v1701_v6  ;;  %v1689_v38 = vadd.f32 %v4260_v24, %v1688_v40  ;;  %v1683_v46 = vsel %vm4272_vm1, %v1682_v60, %v1678_v30  ;;  %v2763_v60 = vld [vmem:[#allocation3 + $0x88] sm:$0xf]  ;;  %v1738_v3 = vsel %vm4342_vm12, %v1734_v36, %v4146_v54  ;;  %v2980_v40 = vld [vmem:[#allocation3 + $0x4c] sm:$0xf0] }
 0x407   :  { %v1720_v22 = vmul.f32 %v4266_v11, %v1683_v46  ;;  %2153 = vmatpush.bf16.msrb.mxu2 %v2804_v31  ;;  %v1942_v11 = vld [vmem:[%s4650_s0 + $0x28] sm:$0xf]  ;;  %2127 = vmatpush.bf16.msrb.mxu0 %v2772_v16  ;;  %v2760_v49 = vor.u32 %v2983_v1, %v2759_v48  ;;  %vm1938_vm0 = vcmp.gt.s32.totalorder %v4077_v41, 5  ;;  %vm1939_vm13 = vcmp.gt.s32.totalorder %v4103_v58, 5  ;;  %v2753_v30 = vld [vmem:[#allocation3 + $0x58] sm:$0xf0] }
 0x408   :  { %v1693_v43 = vsel %vm4321_vm14, %v4260_v24, %v1689_v38  ;;  %v1703_v7 = vmul.f32 %v4296_v20, %v1702_v42  ;;  %vm1706_vm1 = vweird.f32 %v4296_v20  ;;  %v1711_v54 = vand.u32 2147483648, %v4239_v37  ;;  %2141 = vmatpush.bf16.msrb.mxu1 %v2776_v47  ;;  %vm1944_vm5 = vmpackc.low %vm1938_vm0, %vm1938_vm0  ;;  %v4850_v16 = vld [vmem:[#allocation43_spill] sm:$0xff]  ;;  %v4851_v46 = vld [vmem:[#allocation44_spill] sm:$0xff] }
 0x409   :  { %v1698_v9 = vsel %vm4315_vm6, %v1697_v14, %v1693_v43  ;;  %v2764_v8 = vor.u32 %v2984_v27, %v2763_v60  ;;  %v2780_v33 = vor.u32 %v2985_v50, %v2777_v62  ;;  %vm1945_vm9 = vmpackc.low %vm1939_vm13, %vm1939_vm13  ;;  %v1946_v14 = vsel %vm1944_vm5, %v1942_v11, %v1737_v52  ;;  %v4853_v27 = vld [vmem:[#allocation46_spill] sm:$0xff]  ;;  %v3009_v11 = vld [vmem:[%s4653_s3 + $0x30] sm:$0xff] }
 0x40a   :  { %v3181_v32 = vpop.eup %3180  ;;  %v1718_v24 = vmul.f32 %v1698_v9, %v4171_v13  ;;  %v1704_v6 = vadd.f32 %v4296_v20, %v1703_v7  ;;  %v4386_v21 = vsel %vm1727_vm4, %v4292_v18, %v4160_v12  ;;  %v1947_v15 = vsel %vm1945_vm9, %v1943_v26, %v1738_v3 }
 0x40b   :  { %v1725_v55 = vmul.f32 %v3181_v32, %v1668_v57  ;;  %2154 = vmatpush.bf16.msrb.mxu2 %v2792_v59  ;;  %v1990_v39 = vunpack.c.l.b16 %v1946_v14  ;;  %vm1705_vm10 = vweird.f32 %v4239_v37  ;;  %v1709_v63 = vand.u32 2147483647, %v4239_v37  ;;  %2128 = vmatpush.bf16.msrb.mxu0 %v2760_v49  ;;  %v4852_v59 = vld [vmem:[#allocation45_spill] sm:$0xff] }
 0x40c   :  { %v1722_v0 = vadd.f32 %v1720_v22, %v1718_v24  ;;  %v2748_v42 = vor.u32 %v2980_v40, %v2747_v2  ;;  %v1991_v38 = vunpack.c.l.b16 %v1947_v15  ;;  %vm1707_vm11 = vmor %vm1705_vm10, %vm1706_vm1  ;;  %2142 = vmatpush.bf16.msrb.mxu1 %v2764_v8  ;;  %v2752_v12 = vor.u32 %v2981_v4, %v2751_v45  ;;  %v3010_v22 = vld [vmem:[%s4653_s3 + $0x38] sm:$0xff]  ;;  %v4854_v24 = vld [vmem:[#allocation47_spill] sm:$0xff] }
 0x40d   :  { %v1708_v18 = vsel %vm1707_vm11, %v4296_v20, %v1704_v6  ;;  %v2768_v28 = vor.u32 %v2982_v35, %v2765_v56  ;;  %v1712_v44 = vor.u32 1.1754944e-38, %v1711_v54  ;;  %vm1710_vm8 = vcmp.eq.f32.partialorder %v1709_v63, 8.507059e+37  ;;  %2382 = vmatpush.bf16.msrb.mxu3 %v3010_v22  ;;  %v3008_v40 = vld [vmem:[%s4653_s3 + $0x28] sm:$0xff] }
 0x40e   :  { %3182 = vtanh.f32 %v1722_v0  ;;  %v4391_v19 = vsel %vm1728_vm7, %v1722_v0, %v4171_v13  ;;  %v1992_v25 = vpack.c.b16 %v1991_v38, %v1990_v39  ;;  %v2979_v13 = vld [vmem:[#allocation3 + $0x2c] sm:$0xf]  ;;  %v4401_v5 = vsel %vm1727_vm4, %v1725_v55, %v4178_v17  ;;  %v4856_v39 = vld [vmem:[#allocation48_spill] sm:$0xff] }
 0x40f   :  { %2155 = vmatpush.bf16.msrb.mxu2 %v2780_v33  ;;  %2129 = vmatpush.bf16.msrb.mxu0 %v2748_v42  ;;  %v1713_v37 = vsel %vm1710_vm8, %v1712_v44, %v1708_v18  ;;  %v2756_v36 = vor.u32 %v2979_v13, %v2753_v30  ;;  %v324_v17 = vadd.f32 %v4850_v16, %v4799_v53  ;;  %v4855_v45 = vld [vmem:[#allocation51_spill] sm:$0xff]  ;;  %v3007_v42 = vld [vmem:[%s4653_s3 + $0x20] sm:$0xff]  ;;  %v3017_v16 = vld [vmem:[%s4653_s3 + $0x70] sm:$0xff] }
 0x410   :  { %2143 = vmatpush.bf16.msrb.mxu1 %v2752_v12  ;;  %v363_v43 = vadd.f32 %v4851_v46, %v4801_v61  ;;  %v402_v60 = vadd.f32 %v4852_v59, %v4803_v23  ;;  %v326_v32 = vadd.f32 %v4853_v27, %v4799_v53  ;;  %v365_v57 = vadd.f32 %v4854_v24, %v4801_v61  ;;  %v4431_v61 = vld [vmem:[%s4654_s4 + $0x4] sm:$0xf]  ;;  %v3016_v24 = vld [vmem:[%s4653_s3 + $0x68] sm:$0xff] }
 0x411   :  { %2383 = vmatpush.bf16.msrb.mxu3 %v3009_v11  ;;  %v404_v4 = vadd.f32 %v4855_v45, %v4803_v23  ;;  %v1982_v15 = vperm.slane %v4431_v61, 0  ;;  %v441_v35 = vadd.f32 %v4856_v39, %v4808_v29  ;;  %v3018_v23 = vld [vmem:[%s4653_s3 + $0x78] sm:$0xff] }
 0x413   :  { %2156 = vmatpush.bf16.msrb.mxu2 %v2768_v28 }
 0x414   :  { %v3183_v10 = vpop.eup %3182 }
 0x415   :  { %v1726_v34 = vmul.f32 %v3183_v10, %v1713_v37  ;;  %2384 = vmatpush.bf16.msrb.mxu3 %v3008_v40  ;;  %v3006_v10 = vld [vmem:[%s4653_s3 + $0x18] sm:$0xff] }
 0x417   :  { %v4406_v20 = vsel %vm1728_vm7, %v1726_v34, %v4183_v51  ;;  %2157 = vmatpush.bf16.msrb.mxu2 %v2756_v36  ;;  %v4857_v34 = vld [vmem:[#allocation53_spill] sm:$0xff] }
 0x418   :  { %v1747_v31 = vpack.c.bf16 %v4406_v20, %v4401_v5  ;;  %v443_v36 = vadd.f32 %v4857_v34, %v4808_v29 }
 0x419   :  { %2385 = vmatpush.bf16.msrb.mxu3 %v3007_v42 }
 0x41a   :  { %1756 = vmatmul.bf16.vlgmr.msra.gmra.mxu0 %v1747_v31  ;;  %1770 = vmatmul.bf16.vlgmr.msra.gmra.mxu1 %v1747_v31 }
 0x41b   :  { %1784 = vmatmul.bf16.vlgmr.msra.gmra.mxu2 %v1747_v31  ;;  %1798 = vmatmul.bf16.vlgmr.msra.gmra.mxu3 %v1747_v31 }
 0x41c   :  { %2396 = vmatpush.bf16.msra.mxu0 %v3018_v23 }
 0x41d   :  { %2386 = vmatpush.bf16.msrb.mxu3 %v3006_v10 }
 0x420   :  { %2397 = vmatpush.bf16.msra.mxu0 %v3017_v16 }
 0x424   :  { %2398 = vmatpush.bf16.msra.mxu0 %v3016_v24 }
 0x42a   :  { %2130 = vmatmul.bf16.vlgmr.msrb.gmra.mxu0 %v1992_v25  ;;  %2144 = vmatmul.bf16.vlgmr.msrb.gmra.mxu1 %v1992_v25 }
 0x42b   :  { %2158 = vmatmul.bf16.vlgmr.msrb.gmra.mxu2 %v1992_v25 }
 0x497   :  { %v1757_v47 = vpop.f32.mrf.mxu0  ;;  %v1771_v51 = vpop.f32.mrf.mxu1 }
 0x498   :  { %v1804_v48 = vadd.f32 %v1757_v47, %v324_v17  ;;  %v1805_v1 = vadd.f32 %v1771_v51, %v363_v43  ;;  %v1983_v43 = vperm.slane %v4431_v61, 2 }
 0x49a   :  { %v2739_v7 = vmul.f32 -1.442695, %v1804_v48  ;;  %v2740_v9 = vmul.f32 -1.442695, %v1805_v1 }
 0x49c   :  { %3184 = vpow2.f32 %v2739_v7 }
 0x49d   :  { %3186 = vpow2.f32 %v2740_v9 }
 0x49e   :  { %v1785_v52 = vpop.f32.mrf.mxu2  ;;  %v1799_v33 = vpop.f32.mrf.mxu3 }
 0x49f   :  { %v1806_v3 = vadd.f32 %v1785_v52, %v402_v60  ;;  %v1759_v50 = vpop.f32.mrf.mxu0  ;;  %v1773_v62 = vpop.f32.mrf.mxu1  ;;  %v1807_v12 = vadd.f32 %v1799_v33, %v441_v35  ;;  %v3005_v60 = vld [vmem:[%s4653_s3 + $0x10] sm:$0xff] }
 0x4a0   :  { %v1808_v55 = vadd.f32 %v1759_v50, %v326_v32  ;;  %v1809_v49 = vadd.f32 %v1773_v62, %v365_v57  ;;  %2387 = vmatpush.bf16.msrb.mxu3 %v3005_v60 }
 0x4a1   :  { %v2741_v26 = vmul.f32 -1.442695, %v1806_v3 }
 0x4a2   :  { %v3185_v54 = vpop.eup %3184  ;;  %v2742_v0 = vmul.f32 -1.442695, %v1808_v55  ;;  %v2743_v53 = vmul.f32 -1.442695, %v1809_v49 }
 0x4a3   :  { %v3187_v8 = vpop.eup %3186  ;;  %v4426_v2 = vadd.f32 1.0, %v3185_v54  ;;  %3188 = vpow2.f32 %v2741_v26 }
 0x4a4   :  { %v4436_v6 = vadd.f32 1.0, %v3187_v8  ;;  %3190 = vpow2.f32 %v2742_v0  ;;  %v3004_v8 = vld [vmem:[%s4653_s3 + $0x8] sm:$0xff] }
 0x4a5   :  { %3192 = vrcp.f32 %v4426_v2  ;;  %vm1841_vm4 = vweird.f32 %v4426_v2  ;;  %v1845_v22 = vand.u32 2147483647, %v4426_v2  ;;  %v1847_v59 = vand.u32 2147483648, %v4426_v2  ;;  %2388 = vmatpush.bf16.msrb.mxu3 %v3004_v8 }
 0x4a6   :  { %3194 = vrcp.f32 %v4436_v6  ;;  %v1787_v14 = vpop.f32.mrf.mxu2  ;;  %v1801_v48 = vpop.f32.mrf.mxu3  ;;  %v1862_v9 = vand.u32 2147483648, %v4436_v6  ;;  %v1860_v32 = vand.u32 2147483647, %v4436_v6  ;;  %vm1856_vm3 = vweird.f32 %v4436_v6 }
 0x4a7   :  { %3196 = vpow2.f32 %v2743_v53  ;;  %v1810_v56 = vadd.f32 %v1787_v14, %v404_v4  ;;  %v2131_v63 = vpop.f32.mrf.mxu0  ;;  %v2145_v47 = vpop.f32.mrf.mxu1  ;;  %v1811_v3 = vadd.f32 %v1801_v48, %v443_v36  ;;  %vm1846_vm7 = vcmp.eq.f32.partialorder %v1845_v22, 8.507059e+37 }
 0x4a8   :  { %v2132_v44 = vadd.f32 %v2131_v63, %v1982_v15  ;;  %v2146_v55 = vadd.f32 %v2145_v47, %v1983_v43  ;;  %v1863_v26 = vor.u32 1.1754944e-38, %v1862_v9  ;;  %v1848_v54 = vor.u32 1.1754944e-38, %v1847_v59 }
 0x4a9   :  { %v3189_v38 = vpop.eup %3188  ;;  %v2744_v18 = vmul.f32 -1.442695, %v1810_v56  ;;  %vm1861_vm15 = vcmp.eq.f32.partialorder %v1860_v32, 8.507059e+37 }
 0x4aa   :  { %v3191_v25 = vpop.eup %3190  ;;  %v4451_v28 = vadd.f32 1.0, %v3189_v38  ;;  %v2841_v1 = vmul.f32 -1.442695, %v2132_v44  ;;  %v2843_v56 = vmul.f32 -1.442695, %v2146_v55 }
 0x4ab   :  { %v3193_v13 = vpop.eup %3192  ;;  %v4455_v30 = vadd.f32 1.0, %v3191_v25  ;;  %3198 = vpow2.f32 %v2744_v18  ;;  %v3003_v25 = vld [vmem:[%s4653_s3] sm:$0xff] }
 0x4ac   :  { %v3195_v37 = vpop.eup %3194  ;;  %v1837_v31 = vmul.f32 %v3193_v13, %v4426_v2  ;;  %3200 = vrcp.f32 %v4451_v28  ;;  %vm1842_vm2 = vweird.f32 %v3193_v13  ;;  %v3015_v2 = vld [vmem:[%s4653_s3 + $0x60] sm:$0xff]  ;;  %2389 = vmatpush.bf16.msrb.mxu3 %v3003_v25 }
 0x4ad   :  { %v3197_v17 = vpop.eup %3196  ;;  %v1852_v46 = vmul.f32 %v3195_v37, %v4436_v6  ;;  %3202 = vtanh.f32 %v1807_v12  ;;  %vm1857_vm6 = vweird.f32 %v3195_v37  ;;  %vm1843_vm14 = vmor %vm1841_vm4, %vm1842_vm2  ;;  %vm1886_vm1 = vweird.f32 %v4455_v30  ;;  %2399 = vmatpush.bf16.msra.mxu0 %v3015_v2 }
 0x4ae   :  { %v1838_v51 = vsub.f32 1.0, %v1837_v31  ;;  %3204 = vrcp.f32 %v4455_v30  ;;  %v4471_v29 = vadd.f32 1.0, %v3197_v17  ;;  %vm1858_vm12 = vmor %vm1856_vm3, %vm1857_vm6  ;;  %v1890_v38 = vand.u32 2147483647, %v4455_v30 }
 0x4af   :  { %v1853_v7 = vsub.f32 1.0, %v1852_v46  ;;  %v2133_v12 = vpop.f32.mrf.mxu0  ;;  %v2147_v18 = vpop.f32.mrf.mxu1  ;;  %v1984_v2 = vperm.slane %v4431_v61, 3  ;;  %vm1871_vm6 = vweird.f32 %v4451_v28 }
 0x4b0   :  { %v1839_v27 = vmul.f32 %v3193_v13, %v1838_v51  ;;  %3206 = vrcp.f32 %v4471_v29  ;;  %vm1901_vm5 = vweird.f32 %v4471_v29  ;;  %v1907_v10 = vand.u32 2147483648, %v4471_v29  ;;  %v3013_v51 = vld [vmem:[%s4653_s3 + $0x50] sm:$0xff] }
 0x4b1   :  { %v3199_v57 = vpop.eup %3198  ;;  %v1854_v52 = vmul.f32 %v3195_v37, %v1853_v7  ;;  %3208 = vpow2.f32 %v2841_v1  ;;  %v2134_v46 = vadd.f32 %v2133_v12, %v1982_v15  ;;  %v2148_v47 = vadd.f32 %v2147_v18, %v1983_v43 }
 0x4b2   :  { %v4485_v50 = vpop.eup %3200  ;;  %v1840_v62 = vadd.f32 %v3193_v13, %v1839_v27  ;;  %v4487_v11 = vadd.f32 1.0, %v3199_v57  ;;  %v1905_v9 = vand.u32 2147483647, %v4471_v29  ;;  %v1908_v57 = vor.u32 1.1754944e-38, %v1907_v10 }
 0x4b3   :  { %v3203_v49 = vpop.eup %3202  ;;  %v1855_v0 = vadd.f32 %v3195_v37, %v1854_v52  ;;  %v1867_v40 = vmul.f32 %v4485_v50, %v4451_v28  ;;  %v2842_v15 = vmul.f32 -1.442695, %v2134_v46  ;;  %v2844_v32 = vmul.f32 -1.442695, %v2148_v47 }
 0x4b4   :  { %v4497_v53 = vpop.eup %3204  ;;  %v1844_v33 = vsel %vm1843_vm14, %v3193_v13, %v1840_v62  ;;  %3210 = vrcp.f32 %v4487_v11  ;;  %vm1891_vm4 = vcmp.eq.f32.partialorder %v1890_v38, 8.507059e+37  ;;  %vm1906_vm2 = vcmp.eq.f32.partialorder %v1905_v9, 8.507059e+37 }
 0x4b5   :  { %v1849_v45 = vsel %vm1846_vm7, %v1848_v54, %v1844_v33  ;;  %v1859_v4 = vsel %vm1858_vm12, %v3195_v37, %v1855_v0  ;;  %v1882_v14 = vmul.f32 %v4497_v53, %v4455_v30  ;;  %3212 = vtanh.f32 %v1811_v3  ;;  %v3012_v3 = vld [vmem:[%s4653_s3 + $0x48] sm:$0xff] }
 0x4b6   :  { %v3207_v6 = vpop.eup %3206  ;;  %v1864_v39 = vsel %vm1861_vm15, %v1863_v26, %v1859_v4  ;;  %v1930_v35 = vmul.f32 %v3203_v49, %v1849_v45  ;;  %v1868_v13 = vsub.f32 1.0, %v1867_v40  ;;  %v1892_v37 = vand.u32 2147483648, %v4455_v30  ;;  %v3011_v45 = vld [vmem:[%s4653_s3 + $0x40] sm:$0xff] }
 0x4b7   :  { %v1928_v63 = vmul.f32 %v1864_v39, %v4386_v21  ;;  %v1883_v42 = vsub.f32 1.0, %v1882_v14  ;;  %v1897_v23 = vmul.f32 %v3207_v6, %v4471_v29  ;;  %v3209_v44 = vpop.eup %3208  ;;  %v3014_v21 = vld [vmem:[%s4653_s3 + $0x58] sm:$0xff]  ;;  %vm1887_vm9 = vweird.f32 %v4497_v53  ;;  %v2159_v29 = vpop.f32.mrf.mxu2 }
 0x4b8   :  { %v4527_v17 = vadd.f32 1.0, %v3209_v44  ;;  %3214 = vpow2.f32 %v2843_v56  ;;  %2400 = vmatpush.bf16.msra.mxu0 %v3014_v21  ;;  %vm1902_vm10 = vweird.f32 %v3207_v6  ;;  %v1893_v59 = vor.u32 1.1754944e-38, %v1892_v37  ;;  %vm1888_vm11 = vmor %vm1886_vm1, %vm1887_vm9 }
 0x4b9   :  { %v1932_v34 = vadd.f32 %v1930_v35, %v1928_v63  ;;  %v1898_v36 = vsub.f32 1.0, %v1897_v23  ;;  %v1884_v31 = vmul.f32 %v4497_v53, %v1883_v42  ;;  %v1869_v43 = vmul.f32 %v4485_v50, %v1868_v13  ;;  %vm4548_vm8 = vmor %vm1901_vm5, %vm1902_vm10 }
 0x4ba   :  { %v4525_v16 = vpop.eup %3210  ;;  %3216 = vrcp.f32 %v4527_v17  ;;  %vm1872_vm3 = vweird.f32 %v4485_v50  ;;  %v1877_v33 = vand.u32 2147483648, %v4451_v28  ;;  %v1875_v4 = vand.u32 2147483647, %v4451_v28 }
 0x4bb   :  { %v3213_v48 = vpop.eup %3212  ;;  %v1899_v1 = vmul.f32 %v3207_v6, %v1898_v36  ;;  %v1912_v7 = vmul.f32 %v4525_v16, %v4487_v11  ;;  %v1885_v22 = vadd.f32 %v4497_v53, %v1884_v31  ;;  %3218 = vpow2.f32 %v2842_v15  ;;  %vm4575_vm14 = vmor %vm1871_vm6, %vm1872_vm3 }
 0x4bc   :  { %2401 = vmatpush.bf16.msra.mxu0 %v3013_v51  ;;  %3220 = vpow2.f32 %v2844_v32  ;;  %v1870_v0 = vadd.f32 %v4485_v50, %v1869_v43  ;;  %vm1917_vm7 = vweird.f32 %v4525_v16  ;;  %v1922_v35 = vand.u32 2147483648, %v4487_v11 }
 0x4bd   :  { %v1913_v60 = vsub.f32 1.0, %v1912_v7  ;;  %v1900_v27 = vadd.f32 %v3207_v6, %v1899_v1  ;;  %v1889_v52 = vsel %vm1888_vm11, %v4497_v53, %v1885_v22  ;;  %3222 = vtanh.f32 %v1932_v34 }
 0x4be   :  { %v1894_v30 = vsel %vm1891_vm4, %v1893_v59, %v1889_v52  ;;  %v3215_v55 = vpop.eup %3214  ;;  %v1874_v28 = vsel %vm4575_vm14, %v4485_v50, %v1870_v0  ;;  %v1878_v38 = vor.u32 1.1754944e-38, %v1877_v33  ;;  %vm1916_vm12 = vweird.f32 %v4487_v11 }
 0x4bf   :  { %v1904_v62 = vsel %vm4548_vm8, %v3207_v6, %v1900_v27  ;;  %v1914_v49 = vmul.f32 %v4525_v16, %v1913_v60  ;;  %v1931_v54 = vmul.f32 %v3213_v48, %v1894_v30  ;;  %v4562_v53 = vadd.f32 1.0, %v3215_v55  ;;  %vm4594_vm1 = vmor %vm1916_vm12, %vm1917_vm7  ;;  %v2161_v37 = vpop.f32.mrf.mxu2 }
 0x4c0   :  { %v1909_v26 = vsel %vm1906_vm2, %v1908_v57, %v1904_v62  ;;  %v4564_v40 = vpop.eup %3216  ;;  %2402 = vmatpush.bf16.msra.mxu0 %v3012_v3  ;;  %v1920_v12 = vand.u32 2147483647, %v4487_v11  ;;  %vm1876_vm15 = vcmp.eq.f32.partialorder %v1875_v4, 8.507059e+37  ;;  %v2160_v50 = vadd.f32 %v2159_v29, %v1984_v2 }
 0x4c1   :  { %v1929_v8 = vmul.f32 %v1909_v26, %v4391_v19  ;;  %v2173_v19 = vmul.f32 %v4564_v40, %v4527_v17  ;;  %v3219_v6 = vpop.eup %3218  ;;  %v1915_v61 = vadd.f32 %v4525_v16, %v1914_v49  ;;  %3224 = vrcp.f32 %v4562_v53 }
 0x4c2   :  { %v3221_v56 = vpop.eup %3220  ;;  %v4586_v42 = vadd.f32 1.0, %v3219_v6  ;;  %v1879_v11 = vsel %vm1876_vm15, %v1878_v38, %v1874_v28  ;;  %v1923_v10 = vor.u32 1.1754944e-38, %v1922_v35  ;;  %vm1921_vm5 = vcmp.eq.f32.partialorder %v1920_v12, 8.507059e+37  ;;  %v3023_v12 = vld [vmem:[%s4654_s4 + $0x8] ss:$0 sm:$0xff] }
 0x4c3   :  { %v1933_v14 = vadd.f32 %v1931_v54, %v1929_v8  ;;  %v2174_v63 = vsub.f32 1.0, %v2173_v19  ;;  %v3223_v23 = vpop.eup %3222  ;;  %v4590_v18 = vadd.f32 1.0, %v3221_v56  ;;  %v1919_v13 = vsel %vm4594_vm1, %v4525_v16, %v1915_v61 }
 0x4c4   :  { %2403 = vmatpush.bf16.msra.mxu0 %v3011_v45  ;;  %v1936_v21 = vmul.f32 %v3223_v23, %v1879_v11  ;;  %vm2178_vm9 = vweird.f32 %v4564_v40  ;;  %v2183_v46 = vand.u32 2147483648, %v4527_v17  ;;  %v1924_v47 = vsel %vm1921_vm5, %v1923_v10, %v1919_v13 }
 0x4c5   :  { %3226 = vtanh.f32 %v1933_v14  ;;  %v2175_v44 = vmul.f32 %v4564_v40, %v2174_v63  ;;  %vm2177_vm10 = vweird.f32 %v4527_v17  ;;  %v2181_v16 = vand.u32 2147483647, %v4527_v17 }
 0x4c6   :  { %3228 = vrcp.f32 %v4586_v42  ;;  %v2162_v51 = vadd.f32 %v2161_v37, %v1984_v2  ;;  %vm4613_vm11 = vmor %vm2177_vm10, %vm2178_vm9  ;;  %v1940_v17 = vsel %vm1938_vm0, %v1936_v21, %v4401_v5  ;;  %v2184_v27 = vor.u32 1.1754944e-38, %v2183_v46 }
 0x4c7   :  { %3230 = vrcp.f32 %v4590_v18  ;;  %v4604_v34 = vpop.eup %3224  ;;  %v2176_v36 = vadd.f32 %v4564_v40, %v2175_v44  ;;  %vm2182_vm8 = vcmp.eq.f32.partialorder %v2181_v16, 8.507059e+37  ;;  %v2198_v62 = vand.u32 2147483648, %v4586_v42 }
 0x4c8   :  { %3232 = vtanh.f32 %v2160_v50  ;;  %v2211_v7 = vmul.f32 %v4604_v34, %v4562_v53  ;;  %v2196_v5 = vand.u32 2147483647, %v4586_v42  ;;  %vm2215_vm3 = vweird.f32 %v4562_v53 }
 0x4c9   :  { %v2180_v15 = vsel %vm4613_vm11, %v4564_v40, %v2176_v36  ;;  %3234 = vtanh.f32 %v2162_v51  ;;  %v2199_v49 = vor.u32 1.1754944e-38, %v2198_v62  ;;  %vm2216_vm6 = vweird.f32 %v4604_v34 }
 0x4ca   :  { %v2212_v52 = vsub.f32 1.0, %v2211_v7  ;;  %v2185_v30 = vsel %vm2182_vm8, %v2184_v27, %v2180_v15  ;;  %vm2197_vm2 = vcmp.eq.f32.partialorder %v2196_v5, 8.507059e+37  ;;  %v2221_v2 = vand.u32 2147483648, %v4562_v53  ;;  %vm2217_vm7 = vmor %vm2215_vm3, %vm2216_vm6 }
 0x4cb   :  { %v3227_v31 = vpop.eup %3226  ;;  %v2236_v45 = vand.u32 2147483648, %v4590_v18  ;;  %v2219_v4 = vand.u32 2147483647, %v4562_v53  ;;  %vm2230_vm12 = vweird.f32 %v4590_v18  ;;  %v2234_v14 = vand.u32 2147483647, %v4590_v18 }
 0x4cc   :  { %v1937_v48 = vmul.f32 %v3227_v31, %v1924_v47  ;;  %v3229_v1 = vpop.eup %3228  ;;  %v2213_v29 = vmul.f32 %v4604_v34, %v2212_v52  ;;  %v2222_v61 = vor.u32 1.1754944e-38, %v2221_v2 }
 0x4cd   :  { %v3231_v22 = vpop.eup %3230  ;;  %v2188_v59 = vmul.f32 %v3229_v1, %v4586_v42  ;;  %vm2193_vm0 = vweird.f32 %v3229_v1  ;;  %v2237_v35 = vor.u32 1.1754944e-38, %v2236_v45  ;;  %vm2220_vm1 = vcmp.eq.f32.partialorder %v2219_v4, 8.507059e+37 }
 0x4ce   :  { %v1941_v43 = vsel %vm1939_vm13, %v1937_v48, %v4406_v20  ;;  %v2226_v60 = vmul.f32 %v3231_v22, %v4590_v18  ;;  %v3233_v57 = vpop.eup %3232  ;;  %vm2192_vm13 = vweird.f32 %v4586_v42  ;;  %v2214_v40 = vadd.f32 %v4604_v34, %v2213_v29 }
 0x4cf   :  { %v2248_v32 = vpack.c.bf16 %v1941_v43, %v1940_v17  ;;  %v2189_v24 = vsub.f32 1.0, %v2188_v59  ;;  %v2242_v58 = vmul.f32 %v3233_v57, %v2185_v30  ;;  %vm2194_vm4 = vmor %vm2192_vm13, %vm2193_vm0  ;;  %v3235_v26 = vpop.eup %3234  ;;  %vm2231_vm14 = vweird.f32 %v3231_v22 }
 0x4d0   :  { %v2227_v3 = vsub.f32 1.0, %v2226_v60  ;;  %vm2232_vm15 = vmor %vm2230_vm12, %vm2231_vm14  ;;  %v2218_v19 = vsel %vm2217_vm7, %v4604_v34, %v2214_v40  ;;  %vm2235_vm5 = vcmp.eq.f32.partialorder %v2234_v14, 8.507059e+37 }
 0x4d1   :  { %2390 = vmatmul.bf16.vlgmr.msrb.gmra.mxu3 %v2248_v32  ;;  %v2190_v41 = vmul.f32 %v3229_v1, %v2189_v24  ;;  %3236 = vtanh.f32 %v2242_v58  ;;  %v2223_v28 = vsel %vm2220_vm1, %v2222_v61, %v2218_v19 }
 0x4d2   :  { %v2228_v55 = vmul.f32 %v3231_v22, %v2227_v3 }
 0x4d3   :  { %v2191_v20 = vadd.f32 %v3229_v1, %v2190_v41 }
 0x4d4   :  { %v2229_v33 = vadd.f32 %v3231_v22, %v2228_v55 }
 0x4d5   :  { %v2195_v54 = vsel %vm2194_vm4, %v3229_v1, %v2191_v20 }
 0x4d6   :  { %v2200_v0 = vsel %vm2197_vm2, %v2199_v49, %v2195_v54  ;;  %v2233_v6 = vsel %vm2232_vm15, %v3231_v22, %v2229_v33 }
 0x4d7   :  { %v2243_v8 = vmul.f32 %v3235_v26, %v2200_v0  ;;  %v3237_v39 = vpop.eup %3236  ;;  %v2238_v63 = vsel %vm2235_vm5, %v2237_v35, %v2233_v6 }
 0x4d8   :  { %v2246_v42 = vmul.f32 %v3237_v39, %v2223_v28 }
 0x4d9   :  { %3238 = vtanh.f32 %v2243_v8 }
 0x4df   :  { %v3239_v56 = vpop.eup %3238 }
 0x4e0   :  { %v2247_v23 = vmul.f32 %v3239_v56, %v2238_v63 }
 0x4e2   :  { %v2249_v38 = vpack.c.bf16 %v2247_v23, %v2246_v42 }
 0x4e4   :  { %2404 = vmatmul.bf16.vlgmr.msra.gmra.mxu0 %v2249_v38 }
 0x554   :  { %v2391_v53 = vpop.f32.mrf.mxu3 }
 0x555   :  { %v2392_v18 = vadd.f32 %v3023_v12, %v2391_v53 }
 0x55c   :  { %v2393_v44 = vpop.f32.mrf.mxu3 }
 0x55d   :  { %v2394_v13 = vadd.f32 %v3023_v12, %v2393_v44 }
 0x561   :  { %v2405_v25 = vpop.f32.mrf.mxu0 }
 0x562   :  { %v2406_v50 = vadd.f32 %v2405_v25, %v2392_v18 }
 0x564   :  { %2410 = vst [vmem:[%s4655_s5] sm:$0xff] %v2406_v50 }
 0x569   :  { %v2407_v11 = vpop.f32.mrf.mxu0 }
 0x56a   :  { %v2408_v10 = vadd.f32 %v2407_v11, %v2394_v13 }
 0x56c   :  { %2411 = vst [vmem:[%s4655_s5 + $0x8] sm:$0xff] %v2408_v10 }
 0x56d   :  { %2416 = vsyncpa [#allocation4], 1 }

</bundles_post_ra>
